<compile_context>
chip_gen: v5e
topology: v5e:2x2
jax: 0.10.0
libtpu: 0.0.40
codegen_flags: <defaults>
</compile_context>

<pallas_src>
import functools

import jax
import jax.numpy as jnp
from jax.experimental import pallas as pl
from jax.experimental.pallas import tpu as pltpu

HIDDEN_C = 128  # matches self.in_channels = 128 in CNNNet


def _round_up(x, m):
    return ((x + m - 1) // m) * m


# Device-aware scoped-VMEM budget: <= 48 MiB on v7x (64 MiB physical/TC),
# 64 MiB on v5e/v6e (128 MiB physical).
try:
    _VMEM_CAP = int(pltpu.get_tpu_info().vmem_capacity_bytes)
except Exception:  # conservative fallback if the query is unavailable
    _VMEM_CAP = 64 * 1024 * 1024
_VMEM_LIMIT = int(min(64 << 20, max(32 << 20, (_VMEM_CAP * 3) // 4)))


# ----------------------------- Pallas kernels ------------------------------

def _matmul_affine_kernel(x_ref, w_ref, shift_ref, o_ref, *, relu):
    # (tm, K)bf16 @ (K, C)bf16 -> f32 accum; BN scale pre-folded into w, so the
    # epilogue is only + shift (and optional ReLU).
    y = jnp.dot(x_ref[...], w_ref[...], preferred_element_type=jnp.float32)
    y = y + shift_ref[...]
    if relu:
        y = jnp.maximum(y, 0.0)
    o_ref[...] = y.astype(o_ref.dtype)


def _head_kernel(*refs, h, w, nblk, residual):
    # refs = [x, (wa, sa, wb, sb) * nblk, fc_w, fc_b,   <- inputs
    #         feat, gap, logits,                        <- outputs
    #         pad]                                      <- scratch (if nblk)
    x_ref = refs[0]
    fc_w_ref = refs[1 + 4 * nblk]
    fc_b_ref = refs[2 + 4 * nblk]
    feat_ref = refs[3 + 4 * nblk]
    gap_ref = refs[4 + 4 * nblk]
    logit_ref = refs[5 + 4 * nblk]

    bt, s, c = x_ref.shape
    x = x_ref[...]                                    # (bt, s, c) bf16
    xf = x.reshape(bt * s, c)                         # running activation, bf16
    y = xf.astype(jnp.float32)                        # latest block output, f32

    if nblk:
        pad_ref = refs[6 + 4 * nblk]
        # Zeroed once per grid step: every block fully rewrites the interior
        # [:, 1:h+1, 1:w+1, :] and never touches the border, so the border
        # stays zero across all blocks of this step.  (Not gated on
        # program_id==0 because a "parallel" grid gives each TensorCore its
        # own private scratch copy; this per-step zero is only ~9 KiB.)
        pad_ref[...] = jnp.zeros_like(pad_ref)

    for i in range(nblk):
        wa_ref, sa_ref, wb_ref, sb_ref = refs[1 + 4 * i:5 + 4 * i]
        # 1x1 conv + BN + ReLU (BN scale folded into wa -> epilogue is +shift).
        mid = jnp.dot(xf, wa_ref[...], preferred_element_type=jnp.float32)
        mid = jnp.maximum(mid + sa_ref[...], 0.0).astype(jnp.bfloat16)
        pad_ref[:, 1:h + 1, 1:w + 1, :] = mid.reshape(bt, h, w, c)

        # 3x3 conv as 9 shifted-window (bt*h*w, C)x(C, C) matmuls, f32 accum
        # (no im2col slab ever leaves VMEM).
        # TODO(synk): for larger H*W use pltpu.roll + iota masks instead of
        #             sublane-unaligned window reads.
        acc = jnp.zeros((bt * s, c), jnp.float32)
        for kh in range(3):
            for kw in range(3):
                win = pad_ref[:, kh:kh + h, kw:kw + w, :].reshape(bt * s, c)
                acc = acc + jnp.dot(win, wb_ref[kh * 3 + kw],
                                    preferred_element_type=jnp.float32)
        y = acc + sb_ref[...]
        if residual:
            y = jnp.maximum(y + xf.astype(jnp.float32), 0.0)
        xf = y.astype(jnp.bfloat16)

    # layer1 output, GAP and FC (bf16 operands, f32 accumulation).
    y3 = y.reshape(bt, s, c)
    feat_ref[...] = y3.astype(feat_ref.dtype)
    gap = jnp.mean(y3, axis=1)                        # (bt, c) f32
    gap_ref[...] = gap.reshape(bt, 1, c)
    logits = jnp.dot(gap.astype(jnp.bfloat16), fc_w_ref[...],
                     preferred_element_type=jnp.float32) + fc_b_ref[...]
    logit_ref[...] = logits.reshape(bt, 1, logits.shape[-1])


# ----------------------------- kernel wrappers ------------------------------

def matmul_affine(x, w, shift, *, relu, out_dtype, tm=1024):
    """Gridded (M,K)@(K,C) + per-channel shift (+ReLU). x/w should be bf16."""
    m, k = x.shape
    c = w.shape[1]
    if m <= 256:
        tm_eff = _round_up(m, 8)          # single tile; too small to split
        m_pad = tm_eff
    else:
        m128 = _round_up(m, 128)
        # >= 2 parallel grid steps (v7x has 2 TensorCores) ...
        tm_eff = min(_round_up(tm, 128), _round_up(pl.cdiv(m128, 2), 128))
        # ... and cap padding waste at half a tile.
        while tm_eff > 128 and _round_up(m128, tm_eff) - m128 > tm_eff // 2:
            tm_eff = _round_up(tm_eff // 2, 128)
        m_pad = _round_up(m128, tm_eff)
    if m_pad != m:
        x = jnp.pad(x, ((0, m_pad - m), (0, 0)))
    out = pl.pallas_call(
        functools.partial(_matmul_affine_kernel, relu=relu),
        out_shape=jax.ShapeDtypeStruct((m_pad, c), out_dtype),
        grid=(m_pad // tm_eff,),
        in_specs=[
            pl.BlockSpec((tm_eff, k), lambda i: (i, 0)),
            pl.BlockSpec((k, c), lambda i: (0, 0)),
            pl.BlockSpec((1, c), lambda i: (0, 0)),
        ],
        out_specs=pl.BlockSpec((tm_eff, c), lambda i: (i, 0)),
        compiler_params=pltpu.CompilerParams(
            dimension_semantics=("parallel",),
            vmem_limit_bytes=_VMEM_LIMIT),
        cost_estimate=pl.CostEstimate(
            flops=int(2 * m_pad * k * c),
            bytes_accessed=int(m_pad * k * x.dtype.itemsize
                               + k * c * w.dtype.itemsize + c * 4
                               + m_pad * c * jnp.dtype(out_dtype).itemsize),
            transcendentals=0),
    )(x, w, shift)
    return out[:m] if m_pad != m else out


def _batch_tile(n, cap=32):
    """Largest divisor of n (<= cap) that still leaves >= 2 grid steps."""
    best = 1
    for d in range(1, min(n, cap) + 1):
        if n % d == 0 and (n // d >= 2 or n == 1):
            best = d
    return best


def fused_head(x_nsc, block_params, fc_w, fc_b, h, w, *, residual):
    """maxpooled activations -> residual blocks -> GAP -> FC, one fused kernel.

    Gridded over batch tiles; all weights stay resident in VMEM; intermediate
    activations never leave VMEM.
    """
    n, s, c = x_nsc.shape
    assert s == h * w
    nblk = len(block_params)
    ncls = fc_w.shape[1]
    ncp = _round_up(ncls, 128)
    fc_w_p = jnp.pad(fc_w.astype(jnp.float32),
                     ((0, 0), (0, ncp - ncls))).astype(jnp.bfloat16)
    fc_b_p = jnp.pad(fc_b.reshape(1, -1).astype(jnp.float32),
                     ((0, 0), (0, ncp - ncls)))

    bt = _batch_tile(n)
    grid = (n // bt,)

    in_specs = [pl.BlockSpec((bt, s, c), lambda b: (b, 0, 0))]
    ins = [x_nsc]
    for (wa, sa, wb, sb) in block_params:
        in_specs += [
            pl.BlockSpec((c, c), lambda b: (0, 0)),
            pl.BlockSpec((1, c), lambda b: (0, 0)),
            pl.BlockSpec((9, c, c), lambda b: (0, 0, 0)),
            pl.BlockSpec((1, c), lambda b: (0, 0)),
        ]
        ins += [wa, sa, wb, sb]
    in_specs += [pl.BlockSpec((c, ncp), lambda b: (0, 0)),
                 pl.BlockSpec((1, ncp), lambda b: (0, 0))]
    ins += [fc_w_p, fc_b_p]

    out_shapes = (jax.ShapeDtypeStruct((n, s, c), jnp.float32),
                  jax.ShapeDtypeStruct((n, 1, c), jnp.float32),
                  jax.ShapeDtypeStruct((n, 1, ncp), jnp.float32))
    out_specs = (pl.BlockSpec((bt, s, c), lambda b: (b, 0, 0)),
                 pl.BlockSpec((bt, 1, c), lambda b: (b, 0, 0)),
                 pl.BlockSpec((bt, 1, ncp), lambda b: (b, 0, 0)))
    scratch = ([pltpu.VMEM((bt, h + 2, w + 2, c), jnp.bfloat16)]
               if nblk else [])

    feat, gap, logits = pl.pallas_call(
        functools.partial(_head_kernel, h=h, w=w, nblk=nblk, residual=residual),
        out_shape=out_shapes,
        grid=grid,
        in_specs=in_specs,
        out_specs=out_specs,
        scratch_shapes=scratch,
        compiler_params=pltpu.CompilerParams(
            dimension_semantics=("parallel",),
            vmem_limit_bytes=_VMEM_LIMIT),
        cost_estimate=pl.CostEstimate(
            flops=int(2 * n * s * c * c * 10 * max(nblk, 1) + 2 * n * c * ncp),
            bytes_accessed=int(n * s * c * (2 + 4)
                               + nblk * (10 * c * c * 2 + 2 * c * 4)
                               + c * ncp * 2 + n * (c + ncp) * 4),
            transcendentals=0),
    )(*ins)
    return feat, gap.reshape(n, c), logits.reshape(n, ncp)[:, :ncls]


# ------------------------------- JAX glue -----------------------------------

def _im2col(x_nhwc, k, stride, pad, k_pad_to=None):
    """(N,H,W,C) -> (N,Ho,Wo,K) with tap order (kh, kw, ci).

    Optional K padding is folded into the concatenate so no second padded slab
    is materialized through HBM.
    """
    n, h, w, c = x_nhwc.shape
    ho = (h + 2 * pad - k) // stride + 1
    wo = (w + 2 * pad - k) // stride + 1
    xp = jnp.pad(x_nhwc, ((0, 0), (pad, pad), (pad, pad), (0, 0)))
    cols = [xp[:, kh:kh + stride * ho:stride, kw:kw + stride * wo:stride, :]
            for kh in range(k) for kw in range(k)]
    ktot = k * k * c
    if k_pad_to is not None and k_pad_to > ktot:
        cols.append(jnp.zeros((n, ho, wo, k_pad_to - ktot), x_nhwc.dtype))
    return jnp.concatenate(cols, axis=-1), ho, wo


def _maxpool_nhwc(x_nhwc, k=3, stride=2, pad=1):
    """3x3/s2/p1 max pool via XLA strided-slice maxima (no Pallas launch, no
    taps slab).  Zero padding is safe because inputs are post-ReLU (>= 0) and
    no window is entirely padding at these sizes."""
    n, h, w, c = x_nhwc.shape
    ho = (h + 2 * pad - k) // stride + 1
    wo = (w + 2 * pad - k) // stride + 1
    xp = jnp.pad(x_nhwc, ((0, 0), (pad, pad), (pad, pad), (0, 0)))
    out = None
    for kh in range(k):
        for kw in range(k):
            tap = xp[:, kh:kh + stride * ho:stride, kw:kw + stride * wo:stride, :]
            out = tap if out is None else jnp.maximum(out, tap)
    return out, ho, wo


def _fold_bn(gamma, beta, mean, var, conv_bias=None, eps=1e-5):
    scale = gamma / jnp.sqrt(var + eps)
    bias = conv_bias if conv_bias is not None else 0.0
    shift = (bias - mean) * scale + beta
    return (scale.reshape(1, -1).astype(jnp.float32),
            shift.reshape(1, -1).astype(jnp.float32))


# --------------------------- parameters / forward ---------------------------

def init_params(key, image_channels, num_classes, num_hidden_block):
    c = HIDDEN_C
    keys = iter(jax.random.split(key, 128))

    def nrm(shape, std):
        return jax.random.normal(next(keys), shape, jnp.float32) * std

    def bn(ch):
        return dict(
            gamma=1.0 + 0.1 * nrm((ch,), 1.0),
            beta=0.1 * nrm((ch,), 1.0),
            mean=0.1 * nrm((ch,), 1.0),
            var=1.0 + 0.1 * jnp.abs(nrm((ch,), 1.0)),
        )

    params = {
        "conv1_w": nrm((7, 7, image_channels, c),
                       (2.0 / (49 * image_channels)) ** 0.5),
        "bn1": bn(c),
        "blocks": [],
        "fc_w": nrm((c, num_classes), (1.0 / c) ** 0.5),
        "fc_b": 0.05 * nrm((num_classes,), 1.0),
    }
    # _make_layer(block, num_block, res) builds range(1, num_block) blocks.
    for _ in range(num_hidden_block - 1):
        params["blocks"].append(dict(
            w_a=nrm((c, c), (2.0 / c) ** 0.5),              # 1x1 conv
            b_a=0.05 * nrm((c,), 1.0),
            bn_a=bn(c),
            w_b=nrm((3, 3, c, c), (2.0 / (9 * c)) ** 0.5),  # 3x3 conv
            b_b=0.05 * nrm((c,), 1.0),
            bn_b=bn(c),
        ))
    return params


def cnnnet_forward(params, x_nchw, residual=True):
    c = HIDDEN_C
    n = x_nchw.shape[0]
    x = jnp.transpose(x_nchw, (0, 2, 3, 1)).astype(jnp.bfloat16)  # NCHW->NHWC
    ci = x.shape[-1]

    # conv1 (7x7, s2, p3, no bias) + bn1 + relu -> gridded bf16 matmul kernel.
    k1 = 49 * ci
    k1p = _round_up(k1, 128)                               # e.g. 196 -> 256
    cols, h1, w1_ = _im2col(x, k=7, stride=2, pad=3, k_pad_to=k1p)
    cols2 = cols.reshape(n * h1 * w1_, k1p)
    s1, t1 = _fold_bn(**params["bn1"])
    w1 = params["conv1_w"].reshape(k1, c) * s1             # fold BN scale
    w1 = jnp.pad(w1, ((0, k1p - k1), (0, 0)))              # tiny one-time pad
    y = matmul_affine(cols2, w1.astype(jnp.bfloat16), t1,
                      relu=True, out_dtype=jnp.bfloat16)
    y = y.reshape(n, h1, w1_, c)

    # maxpool 3x3/s2/p1 via XLA slice maxima (fused by XLA; no taps slab).
    y, h2, w2 = _maxpool_nhwc(y, k=3, stride=2, pad=1)
    y = y.reshape(n, h2 * w2, c)                           # (N, S, C) bf16

    # layer1 + GAP + FC: one fused, batch-tiled Pallas kernel.
    blocks = []
    for blk in params["blocks"]:
        s_a, t_a = _fold_bn(conv_bias=blk["b_a"], **blk["bn_a"])
        s_b, t_b = _fold_bn(conv_bias=blk["b_b"], **blk["bn_b"])
        wa = (blk["w_a"] * s_a).astype(jnp.bfloat16)                     # (C,C)
        wb = (blk["w_b"] * s_b.reshape(1, 1, 1, c)).reshape(9, c, c)
        blocks.append((wa, t_a, wb.astype(jnp.bfloat16), t_b))

    feat, output_gap, logits = fused_head(
        y, blocks, params["fc_w"], params["fc_b"], h2, w2, residual=residual)

    output = jnp.transpose(feat.reshape(n, h2, w2, c), (0, 3, 1, 2))  # NCHW f32
    return logits, output, output_gap


# ----------------------------------- main ------------------------------------

if __name__ == "__main__":
    key = jax.random.PRNGKey(0)
    k_params, k_x = jax.random.split(key)

    image_channels = 4
    num_classes = 10
    num_hidden_block = 3     # -> 2 residual blocks (range(1, num_block))
    residual = True

    params = init_params(k_params, image_channels, num_classes, num_hidden_block)
    x = jax.random.normal(k_x, (2, image_channels, 16, 16), jnp.float32)  # NCHW

    fwd = jax.jit(functools.partial(cnnnet_forward, residual=residual))
    logits, output, output_gap = fwd(params, x)
    jax.block_until_ready((logits, output, output_gap))

    assert logits.shape == (2, num_classes)
    assert output.shape == (2, HIDDEN_C, 4, 4)
    assert output_gap.shape == (2, HIDDEN_C)
    assert bool(jnp.all(jnp.isfinite(logits)))
    print("KERNEL_OK")
</pallas_src>

<mosaic_0001>
module attributes {stable_mosaic.version = 11 : i64} {
  func.func @_matmul_affine_kernel(%arg0: i32, %arg1: memref<128x256xbf16, #tpu.memory_space<vmem>>, %arg2: memref<256x128xbf16, #tpu.memory_space<vmem>>, %arg3: memref<1x128xf32, #tpu.memory_space<vmem>>, %arg4: memref<128x128xbf16, #tpu.memory_space<vmem>>) attributes {dimension_semantics = [#tpu.dimension_semantics<parallel>], iteration_bounds = array<i64: 1>, scalar_prefetch = 0 : i64, scratch_operands = 0 : i64, tpu.core_type = #tpu.core_type<tc>, window_params = [{transform_indices = @transform_0, window_bounds = array<i64: 128, 256>}, {pipeline_mode = #tpu.pipeline_mode<synchronous>, transform_indices = @transform_1, window_bounds = array<i64: 256, 128>}, {pipeline_mode = #tpu.pipeline_mode<synchronous>, transform_indices = @transform_2, window_bounds = array<i64: 1, 128>}, {transform_indices = @transform_3, window_bounds = array<i64: 128, 128>}]} {
    %c0 = arith.constant 0 : index
    %c0_0 = arith.constant 0 : index
    %0 = vector.load %arg1[%c0, %c0_0] : memref<128x256xbf16, #tpu.memory_space<vmem>>, vector<128x256xbf16>
    %c0_1 = arith.constant 0 : index
    %c0_2 = arith.constant 0 : index
    %1 = vector.load %arg2[%c0_1, %c0_2] : memref<256x128xbf16, #tpu.memory_space<vmem>>, vector<256x128xbf16>
    %cst = arith.constant dense<0.000000e+00> : vector<128x128xf32>
    %2 = tpu.matmul %0, %1, %cst {dimension_numbers = #tpu.dot_dimension_numbers<[1], [0], [0], [1], [0, 0, 1, 1], [], []>} : vector<128x256xbf16>, vector<256x128xbf16>, vector<128x128xf32> -> vector<128x128xf32>
    %c0_3 = arith.constant 0 : index
    %c0_4 = arith.constant 0 : index
    %3 = vector.load %arg3[%c0_3, %c0_4] : memref<1x128xf32, #tpu.memory_space<vmem>>, vector<1x128xf32>
    %4 = vector.broadcast %3 : vector<1x128xf32> to vector<128x128xf32>
    %5 = arith.addf %2, %4 : vector<128x128xf32>
    %cst_5 = arith.constant 0.000000e+00 : f32
    %6 = vector.broadcast %cst_5 : f32 to vector<128x128xf32>
    %7 = arith.maximumf %5, %6 : vector<128x128xf32>
    %8 = arith.truncf %7 : vector<128x128xf32> to vector<128x128xbf16>
    %c0_6 = arith.constant 0 : index
    %c0_7 = arith.constant 0 : index
    %9 = vector.load %arg4[%c0_6, %c0_7] : memref<128x128xbf16, #tpu.memory_space<vmem>>, vector<128x128xbf16>
    tpu.vector_store %arg4[%c0_6, %c0_7], %8 {strides = array<i32>} : memref<128x128xbf16, #tpu.memory_space<vmem>>, vector<128x128xbf16>,
    return
  }
  func.func @transform_0(%arg0: i32) -> (i32, i32) {
    %c0_i32 = arith.constant 0 : i32
    %c0_i32_0 = arith.constant 0 : i32
    return %arg0, %c0_i32 : i32, i32
  }
  func.func @transform_1(%arg0: i32) -> (i32, i32) {
    %c0_i32 = arith.constant 0 : i32
    %c0_i32_0 = arith.constant 0 : i32
    %c0_i32_1 = arith.constant 0 : i32
    return %c0_i32, %c0_i32_0 : i32, i32
  }
  func.func @transform_2(%arg0: i32) -> (i32, i32) {
    %c0_i32 = arith.constant 0 : i32
    %c0_i32_0 = arith.constant 0 : i32
    %c0_i32_1 = arith.constant 0 : i32
    return %c0_i32, %c0_i32_0 : i32, i32
  }
  func.func @transform_3(%arg0: i32) -> (i32, i32) {
    %c0_i32 = arith.constant 0 : i32
    %c0_i32_0 = arith.constant 0 : i32
    return %arg0, %c0_i32 : i32, i32
  }
}

module attributes {stable_mosaic.version = 11 : i64} {
  func.func @_head_kernel(%arg0: i32, %arg1: memref<1x16x128xbf16, #tpu.memory_space<vmem>>, %arg2: memref<128x128xbf16, #tpu.memory_space<vmem>>, %arg3: memref<1x128xf32, #tpu.memory_space<vmem>>, %arg4: memref<9x128x128xbf16, #tpu.memory_space<vmem>>, %arg5: memref<1x128xf32, #tpu.memory_space<vmem>>, %arg6: memref<128x128xbf16, #tpu.memory_space<vmem>>, %arg7: memref<1x128xf32, #tpu.memory_space<vmem>>, %arg8: memref<9x128x128xbf16, #tpu.memory_space<vmem>>, %arg9: memref<1x128xf32, #tpu.memory_space<vmem>>, %arg10: memref<128x128xbf16, #tpu.memory_space<vmem>>, %arg11: memref<1x128xf32, #tpu.memory_space<vmem>>, %arg12: memref<1x16x128xf32, #tpu.memory_space<vmem>>, %arg13: memref<1x1x128xf32, #tpu.memory_space<vmem>>, %arg14: memref<1x1x128xf32, #tpu.memory_space<vmem>>, %arg15: memref<1x6x6x128xbf16, #tpu.memory_space<vmem>>) attributes {dimension_semantics = [#tpu.dimension_semantics<parallel>], iteration_bounds = array<i64: 2>, scalar_prefetch = 0 : i64, scratch_operands = 1 : i64, tpu.core_type = #tpu.core_type<tc>, window_params = [{transform_indices = @transform_0, window_bounds = array<i64: 1, 16, 128>}, {pipeline_mode = #tpu.pipeline_mode<synchronous>, transform_indices = @transform_1, window_bounds = array<i64: 128, 128>}, {pipeline_mode = #tpu.pipeline_mode<synchronous>, transform_indices = @transform_2, window_bounds = array<i64: 1, 128>}, {pipeline_mode = #tpu.pipeline_mode<synchronous>, transform_indices = @transform_3, window_bounds = array<i64: 9, 128, 128>}, {pipeline_mode = #tpu.pipeline_mode<synchronous>, transform_indices = @transform_4, window_bounds = array<i64: 1, 128>}, {pipeline_mode = #tpu.pipeline_mode<synchronous>, transform_indices = @transform_5, window_bounds = array<i64: 128, 128>}, {pipeline_mode = #tpu.pipeline_mode<synchronous>, transform_indices = @transform_6, window_bounds = array<i64: 1, 128>}, {pipeline_mode = #tpu.pipeline_mode<synchronous>, transform_indices = @transform_7, window_bounds = array<i64: 9, 128, 128>}, {pipeline_mode = #tpu.pipeline_mode<synchronous>, transform_indices = @transform_8, window_bounds = array<i64: 1, 128>}, {pipeline_mode = #tpu.pipeline_mode<synchronous>, transform_indices = @transform_9, window_bounds = array<i64: 128, 128>}, {pipeline_mode = #tpu.pipeline_mode<synchronous>, transform_indices = @transform_10, window_bounds = array<i64: 1, 128>}, {transform_indices = @transform_11, window_bounds = array<i64: 1, 16, 128>}, {transform_indices = @transform_12, window_bounds = array<i64: 1, 1, 128>}, {transform_indices = @transform_13, window_bounds = array<i64: 1, 1, 128>}]} {
    %c0 = arith.constant 0 : index
    %c0_0 = arith.constant 0 : index
    %c0_1 = arith.constant 0 : index
    %0 = vector.load %arg1[%c0, %c0_0, %c0_1] : memref<1x16x128xbf16, #tpu.memory_space<vmem>>, vector<1x16x128xbf16>
    %1 = vector.shape_cast %0 : vector<1x16x128xbf16> to vector<16x128xbf16>
    %cst = arith.constant 0.000000e+00 : bf16
    %2 = vector.broadcast %cst : bf16 to vector<1x6x6x128xbf16>
    %c0_2 = arith.constant 0 : index
    %c0_3 = arith.constant 0 : index
    %c0_4 = arith.constant 0 : index
    %c0_5 = arith.constant 0 : index
    %3 = vector.load %arg15[%c0_2, %c0_3, %c0_4, %c0_5] : memref<1x6x6x128xbf16, #tpu.memory_space<vmem>>, vector<1x6x6x128xbf16>
    tpu.vector_store %arg15[%c0_2, %c0_3, %c0_4, %c0_5], %2 {strides = array<i32>} : memref<1x6x6x128xbf16, #tpu.memory_space<vmem>>, vector<1x6x6x128xbf16>,
    %c0_6 = arith.constant 0 : index
    %c0_7 = arith.constant 0 : index
    %4 = vector.load %arg2[%c0_6, %c0_7] : memref<128x128xbf16, #tpu.memory_space<vmem>>, vector<128x128xbf16>
    %cst_8 = arith.constant dense<0.000000e+00> : vector<16x128xf32>
    %5 = tpu.matmul %1, %4, %cst_8 {dimension_numbers = #tpu.dot_dimension_numbers<[1], [0], [0], [1], [0, 0, 1, 1], [], []>} : vector<16x128xbf16>, vector<128x128xbf16>, vector<16x128xf32> -> vector<16x128xf32>
    %c0_9 = arith.constant 0 : index
    %c0_10 = arith.constant 0 : index
    %6 = vector.load %arg3[%c0_9, %c0_10] : memref<1x128xf32, #tpu.memory_space<vmem>>, vector<1x128xf32>
    %7 = vector.broadcast %6 : vector<1x128xf32> to vector<16x128xf32>
    %8 = arith.addf %5, %7 : vector<16x128xf32>
    %cst_11 = arith.constant 0.000000e+00 : f32
    %9 = vector.broadcast %cst_11 : f32 to vector<16x128xf32>
    %10 = arith.maximumf %8, %9 : vector<16x128xf32>
    %11 = arith.truncf %10 : vector<16x128xf32> to vector<16x128xbf16>
    %12 = vector.shape_cast %11 : vector<16x128xbf16> to vector<1x4x4x128xbf16>
    %c0_12 = arith.constant 0 : index
    %c1 = arith.constant 1 : index
    %c1_13 = arith.constant 1 : index
    %c0_14 = arith.constant 0 : index
    %13 = vector.load %arg15[%c0_12, %c1, %c1_13, %c0_14] : memref<1x6x6x128xbf16, #tpu.memory_space<vmem>>, vector<1x4x4x128xbf16>
    tpu.vector_store %arg15[%c0_12, %c1, %c1_13, %c0_14], %12 {strides = array<i32>} : memref<1x6x6x128xbf16, #tpu.memory_space<vmem>>, vector<1x4x4x128xbf16>,
    %cst_15 = arith.constant 0.000000e+00 : f32
    %14 = vector.broadcast %cst_15 : f32 to vector<16x128xf32>
    %c0_16 = arith.constant 0 : index
    %c0_17 = arith.constant 0 : index
    %c0_18 = arith.constant 0 : index
    %c0_19 = arith.constant 0 : index
    %15 = vector.load %arg15[%c0_16, %c0_17, %c0_18, %c0_19] : memref<1x6x6x128xbf16, #tpu.memory_space<vmem>>, vector<1x4x4x128xbf16>
    %16 = vector.shape_cast %15 : vector<1x4x4x128xbf16> to vector<16x128xbf16>
    %c0_20 = arith.constant 0 : index
    %c0_21 = arith.constant 0 : index
    %c0_22 = arith.constant 0 : index
    %17 = vector.load %arg4[%c0_20, %c0_21, %c0_22] : memref<9x128x128xbf16, #tpu.memory_space<vmem>>, vector<1x128x128xbf16>
    %18 = vector.shape_cast %17 : vector<1x128x128xbf16> to vector<128x128xbf16>
    %cst_23 = arith.constant dense<0.000000e+00> : vector<16x128xf32>
    %19 = tpu.matmul %16, %18, %cst_23 {dimension_numbers = #tpu.dot_dimension_numbers<[1], [0], [0], [1], [0, 0, 1, 1], [], []>} : vector<16x128xbf16>, vector<128x128xbf16>, vector<16x128xf32> -> vector<16x128xf32>
    %20 = arith.addf %14, %19 : vector<16x128xf32>
    %c0_24 = arith.constant 0 : index
    %c0_25 = arith.constant 0 : index
    %c1_26 = arith.constant 1 : index
    %c0_27 = arith.constant 0 : index
    %21 = vector.load %arg15[%c0_24, %c0_25, %c1_26, %c0_27] : memref<1x6x6x128xbf16, #tpu.memory_space<vmem>>, vector<1x4x4x128xbf16>
    %22 = vector.shape_cast %21 : vector<1x4x4x128xbf16> to vector<16x128xbf16>
    %c1_28 = arith.constant 1 : index
    %c0_29 = arith.constant 0 : index
    %c0_30 = arith.constant 0 : index
    %23 = vector.load %arg4[%c1_28, %c0_29, %c0_30] : memref<9x128x128xbf16, #tpu.memory_space<vmem>>, vector<1x128x128xbf16>
    %24 = vector.shape_cast %23 : vector<1x128x128xbf16> to vector<128x128xbf16>
    %cst_31 = arith.constant dense<0.000000e+00> : vector<16x128xf32>
    %25 = tpu.matmul %22, %24, %cst_31 {dimension_numbers = #tpu.dot_dimension_numbers<[1], [0], [0], [1], [0, 0, 1, 1], [], []>} : vector<16x128xbf16>, vector<128x128xbf16>, vector<16x128xf32> -> vector<16x128xf32>
    %26 = arith.addf %20, %25 : vector<16x128xf32>
    %c0_32 = arith.constant 0 : index
    %c0_33 = arith.constant 0 : index
    %c2 = arith.constant 2 : index
    %c0_34 = arith.constant 0 : index
    %27 = vector.load %arg15[%c0_32, %c0_33, %c2, %c0_34] : memref<1x6x6x128xbf16, #tpu.memory_space<vmem>>, vector<1x4x4x128xbf16>
    %28 = vector.shape_cast %27 : vector<1x4x4x128xbf16> to vector<16x128xbf16>
    %c2_35 = arith.constant 2 : index
    %c0_36 = arith.constant 0 : index
    %c0_37 = arith.constant 0 : index
    %29 = vector.load %arg4[%c2_35, %c0_36, %c0_37] : memref<9x128x128xbf16, #tpu.memory_space<vmem>>, vector<1x128x128xbf16>
    %30 = vector.shape_cast %29 : vector<1x128x128xbf16> to vector<128x128xbf16>
    %cst_38 = arith.constant dense<0.000000e+00> : vector<16x128xf32>
    %31 = tpu.matmul %28, %30, %cst_38 {dimension_numbers = #tpu.dot_dimension_numbers<[1], [0], [0], [1], [0, 0, 1, 1], [], []>} : vector<16x128xbf16>, vector<128x128xbf16>, vector<16x128xf32> -> vector<16x128xf32>
    %32 = arith.addf %26, %31 : vector<16x128xf32>
    %c0_39 = arith.constant 0 : index
    %c1_40 = arith.constant 1 : index
    %c0_41 = arith.constant 0 : index
    %c0_42 = arith.constant 0 : index
    %33 = vector.load %arg15[%c0_39, %c1_40, %c0_41, %c0_42] : memref<1x6x6x128xbf16, #tpu.memory_space<vmem>>, vector<1x4x4x128xbf16>
    %34 = vector.shape_cast %33 : vector<1x4x4x128xbf16> to vector<16x128xbf16>
    %c3 = arith.constant 3 : index
    %c0_43 = arith.constant 0 : index
    %c0_44 = arith.constant 0 : index
    %35 = vector.load %arg4[%c3, %c0_43, %c0_44] : memref<9x128x128xbf16, #tpu.memory_space<vmem>>, vector<1x128x128xbf16>
    %36 = vector.shape_cast %35 : vector<1x128x128xbf16> to vector<128x128xbf16>
    %cst_45 = arith.constant dense<0.000000e+00> : vector<16x128xf32>
    %37 = tpu.matmul %34, %36, %cst_45 {dimension_numbers = #tpu.dot_dimension_numbers<[1], [0], [0], [1], [0, 0, 1, 1], [], []>} : vector<16x128xbf16>, vector<128x128xbf16>, vector<16x128xf32> -> vector<16x128xf32>
    %38 = arith.addf %32, %37 : vector<16x128xf32>
    %c0_46 = arith.constant 0 : index
    %c1_47 = arith.constant 1 : index
    %c1_48 = arith.constant 1 : index
    %c0_49 = arith.constant 0 : index
    %39 = vector.load %arg15[%c0_46, %c1_47, %c1_48, %c0_49] : memref<1x6x6x128xbf16, #tpu.memory_space<vmem>>, vector<1x4x4x128xbf16>
    %40 = vector.shape_cast %39 : vector<1x4x4x128xbf16> to vector<16x128xbf16>
    %c4 = arith.constant 4 : index
    %c0_50 = arith.constant 0 : index
    %c0_51 = arith.constant 0 : index
    %41 = vector.load %arg4[%c4, %c0_50, %c0_51] : memref<9x128x128xbf16, #tpu.memory_space<vmem>>, vector<1x128x128xbf16>
    %42 = vector.shape_cast %41 : vector<1x128x128xbf16> to vector<128x128xbf16>
    %cst_52 = arith.constant dense<0.000000e+00> : vector<16x128xf32>
    %43 = tpu.matmul %40, %42, %cst_52 {dimension_numbers = #tpu.dot_dimension_numbers<[1], [0], [0], [1], [0, 0, 1, 1], [], []>} : vector<16x128xbf16>, vector<128x128xbf16>, vector<16x128xf32> -> vector<16x128xf32>
    %44 = arith.addf %38, %43 : vector<16x128xf32>
    %c0_53 = arith.constant 0 : index
    %c1_54 = arith.constant 1 : index
    %c2_55 = arith.constant 2 : index
    %c0_56 = arith.constant 0 : index
    %45 = vector.load %arg15[%c0_53, %c1_54, %c2_55, %c0_56] : memref<1x6x6x128xbf16, #tpu.memory_space<vmem>>, vector<1x4x4x128xbf16>
    %46 = vector.shape_cast %45 : vector<1x4x4x128xbf16> to vector<16x128xbf16>
    %c5 = arith.constant 5 : index
    %c0_57 = arith.constant 0 : index
    %c0_58 = arith.constant 0 : index
    %47 = vector.load %arg4[%c5, %c0_57, %c0_58] : memref<9x128x128xbf16, #tpu.memory_space<vmem>>, vector<1x128x128xbf16>
    %48 = vector.shape_cast %47 : vector<1x128x128xbf16> to vector<128x128xbf16>
    %cst_59 = arith.constant dense<0.000000e+00> : vector<16x128xf32>
    %49 = tpu.matmul %46, %48, %cst_59 {dimension_numbers = #tpu.dot_dimension_numbers<[1], [0], [0], [1], [0, 0, 1, 1], [], []>} : vector<16x128xbf16>, vector<128x128xbf16>, vector<16x128xf32> -> vector<16x128xf32>
    %50 = arith.addf %44, %49 : vector<16x128xf32>
    %c0_60 = arith.constant 0 : index
    %c2_61 = arith.constant 2 : index
    %c0_62 = arith.constant 0 : index
    %c0_63 = arith.constant 0 : index
    %51 = vector.load %arg15[%c0_60, %c2_61, %c0_62, %c0_63] : memref<1x6x6x128xbf16, #tpu.memory_space<vmem>>, vector<1x4x4x128xbf16>
    %52 = vector.shape_cast %51 : vector<1x4x4x128xbf16> to vector<16x128xbf16>
    %c6 = arith.constant 6 : index
    %c0_64 = arith.constant 0 : index
    %c0_65 = arith.constant 0 : index
    %53 = vector.load %arg4[%c6, %c0_64, %c0_65] : memref<9x128x128xbf16, #tpu.memory_space<vmem>>, vector<1x128x128xbf16>
    %54 = vector.shape_cast %53 : vector<1x128x128xbf16> to vector<128x128xbf16>
    %cst_66 = arith.constant dense<0.000000e+00> : vector<16x128xf32>
    %55 = tpu.matmul %52, %54, %cst_66 {dimension_numbers = #tpu.dot_dimension_numbers<[1], [0], [0], [1], [0, 0, 1, 1], [], []>} : vector<16x128xbf16>, vector<128x128xbf16>, vector<16x128xf32> -> vector<16x128xf32>
    %56 = arith.addf %50, %55 : vector<16x128xf32>
    %c0_67 = arith.constant 0 : index
    %c2_68 = arith.constant 2 : index
    %c1_69 = arith.constant 1 : index
    %c0_70 = arith.constant 0 : index
    %57 = vector.load %arg15[%c0_67, %c2_68, %c1_69, %c0_70] : memref<1x6x6x128xbf16, #tpu.memory_space<vmem>>, vector<1x4x4x128xbf16>
    %58 = vector.shape_cast %57 : vector<1x4x4x128xbf16> to vector<16x128xbf16>
    %c7 = arith.constant 7 : index
    %c0_71 = arith.constant 0 : index
    %c0_72 = arith.constant 0 : index
    %59 = vector.load %arg4[%c7, %c0_71, %c0_72] : memref<9x128x128xbf16, #tpu.memory_space<vmem>>, vector<1x128x128xbf16>
    %60 = vector.shape_cast %59 : vector<1x128x128xbf16> to vector<128x128xbf16>
    %cst_73 = arith.constant dense<0.000000e+00> : vector<16x128xf32>
    %61 = tpu.matmul %58, %60, %cst_73 {dimension_numbers = #tpu.dot_dimension_numbers<[1], [0], [0], [1], [0, 0, 1, 1], [], []>} : vector<16x128xbf16>, vector<128x128xbf16>, vector<16x128xf32> -> vector<16x128xf32>
    %62 = arith.addf %56, %61 : vector<16x128xf32>
    %c0_74 = arith.constant 0 : index
    %c2_75 = arith.constant 2 : index
    %c2_76 = arith.constant 2 : index
    %c0_77 = arith.constant 0 : index
    %63 = vector.load %arg15[%c0_74, %c2_75, %c2_76, %c0_77] : memref<1x6x6x128xbf16, #tpu.memory_space<vmem>>, vector<1x4x4x128xbf16>
    %64 = vector.shape_cast %63 : vector<1x4x4x128xbf16> to vector<16x128xbf16>
    %c8 = arith.constant 8 : index
    %c0_78 = arith.constant 0 : index
    %c0_79 = arith.constant 0 : index
    %65 = vector.load %arg4[%c8, %c0_78, %c0_79] : memref<9x128x128xbf16, #tpu.memory_space<vmem>>, vector<1x128x128xbf16>
    %66 = vector.shape_cast %65 : vector<1x128x128xbf16> to vector<128x128xbf16>
    %cst_80 = arith.constant dense<0.000000e+00> : vector<16x128xf32>
    %67 = tpu.matmul %64, %66, %cst_80 {dimension_numbers = #tpu.dot_dimension_numbers<[1], [0], [0], [1], [0, 0, 1, 1], [], []>} : vector<16x128xbf16>, vector<128x128xbf16>, vector<16x128xf32> -> vector<16x128xf32>
    %68 = arith.addf %62, %67 : vector<16x128xf32>
    %c0_81 = arith.constant 0 : index
    %c0_82 = arith.constant 0 : index
    %69 = vector.load %arg5[%c0_81, %c0_82] : memref<1x128xf32, #tpu.memory_space<vmem>>, vector<1x128xf32>
    %70 = vector.broadcast %69 : vector<1x128xf32> to vector<16x128xf32>
    %71 = arith.addf %68, %70 : vector<16x128xf32>
    %72 = arith.extf %1 : vector<16x128xbf16> to vector<16x128xf32>
    %73 = arith.addf %71, %72 : vector<16x128xf32>
    %cst_83 = arith.constant 0.000000e+00 : f32
    %74 = vector.broadcast %cst_83 : f32 to vector<16x128xf32>
    %75 = arith.maximumf %73, %74 : vector<16x128xf32>
    %76 = arith.truncf %75 : vector<16x128xf32> to vector<16x128xbf16>
    %c0_84 = arith.constant 0 : index
    %c0_85 = arith.constant 0 : index
    %77 = vector.load %arg6[%c0_84, %c0_85] : memref<128x128xbf16, #tpu.memory_space<vmem>>, vector<128x128xbf16>
    %cst_86 = arith.constant dense<0.000000e+00> : vector<16x128xf32>
    %78 = tpu.matmul %76, %77, %cst_86 {dimension_numbers = #tpu.dot_dimension_numbers<[1], [0], [0], [1], [0, 0, 1, 1], [], []>} : vector<16x128xbf16>, vector<128x128xbf16>, vector<16x128xf32> -> vector<16x128xf32>
    %c0_87 = arith.constant 0 : index
    %c0_88 = arith.constant 0 : index
    %79 = vector.load %arg7[%c0_87, %c0_88] : memref<1x128xf32, #tpu.memory_space<vmem>>, vector<1x128xf32>
    %80 = vector.broadcast %79 : vector<1x128xf32> to vector<16x128xf32>
    %81 = arith.addf %78, %80 : vector<16x128xf32>
    %cst_89 = arith.constant 0.000000e+00 : f32
    %82 = vector.broadcast %cst_89 : f32 to vector<16x128xf32>
    %83 = arith.maximumf %81, %82 : vector<16x128xf32>
    %84 = arith.truncf %83 : vector<16x128xf32> to vector<16x128xbf16>
    %85 = vector.shape_cast %84 : vector<16x128xbf16> to vector<1x4x4x128xbf16>
    %c0_90 = arith.constant 0 : index
    %c1_91 = arith.constant 1 : index
    %c1_92 = arith.constant 1 : index
    %c0_93 = arith.constant 0 : index
    %86 = vector.load %arg15[%c0_90, %c1_91, %c1_92, %c0_93] : memref<1x6x6x128xbf16, #tpu.memory_space<vmem>>, vector<1x4x4x128xbf16>
    tpu.vector_store %arg15[%c0_90, %c1_91, %c1_92, %c0_93], %85 {strides = array<i32>} : memref<1x6x6x128xbf16, #tpu.memory_space<vmem>>, vector<1x4x4x128xbf16>,
    %cst_94 = arith.constant 0.000000e+00 : f32
    %87 = vector.broadcast %cst_94 : f32 to vector<16x128xf32>
    %c0_95 = arith.constant 0 : index
    %c0_96 = arith.constant 0 : index
    %c0_97 = arith.constant 0 : index
    %c0_98 = arith.constant 0 : index
    %88 = vector.load %arg15[%c0_95, %c0_96, %c0_97, %c0_98] : memref<1x6x6x128xbf16, #tpu.memory_space<vmem>>, vector<1x4x4x128xbf16>
    %89 = vector.shape_cast %88 : vector<1x4x4x128xbf16> to vector<16x128xbf16>
    %c0_99 = arith.constant 0 : index
    %c0_100 = arith.constant 0 : index
    %c0_101 = arith.constant 0 : index
    %90 = vector.load %arg8[%c0_99, %c0_100, %c0_101] : memref<9x128x128xbf16, #tpu.memory_space<vmem>>, vector<1x128x128xbf16>
    %91 = vector.shape_cast %90 : vector<1x128x128xbf16> to vector<128x128xbf16>
    %cst_102 = arith.constant dense<0.000000e+00> : vector<16x128xf32>
    %92 = tpu.matmul %89, %91, %cst_102 {dimension_numbers = #tpu.dot_dimension_numbers<[1], [0], [0], [1], [0, 0, 1, 1], [], []>} : vector<16x128xbf16>, vector<128x128xbf16>, vector<16x128xf32> -> vector<16x128xf32>
    %93 = arith.addf %87, %92 : vector<16x128xf32>
    %c0_103 = arith.constant 0 : index
    %c0_104 = arith.constant 0 : index
    %c1_105 = arith.constant 1 : index
    %c0_106 = arith.constant 0 : index
    %94 = vector.load %arg15[%c0_103, %c0_104, %c1_105, %c0_106] : memref<1x6x6x128xbf16, #tpu.memory_space<vmem>>, vector<1x4x4x128xbf16>
    %95 = vector.shape_cast %94 : vector<1x4x4x128xbf16> to vector<16x128xbf16>
    %c1_107 = arith.constant 1 : index
    %c0_108 = arith.constant 0 : index
    %c0_109 = arith.constant 0 : index
    %96 = vector.load %arg8[%c1_107, %c0_108, %c0_109] : memref<9x128x128xbf16, #tpu.memory_space<vmem>>, vector<1x128x128xbf16>
    %97 = vector.shape_cast %96 : vector<1x128x128xbf16> to vector<128x128xbf16>
    %cst_110 = arith.constant dense<0.000000e+00> : vector<16x128xf32>
    %98 = tpu.matmul %95, %97, %cst_110 {dimension_numbers = #tpu.dot_dimension_numbers<[1], [0], [0], [1], [0, 0, 1, 1], [], []>} : vector<16x128xbf16>, vector<128x128xbf16>, vector<16x128xf32> -> vector<16x128xf32>
    %99 = arith.addf %93, %98 : vector<16x128xf32>
    %c0_111 = arith.constant 0 : index
    %c0_112 = arith.constant 0 : index
    %c2_113 = arith.constant 2 : index
    %c0_114 = arith.constant 0 : index
    %100 = vector.load %arg15[%c0_111, %c0_112, %c2_113, %c0_114] : memref<1x6x6x128xbf16, #tpu.memory_space<vmem>>, vector<1x4x4x128xbf16>
    %101 = vector.shape_cast %100 : vector<1x4x4x128xbf16> to vector<16x128xbf16>
    %c2_115 = arith.constant 2 : index
    %c0_116 = arith.constant 0 : index
    %c0_117 = arith.constant 0 : index
    %102 = vector.load %arg8[%c2_115, %c0_116, %c0_117] : memref<9x128x128xbf16, #tpu.memory_space<vmem>>, vector<1x128x128xbf16>
    %103 = vector.shape_cast %102 : vector<1x128x128xbf16> to vector<128x128xbf16>
    %cst_118 = arith.constant dense<0.000000e+00> : vector<16x128xf32>
    %104 = tpu.matmul %101, %103, %cst_118 {dimension_numbers = #tpu.dot_dimension_numbers<[1], [0], [0], [1], [0, 0, 1, 1], [], []>} : vector<16x128xbf16>, vector<128x128xbf16>, vector<16x128xf32> -> vector<16x128xf32>
    %105 = arith.addf %99, %104 : vector<16x128xf32>
    %c0_119 = arith.constant 0 : index
    %c1_120 = arith.constant 1 : index
    %c0_121 = arith.constant 0 : index
    %c0_122 = arith.constant 0 : index
    %106 = vector.load %arg15[%c0_119, %c1_120, %c0_121, %c0_122] : memref<1x6x6x128xbf16, #tpu.memory_space<vmem>>, vector<1x4x4x128xbf16>
    %107 = vector.shape_cast %106 : vector<1x4x4x128xbf16> to vector<16x128xbf16>
    %c3_123 = arith.constant 3 : index
    %c0_124 = arith.constant 0 : index
    %c0_125 = arith.constant 0 : index
    %108 = vector.load %arg8[%c3_123, %c0_124, %c0_125] : memref<9x128x128xbf16, #tpu.memory_space<vmem>>, vector<1x128x128xbf16>
    %109 = vector.shape_cast %108 : vector<1x128x128xbf16> to vector<128x128xbf16>
    %cst_126 = arith.constant dense<0.000000e+00> : vector<16x128xf32>
    %110 = tpu.matmul %107, %109, %cst_126 {dimension_numbers = #tpu.dot_dimension_numbers<[1], [0], [0], [1], [0, 0, 1, 1], [], []>} : vector<16x128xbf16>, vector<128x128xbf16>, vector<16x128xf32> -> vector<16x128xf32>
    %111 = arith.addf %105, %110 : vector<16x128xf32>
    %c0_127 = arith.constant 0 : index
    %c1_128 = arith.constant 1 : index
    %c1_129 = arith.constant 1 : index
    %c0_130 = arith.constant 0 : index
    %112 = vector.load %arg15[%c0_127, %c1_128, %c1_129, %c0_130] : memref<1x6x6x128xbf16, #tpu.memory_space<vmem>>, vector<1x4x4x128xbf16>
    %113 = vector.shape_cast %112 : vector<1x4x4x128xbf16> to vector<16x128xbf16>
    %c4_131 = arith.constant 4 : index
    %c0_132 = arith.constant 0 : index
    %c0_133 = arith.constant 0 : index
    %114 = vector.load %arg8[%c4_131, %c0_132, %c0_133] : memref<9x128x128xbf16, #tpu.memory_space<vmem>>, vector<1x128x128xbf16>
    %115 = vector.shape_cast %114 : vector<1x128x128xbf16> to vector<128x128xbf16>
    %cst_134 = arith.constant dense<0.000000e+00> : vector<16x128xf32>
    %116 = tpu.matmul %113, %115, %cst_134 {dimension_numbers = #tpu.dot_dimension_numbers<[1], [0], [0], [1], [0, 0, 1, 1], [], []>} : vector<16x128xbf16>, vector<128x128xbf16>, vector<16x128xf32> -> vector<16x128xf32>
    %117 = arith.addf %111, %116 : vector<16x128xf32>
    %c0_135 = arith.constant 0 : index
    %c1_136 = arith.constant 1 : index
    %c2_137 = arith.constant 2 : index
    %c0_138 = arith.constant 0 : index
    %118 = vector.load %arg15[%c0_135, %c1_136, %c2_137, %c0_138] : memref<1x6x6x128xbf16, #tpu.memory_space<vmem>>, vector<1x4x4x128xbf16>
    %119 = vector.shape_cast %118 : vector<1x4x4x128xbf16> to vector<16x128xbf16>
    %c5_139 = arith.constant 5 : index
    %c0_140 = arith.constant 0 : index
    %c0_141 = arith.constant 0 : index
    %120 = vector.load %arg8[%c5_139, %c0_140, %c0_141] : memref<9x128x128xbf16, #tpu.memory_space<vmem>>, vector<1x128x128xbf16>
    %121 = vector.shape_cast %120 : vector<1x128x128xbf16> to vector<128x128xbf16>
    %cst_142 = arith.constant dense<0.000000e+00> : vector<16x128xf32>
    %122 = tpu.matmul %119, %121, %cst_142 {dimension_numbers = #tpu.dot_dimension_numbers<[1], [0], [0], [1], [0, 0, 1, 1], [], []>} : vector<16x128xbf16>, vector<128x128xbf16>, vector<16x128xf32> -> vector<16x128xf32>
    %123 = arith.addf %117, %122 : vector<16x128xf32>
    %c0_143 = arith.constant 0 : index
    %c2_144 = arith.constant 2 : index
    %c0_145 = arith.constant 0 : index
    %c0_146 = arith.constant 0 : index
    %124 = vector.load %arg15[%c0_143, %c2_144, %c0_145, %c0_146] : memref<1x6x6x128xbf16, #tpu.memory_space<vmem>>, vector<1x4x4x128xbf16>
    %125 = vector.shape_cast %124 : vector<1x4x4x128xbf16> to vector<16x128xbf16>
    %c6_147 = arith.constant 6 : index
    %c0_148 = arith.constant 0 : index
    %c0_149 = arith.constant 0 : index
    %126 = vector.load %arg8[%c6_147, %c0_148, %c0_149] : memref<9x128x128xbf16, #tpu.memory_space<vmem>>, vector<1x128x128xbf16>
    %127 = vector.shape_cast %126 : vector<1x128x128xbf16> to vector<128x128xbf16>
    %cst_150 = arith.constant dense<0.000000e+00> : vector<16x128xf32>
    %128 = tpu.matmul %125, %127, %cst_150 {dimension_numbers = #tpu.dot_dimension_numbers<[1], [0], [0], [1], [0, 0, 1, 1], [], []>} : vector<16x128xbf16>, vector<128x128xbf16>, vector<16x128xf32> -> vector<16x128xf32>
    %129 = arith.addf %123, %128 : vector<16x128xf32>
    %c0_151 = arith.constant 0 : index
    %c2_152 = arith.constant 2 : index
    %c1_153 = arith.constant 1 : index
    %c0_154 = arith.constant 0 : index
    %130 = vector.load %arg15[%c0_151, %c2_152, %c1_153, %c0_154] : memref<1x6x6x128xbf16, #tpu.memory_space<vmem>>, vector<1x4x4x128xbf16>
    %131 = vector.shape_cast %130 : vector<1x4x4x128xbf16> to vector<16x128xbf16>
    %c7_155 = arith.constant 7 : index
    %c0_156 = arith.constant 0 : index
    %c0_157 = arith.constant 0 : index
    %132 = vector.load %arg8[%c7_155, %c0_156, %c0_157] : memref<9x128x128xbf16, #tpu.memory_space<vmem>>, vector<1x128x128xbf16>
    %133 = vector.shape_cast %132 : vector<1x128x128xbf16> to vector<128x128xbf16>
    %cst_158 = arith.constant dense<0.000000e+00> : vector<16x128xf32>
    %134 = tpu.matmul %131, %133, %cst_158 {dimension_numbers = #tpu.dot_dimension_numbers<[1], [0], [0], [1], [0, 0, 1, 1], [], []>} : vector<16x128xbf16>, vector<128x128xbf16>, vector<16x128xf32> -> vector<16x128xf32>
    %135 = arith.addf %129, %134 : vector<16x128xf32>
    %c0_159 = arith.constant 0 : index
    %c2_160 = arith.constant 2 : index
    %c2_161 = arith.constant 2 : index
    %c0_162 = arith.constant 0 : index
    %136 = vector.load %arg15[%c0_159, %c2_160, %c2_161, %c0_162] : memref<1x6x6x128xbf16, #tpu.memory_space<vmem>>, vector<1x4x4x128xbf16>
    %137 = vector.shape_cast %136 : vector<1x4x4x128xbf16> to vector<16x128xbf16>
    %c8_163 = arith.constant 8 : index
    %c0_164 = arith.constant 0 : index
    %c0_165 = arith.constant 0 : index
    %138 = vector.load %arg8[%c8_163, %c0_164, %c0_165] : memref<9x128x128xbf16, #tpu.memory_space<vmem>>, vector<1x128x128xbf16>
    %139 = vector.shape_cast %138 : vector<1x128x128xbf16> to vector<128x128xbf16>
    %cst_166 = arith.constant dense<0.000000e+00> : vector<16x128xf32>
    %140 = tpu.matmul %137, %139, %cst_166 {dimension_numbers = #tpu.dot_dimension_numbers<[1], [0], [0], [1], [0, 0, 1, 1], [], []>} : vector<16x128xbf16>, vector<128x128xbf16>, vector<16x128xf32> -> vector<16x128xf32>
    %141 = arith.addf %135, %140 : vector<16x128xf32>
    %c0_167 = arith.constant 0 : index
    %c0_168 = arith.constant 0 : index
    %142 = vector.load %arg9[%c0_167, %c0_168] : memref<1x128xf32, #tpu.memory_space<vmem>>, vector<1x128xf32>
    %143 = vector.broadcast %142 : vector<1x128xf32> to vector<16x128xf32>
    %144 = arith.addf %141, %143 : vector<16x128xf32>
    %145 = arith.extf %76 : vector<16x128xbf16> to vector<16x128xf32>
    %146 = arith.addf %144, %145 : vector<16x128xf32>
    %cst_169 = arith.constant 0.000000e+00 : f32
    %147 = vector.broadcast %cst_169 : f32 to vector<16x128xf32>
    %148 = arith.maximumf %146, %147 : vector<16x128xf32>
    %149 = vector.shape_cast %148 : vector<16x128xf32> to vector<1x16x128xf32>
    %c0_170 = arith.constant 0 : index
    %c0_171 = arith.constant 0 : index
    %c0_172 = arith.constant 0 : index
    %150 = vector.load %arg12[%c0_170, %c0_171, %c0_172] : memref<1x16x128xf32, #tpu.memory_space<vmem>>, vector<1x16x128xf32>
    tpu.vector_store %arg12[%c0_170, %c0_171, %c0_172], %149 {strides = array<i32>} : memref<1x16x128xf32, #tpu.memory_space<vmem>>, vector<1x16x128xf32>,
    %cst_173 = arith.constant dense<0.000000e+00> : vector<1x128xf32>
    %151 = vector.multi_reduction <add>, %149, %cst_173 [1] : vector<1x16x128xf32> to vector<1x128xf32>
    %cst_174 = arith.constant 1.600000e+01 : f32
    %152 = vector.broadcast %cst_174 : f32 to vector<1x128xf32>
    %153 = arith.divf %151, %152 : vector<1x128xf32>
    %154 = vector.shape_cast %153 : vector<1x128xf32> to vector<1x1x128xf32>
    %c0_175 = arith.constant 0 : index
    %c0_176 = arith.constant 0 : index
    %c0_177 = arith.constant 0 : index
    %155 = vector.load %arg13[%c0_175, %c0_176, %c0_177] : memref<1x1x128xf32, #tpu.memory_space<vmem>>, vector<1x1x128xf32>
    tpu.vector_store %arg13[%c0_175, %c0_176, %c0_177], %154 {strides = array<i32>} : memref<1x1x128xf32, #tpu.memory_space<vmem>>, vector<1x1x128xf32>,
    %156 = arith.truncf %153 : vector<1x128xf32> to vector<1x128xbf16>
    %c0_178 = arith.constant 0 : index
    %c0_179 = arith.constant 0 : index
    %157 = vector.load %arg10[%c0_178, %c0_179] : memref<128x128xbf16, #tpu.memory_space<vmem>>, vector<128x128xbf16>
    %cst_180 = arith.constant dense<0.000000e+00> : vector<1x128xf32>
    %158 = tpu.matmul %156, %157, %cst_180 {dimension_numbers = #tpu.dot_dimension_numbers<[1], [0], [0], [1], [0, 0, 1, 1], [], []>} : vector<1x128xbf16>, vector<128x128xbf16>, vector<1x128xf32> -> vector<1x128xf32>
    %c0_181 = arith.constant 0 : index
    %c0_182 = arith.constant 0 : index
    %159 = vector.load %arg11[%c0_181, %c0_182] : memref<1x128xf32, #tpu.memory_space<vmem>>, vector<1x128xf32>
    %160 = arith.addf %158, %159 : vector<1x128xf32>
    %161 = vector.shape_cast %160 : vector<1x128xf32> to vector<1x1x128xf32>
    %c0_183 = arith.constant 0 : index
    %c0_184 = arith.constant 0 : index
    %c0_185 = arith.constant 0 : index
    %162 = vector.load %arg14[%c0_183, %c0_184, %c0_185] : memref<1x1x128xf32, #tpu.memory_space<vmem>>, vector<1x1x128xf32>
    tpu.vector_store %arg14[%c0_183, %c0_184, %c0_185], %161 {strides = array<i32>} : memref<1x1x128xf32, #tpu.memory_space<vmem>>, vector<1x1x128xf32>,
    return
  }
  func.func @transform_0(%arg0: i32) -> (i32, i32, i32) {
    %c0_i32 = arith.constant 0 : i32
    %c0_i32_0 = arith.constant 0 : i32
    %c0_i32_1 = arith.constant 0 : i32
    return %arg0, %c0_i32, %c0_i32_0 : i32, i32, i32
  }
  func.func @transform_1(%arg0: i32) -> (i32, i32) {
    %c0_i32 = arith.constant 0 : i32
    %c0_i32_0 = arith.constant 0 : i32
    %c0_i32_1 = arith.constant 0 : i32
    return %c0_i32, %c0_i32_0 : i32, i32
  }
  func.func @transform_2(%arg0: i32) -> (i32, i32) {
    %c0_i32 = arith.constant 0 : i32
    %c0_i32_0 = arith.constant 0 : i32
    %c0_i32_1 = arith.constant 0 : i32
    return %c0_i32, %c0_i32_0 : i32, i32
  }
  func.func @transform_3(%arg0: i32) -> (i32, i32, i32) {
    %c0_i32 = arith.constant 0 : i32
    %c0_i32_0 = arith.constant 0 : i32
    %c0_i32_1 = arith.constant 0 : i32
    %c0_i32_2 = arith.constant 0 : i32
    return %c0_i32, %c0_i32_0, %c0_i32_1 : i32, i32, i32
  }
  func.func @transform_4(%arg0: i32) -> (i32, i32) {
    %c0_i32 = arith.constant 0 : i32
    %c0_i32_0 = arith.constant 0 : i32
    %c0_i32_1 = arith.constant 0 : i32
    return %c0_i32, %c0_i32_0 : i32, i32
  }
  func.func @transform_5(%arg0: i32) -> (i32, i32) {
    %c0_i32 = arith.constant 0 : i32
    %c0_i32_0 = arith.constant 0 : i32
    %c0_i32_1 = arith.constant 0 : i32
    return %c0_i32, %c0_i32_0 : i32, i32
  }
  func.func @transform_6(%arg0: i32) -> (i32, i32) {
    %c0_i32 = arith.constant 0 : i32
    %c0_i32_0 = arith.constant 0 : i32
    %c0_i32_1 = arith.constant 0 : i32
    return %c0_i32, %c0_i32_0 : i32, i32
  }
  func.func @transform_7(%arg0: i32) -> (i32, i32, i32) {
    %c0_i32 = arith.constant 0 : i32
    %c0_i32_0 = arith.constant 0 : i32
    %c0_i32_1 = arith.constant 0 : i32
    %c0_i32_2 = arith.constant 0 : i32
    return %c0_i32, %c0_i32_0, %c0_i32_1 : i32, i32, i32
  }
  func.func @transform_8(%arg0: i32) -> (i32, i32) {
    %c0_i32 = arith.constant 0 : i32
    %c0_i32_0 = arith.constant 0 : i32
    %c0_i32_1 = arith.constant 0 : i32
    return %c0_i32, %c0_i32_0 : i32, i32
  }
  func.func @transform_9(%arg0: i32) -> (i32, i32) {
    %c0_i32 = arith.constant 0 : i32
    %c0_i32_0 = arith.constant 0 : i32
    %c0_i32_1 = arith.constant 0 : i32
    return %c0_i32, %c0_i32_0 : i32, i32
  }
  func.func @transform_10(%arg0: i32) -> (i32, i32) {
    %c0_i32 = arith.constant 0 : i32
    %c0_i32_0 = arith.constant 0 : i32
    %c0_i32_1 = arith.constant 0 : i32
    return %c0_i32, %c0_i32_0 : i32, i32
  }
  func.func @transform_11(%arg0: i32) -> (i32, i32, i32) {
    %c0_i32 = arith.constant 0 : i32
    %c0_i32_0 = arith.constant 0 : i32
    %c0_i32_1 = arith.constant 0 : i32
    return %arg0, %c0_i32, %c0_i32_0 : i32, i32, i32
  }
  func.func @transform_12(%arg0: i32) -> (i32, i32, i32) {
    %c0_i32 = arith.constant 0 : i32
    %c0_i32_0 = arith.constant 0 : i32
    %c0_i32_1 = arith.constant 0 : i32
    return %arg0, %c0_i32, %c0_i32_0 : i32, i32, i32
  }
  func.func @transform_13(%arg0: i32) -> (i32, i32, i32) {
    %c0_i32 = arith.constant 0 : i32
    %c0_i32_0 = arith.constant 0 : i32
    %c0_i32_1 = arith.constant 0 : i32
    return %arg0, %c0_i32, %c0_i32_0 : i32, i32, i32
  }
}

</mosaic_0001>

<bundles_post_ra>
// kernel: cnnnet_forward.2
= control target key start
LH: loop header
LB: loop body
LE: loop exit
PB: predicated region body
PF: predicated region fallthrough
CT: control target
= control target key end

     0   :  { %s825_s1 = inlined_call_operand.vmem [shape: bf16[256,128], index: 1, kind: input, shape index: {}]   ;;  %s826_s2 = inlined_call_operand.vmem [shape: f32[1,128], index: 2, kind: input, shape index: {}]   ;;  %s827_s0 = inlined_call_operand.vmem [shape: bf16[128,256], index: 0, kind: input, shape index: {}]   ;;  %s828_s3 = inlined_call_operand.vmem [shape: bf16[128,128], index: 3, kind: output, shape index: {}]  }
   0x1   :  { %v543_v0 = vld [vmem:[%s825_s1 + $0x38] sm:$0xff]  ;;  %v542_v2 = vld [vmem:[%s825_s1 + $0x30] sm:$0xff]  ;;  %v541_v4 = vld [vmem:[%s825_s1 + $0x28] sm:$0xff] }
   0x2   :  { %v551_v1 = vld [vmem:[%s825_s1 + $0x78] sm:$0xff]  ;;  %242 = vmatpush.bf16.msra.mxu0 %v543_v0  ;;  %599 = vmatpush.bf16.msra.mxu2 %v543_v0  ;;  %v550_v3 = vld [vmem:[%s825_s1 + $0x70] sm:$0xff]  ;;  %v549_v5 = vld [vmem:[%s825_s1 + $0x68] sm:$0xff] }
   0x3   :  { %291 = vmatpush.bf16.msra.mxu1 %v551_v1  ;;  %607 = vmatpush.bf16.msra.mxu3 %v551_v1  ;;  %v540_v6 = vld [vmem:[%s825_s1 + $0x20] sm:$0xff]  ;;  %v539_v8 = vld [vmem:[%s825_s1 + $0x18] sm:$0xff]  ;;  %v538_v10 = vld [vmem:[%s825_s1 + $0x10] sm:$0xff] }
   0x4   :  { %v548_v7 = vld [vmem:[%s825_s1 + $0x60] sm:$0xff]  ;;  %v547_v9 = vld [vmem:[%s825_s1 + $0x58] sm:$0xff]  ;;  %v546_v11 = vld [vmem:[%s825_s1 + $0x50] sm:$0xff] }
   0x5   :  { %v537_v12 = vld [vmem:[%s825_s1 + $0x8] sm:$0xff]  ;;  %v536_v14 = vld [vmem:[%s825_s1] sm:$0xff]  ;;  %v402_v28 = vld [vmem:[%s827_s0 + $0x10] sm:$0xf] }
   0x6   :  { %243 = vmatpush.bf16.msra.mxu0 %v542_v2  ;;  %600 = vmatpush.bf16.msra.mxu2 %v542_v2  ;;  %v545_v13 = vld [vmem:[%s825_s1 + $0x48] sm:$0xff]  ;;  %v544_v15 = vld [vmem:[%s825_s1 + $0x40] sm:$0xff]  ;;  %v523_v29 = vld [vmem:[%s827_s0 + $0x14] sm:$0xf0] }
   0x7   :  { %292 = vmatpush.bf16.msra.mxu1 %v550_v3  ;;  %608 = vmatpush.bf16.msra.mxu3 %v550_v3  ;;  %v394_v16 = vld [vmem:[%s827_s0] sm:$0xf]  ;;  %v521_v17 = vld [vmem:[%s827_s0 + $0x4] sm:$0xf0]  ;;  %v520_v20 = vld [vmem:[%s827_s0 + $0x4] sm:$0xf]  ;;  %v403_v36 = vor.u32 %v523_v29, %v402_v28 }
   0x8   :  { %v426_v18 = vld [vmem:[%s827_s0 + $0x40] sm:$0xf]  ;;  %v529_v19 = vld [vmem:[%s827_s0 + $0x44] sm:$0xf0]  ;;  %v396_v21 = vld [vmem:[%s827_s0 + $0x8] sm:$0xf0]  ;;  %v395_v24 = vor.u32 %v521_v17, %v394_v16 }
   0x9   :  { %v528_v22 = vld [vmem:[%s827_s0 + $0x44] sm:$0xf]  ;;  %v428_v23 = vld [vmem:[%s827_s0 + $0x48] sm:$0xf0]  ;;  %v427_v25 = vor.u32 %v529_v19, %v426_v18  ;;  %v399_v26 = vor.u32 %v520_v20, %v396_v21  ;;  %v434_v30 = vld [vmem:[%s827_s0 + $0x50] sm:$0xf] }
   0xa   :  { %244 = vmatpush.bf16.msra.mxu0 %v541_v4  ;;  %601 = vmatpush.bf16.msra.mxu2 %v541_v4  ;;  %v431_v27 = vor.u32 %v528_v22, %v428_v23  ;;  %v531_v31 = vld [vmem:[%s827_s0 + $0x54] sm:$0xf0]  ;;  %v522_v32 = vld [vmem:[%s827_s0 + $0x14] sm:$0xf]  ;;  %v404_v33 = vld [vmem:[%s827_s0 + $0x18] sm:$0xf0] }
   0xb   :  { %293 = vmatpush.bf16.msra.mxu1 %v549_v5  ;;  %609 = vmatpush.bf16.msra.mxu3 %v549_v5  ;;  %v530_v34 = vld [vmem:[%s827_s0 + $0x54] sm:$0xf]  ;;  %v436_v35 = vld [vmem:[%s827_s0 + $0x58] sm:$0xf0]  ;;  %v435_v37 = vor.u32 %v531_v31, %v434_v30  ;;  %v407_v38 = vor.u32 %v522_v32, %v404_v33  ;;  %v410_v40 = vld [vmem:[%s827_s0 + $0x20] sm:$0xf] }
   0xc   :  { %v439_v39 = vor.u32 %v530_v34, %v436_v35  ;;  %v525_v41 = vld [vmem:[%s827_s0 + $0x24] sm:$0xf0]  ;;  %v442_v42 = vld [vmem:[%s827_s0 + $0x60] sm:$0xf]  ;;  %v524_v44 = vld [vmem:[%s827_s0 + $0x24] sm:$0xf] }
   0xd   :  { %v533_v43 = vld [vmem:[%s827_s0 + $0x64] sm:$0xf0]  ;;  %v412_v45 = vld [vmem:[%s827_s0 + $0x28] sm:$0xf0]  ;;  %v532_v46 = vld [vmem:[%s827_s0 + $0x64] sm:$0xf]  ;;  %v411_v48 = vor.u32 %v525_v41, %v410_v40 }
   0xe   :  { %245 = vmatpush.bf16.msra.mxu0 %v540_v6  ;;  %602 = vmatpush.bf16.msra.mxu2 %v540_v6  ;;  %v444_v47 = vld [vmem:[%s827_s0 + $0x68] sm:$0xf0]  ;;  %v443_v49 = vor.u32 %v533_v43, %v442_v42  ;;  %v415_v50 = vor.u32 %v524_v44, %v412_v45  ;;  %v418_v52 = vld [vmem:[%s827_s0 + $0x30] sm:$0xf]  ;;  %v527_v53 = vld [vmem:[%s827_s0 + $0x34] sm:$0xf0] }
   0xf   :  { %294 = vmatpush.bf16.msra.mxu1 %v548_v7  ;;  %610 = vmatpush.bf16.msra.mxu3 %v548_v7  ;;  %v447_v51 = vor.u32 %v532_v46, %v444_v47  ;;  %v450_v54 = vld [vmem:[%s827_s0 + $0x70] sm:$0xf]  ;;  %v535_v55 = vld [vmem:[%s827_s0 + $0x74] sm:$0xf0]  ;;  %v526_v56 = vld [vmem:[%s827_s0 + $0x34] sm:$0xf]  ;;  %v419_v60 = vor.u32 %v527_v53, %v418_v52 }
  0x10   :  { %v420_v57 = vld [vmem:[%s827_s0 + $0x38] sm:$0xf0]  ;;  %v534_v58 = vld [vmem:[%s827_s0 + $0x74] sm:$0xf]  ;;  %v451_v61 = vor.u32 %v535_v55, %v450_v54  ;;  %v783_v1 = vld [vmem:[%s826_s2] ss:$0 sm:$0xff] }
  0x11   :  { %v452_v59 = vld [vmem:[%s827_s0 + $0x78] sm:$0xf0]  ;;  %v423_v62 = vor.u32 %v526_v56, %v420_v57 }
  0x12   :  { %246 = vmatpush.bf16.msra.mxu0 %v539_v8  ;;  %603 = vmatpush.bf16.msra.mxu2 %v539_v8  ;;  %v455_v63 = vor.u32 %v534_v58, %v452_v59 }
  0x13   :  { %295 = vmatpush.bf16.msra.mxu1 %v547_v9  ;;  %611 = vmatpush.bf16.msra.mxu3 %v547_v9 }
  0x16   :  { %247 = vmatpush.bf16.msra.mxu0 %v538_v10  ;;  %604 = vmatpush.bf16.msra.mxu2 %v538_v10 }
  0x17   :  { %296 = vmatpush.bf16.msra.mxu1 %v546_v11  ;;  %612 = vmatpush.bf16.msra.mxu3 %v546_v11 }
  0x1a   :  { %248 = vmatpush.bf16.msra.mxu0 %v537_v12  ;;  %605 = vmatpush.bf16.msra.mxu2 %v537_v12 }
  0x1b   :  { %297 = vmatpush.bf16.msra.mxu1 %v545_v13  ;;  %613 = vmatpush.bf16.msra.mxu3 %v545_v13 }
  0x1e   :  { %249 = vmatpush.bf16.msra.mxu0 %v536_v14  ;;  %606 = vmatpush.bf16.msra.mxu2 %v536_v14 }
  0x1f   :  { %298 = vmatpush.bf16.msra.mxu1 %v544_v15  ;;  %614 = vmatpush.bf16.msra.mxu3 %v544_v15 }
  0x21   :  { %250 = vmatmul.bf16.vlgmr.msra.gmra.mxu0 %v395_v24  ;;  %270 = vmatmul.bf16.vlgmr.msra.gmra.mxu2 %v427_v25 }
  0x22   :  { %299 = vmatmul.bf16.vlgmr.msra.gmra.mxu1 %v399_v26  ;;  %319 = vmatmul.bf16.vlgmr.msra.gmra.mxu3 %v431_v27 }
  0x31   :  { %255 = vmatmul.bf16.gmra.mxu0 %v403_v36  ;;  %275 = vmatmul.bf16.gmra.mxu2 %v435_v37 }
  0x32   :  { %304 = vmatmul.bf16.gmra.mxu1 %v407_v38  ;;  %324 = vmatmul.bf16.gmra.mxu3 %v439_v39 }
  0x41   :  { %260 = vmatmul.bf16.gmra.mxu0 %v411_v48  ;;  %280 = vmatmul.bf16.gmra.mxu2 %v443_v49 }
  0x42   :  { %309 = vmatmul.bf16.gmra.mxu1 %v415_v50  ;;  %329 = vmatmul.bf16.gmra.mxu3 %v447_v51 }
  0x51   :  { %265 = vmatmul.bf16.gmra.mxu0 %v419_v60  ;;  %285 = vmatmul.bf16.gmra.mxu2 %v451_v61 }
  0x52   :  { %314 = vmatmul.bf16.gmra.mxu1 %v423_v62  ;;  %334 = vmatmul.bf16.gmra.mxu3 %v455_v63 }
  0x9e   :  { %v251_v0 = vpop.f32.mrf.mxu0 }
  0x9f   :  { %v300_v2 = vpop.f32.mrf.mxu1  ;;  %v252_v3 = vadd.f32 %v783_v1, %v251_v0 }
  0xa1   :  { %v301_v7 = vadd.f32 %v300_v2, %v252_v3 }
  0xa3   :  { %v340_v12 = vmax.f32 %v301_v7, 0.0 }
  0xa4   :  { %v271_v4 = vpop.f32.mrf.mxu2 }
  0xa5   :  { %v320_v5 = vpop.f32.mrf.mxu3  ;;  %v272_v10 = vadd.f32 %v783_v1, %v271_v4 }
  0xa6   :  { %v253_v6 = vpop.f32.mrf.mxu0 }
  0xa7   :  { %v254_v8 = vadd.f32 %v783_v1, %v253_v6  ;;  %v302_v9 = vpop.f32.mrf.mxu1  ;;  %v321_v15 = vadd.f32 %v320_v5, %v272_v10 }
  0xa9   :  { %v303_v11 = vadd.f32 %v302_v9, %v254_v8  ;;  %v348_v22 = vmax.f32 %v321_v15, 0.0 }
  0xab   :  { %v341_v13 = vmax.f32 %v303_v11, 0.0 }
  0xac   :  { %v273_v14 = vpop.f32.mrf.mxu2 }
  0xad   :  { %v555_v16 = vpack.c.bf16 %v341_v13, %v340_v12  ;;  %v274_v17 = vadd.f32 %v783_v1, %v273_v14  ;;  %v322_v18 = vpop.f32.mrf.mxu3 }
  0xae   :  { %v256_v19 = vpop.f32.mrf.mxu0 }
  0xaf   :  { %556 = vst [vmem:[%s828_s3] sm:$0xff] %v555_v16   ;;  %v323_v20 = vadd.f32 %v322_v18, %v274_v17  ;;  %v305_v21 = vpop.f32.mrf.mxu1  ;;  %v257_v25 = vadd.f32 %v783_v1, %v256_v19 }
  0xb1   :  { %v349_v23 = vmax.f32 %v323_v20, 0.0  ;;  %v306_v29 = vadd.f32 %v305_v21, %v257_v25 }
  0xb3   :  { %v575_v24 = vpack.c.bf16 %v349_v23, %v348_v22  ;;  %v342_v34 = vmax.f32 %v306_v29, 0.0 }
  0xb4   :  { %v276_v26 = vpop.f32.mrf.mxu2 }
  0xb5   :  { %595 = vst [vmem:[%s828_s3 + $0x20] sm:$0xff] %v575_v24   ;;  %v325_v27 = vpop.f32.mrf.mxu3  ;;  %v277_v32 = vadd.f32 %v783_v1, %v276_v26 }
  0xb6   :  { %v258_v28 = vpop.f32.mrf.mxu0 }
  0xb7   :  { %v259_v30 = vadd.f32 %v783_v1, %v258_v28  ;;  %v307_v31 = vpop.f32.mrf.mxu1  ;;  %v326_v37 = vadd.f32 %v325_v27, %v277_v32 }
  0xb9   :  { %v308_v33 = vadd.f32 %v307_v31, %v259_v30  ;;  %v350_v44 = vmax.f32 %v326_v37, 0.0 }
  0xbb   :  { %v343_v35 = vmax.f32 %v308_v33, 0.0 }
  0xbc   :  { %v278_v36 = vpop.f32.mrf.mxu2 }
  0xbd   :  { %v560_v38 = vpack.c.bf16 %v343_v35, %v342_v34  ;;  %v279_v39 = vadd.f32 %v783_v1, %v278_v36  ;;  %v327_v40 = vpop.f32.mrf.mxu3 }
  0xbe   :  { %v261_v41 = vpop.f32.mrf.mxu0 }
  0xbf   :  { %592 = vst [vmem:[%s828_s3 + $0x8] sm:$0xff] %v560_v38   ;;  %v328_v42 = vadd.f32 %v327_v40, %v279_v39  ;;  %v310_v43 = vpop.f32.mrf.mxu1  ;;  %v262_v47 = vadd.f32 %v783_v1, %v261_v41 }
  0xc1   :  { %v351_v45 = vmax.f32 %v328_v42, 0.0  ;;  %v311_v51 = vadd.f32 %v310_v43, %v262_v47 }
  0xc3   :  { %v580_v46 = vpack.c.bf16 %v351_v45, %v350_v44  ;;  %v344_v56 = vmax.f32 %v311_v51, 0.0 }
  0xc4   :  { %v281_v48 = vpop.f32.mrf.mxu2 }
  0xc5   :  { %596 = vst [vmem:[%s828_s3 + $0x28] sm:$0xff] %v580_v46   ;;  %v330_v49 = vpop.f32.mrf.mxu3  ;;  %v282_v54 = vadd.f32 %v783_v1, %v281_v48 }
  0xc6   :  { %v263_v50 = vpop.f32.mrf.mxu0 }
  0xc7   :  { %v264_v52 = vadd.f32 %v783_v1, %v263_v50  ;;  %v312_v53 = vpop.f32.mrf.mxu1  ;;  %v331_v59 = vadd.f32 %v330_v49, %v282_v54 }
  0xc9   :  { %v313_v55 = vadd.f32 %v312_v53, %v264_v52  ;;  %v352_v3 = vmax.f32 %v331_v59, 0.0 }
  0xcb   :  { %v345_v57 = vmax.f32 %v313_v55, 0.0 }
  0xcc   :  { %v283_v58 = vpop.f32.mrf.mxu2 }
  0xcd   :  { %v565_v60 = vpack.c.bf16 %v345_v57, %v344_v56  ;;  %v284_v61 = vadd.f32 %v783_v1, %v283_v58  ;;  %v332_v62 = vpop.f32.mrf.mxu3 }
  0xce   :  { %v266_v63 = vpop.f32.mrf.mxu0 }
  0xcf   :  { %593 = vst [vmem:[%s828_s3 + $0x10] sm:$0xff] %v565_v60   ;;  %v333_v0 = vadd.f32 %v332_v62, %v284_v61  ;;  %v315_v2 = vpop.f32.mrf.mxu1  ;;  %v267_v6 = vadd.f32 %v783_v1, %v266_v63 }
  0xd1   :  { %v353_v4 = vmax.f32 %v333_v0, 0.0  ;;  %v316_v10 = vadd.f32 %v315_v2, %v267_v6 }
  0xd3   :  { %v585_v5 = vpack.c.bf16 %v353_v4, %v352_v3  ;;  %v346_v15 = vmax.f32 %v316_v10, 0.0 }
  0xd4   :  { %v286_v7 = vpop.f32.mrf.mxu2 }
  0xd5   :  { %597 = vst [vmem:[%s828_s3 + $0x30] sm:$0xff] %v585_v5   ;;  %v335_v8 = vpop.f32.mrf.mxu3  ;;  %v287_v13 = vadd.f32 %v783_v1, %v286_v7 }
  0xd6   :  { %v268_v9 = vpop.f32.mrf.mxu0 }
  0xd7   :  { %v269_v11 = vadd.f32 %v783_v1, %v268_v9  ;;  %v317_v12 = vpop.f32.mrf.mxu1  ;;  %v336_v18 = vadd.f32 %v335_v8, %v287_v13 }
  0xd9   :  { %v318_v14 = vadd.f32 %v317_v12, %v269_v11  ;;  %v354_v23 = vmax.f32 %v336_v18, 0.0 }
  0xdb   :  { %v347_v16 = vmax.f32 %v318_v14, 0.0 }
  0xdc   :  { %v288_v17 = vpop.f32.mrf.mxu2 }
  0xdd   :  { %v570_v19 = vpack.c.bf16 %v347_v16, %v346_v15  ;;  %v289_v20 = vadd.f32 %v783_v1, %v288_v17  ;;  %v337_v21 = vpop.f32.mrf.mxu3 }
  0xdf   :  { %594 = vst [vmem:[%s828_s3 + $0x18] sm:$0xff] %v570_v19   ;;  %v338_v22 = vadd.f32 %v337_v21, %v289_v20 }
  0xe1   :  { %v355_v24 = vmax.f32 %v338_v22, 0.0 }
  0xe3   :  { %v590_v25 = vpack.c.bf16 %v355_v24, %v354_v23 }
  0xe5   :  { %598 = vst [vmem:[%s828_s3 + $0x38] sm:$0xff] %v590_v25  }

// kernel: cnnnet_forward.3
= control target key start
LH: loop header
LB: loop body
LE: loop exit
PB: predicated region body
PF: predicated region fallthrough
CT: control target
= control target key end

     0   :  { %s6013_s0 = inlined_call_operand.vmem [shape: bf16[2,16,128], index: 0, kind: input, shape index: {}]   ;;  %s6014_s1 = inlined_call_operand.vmem [shape: bf16[128,128], index: 1, kind: input, shape index: {}]   ;;  %s6015_s2 = inlined_call_operand.vmem [shape: f32[1,128], index: 2, kind: input, shape index: {}]   ;;  %s6016_s3 = inlined_call_operand.vmem [shape: bf16[9,128,128], index: 3, kind: input, shape index: {}]   ;;  %s6017_s4 = inlined_call_operand.vmem [shape: f32[1,128], index: 4, kind: input, shape index: {}]   ;;  %s6018_s5 = inlined_call_operand.vmem [shape: bf16[128,128], index: 5, kind: input, shape index: {}]   ;;  %s6019_s6 = inlined_call_operand.vmem [shape: f32[1,128], index: 6, kind: input, shape index: {}]   ;;  %s6020_s7 = inlined_call_operand.vmem [shape: bf16[9,128,128], index: 7, kind: input, shape index: {}]   ;;  %s6021_s8 = inlined_call_operand.vmem [shape: f32[1,128], index: 8, kind: input, shape index: {}]   ;;  %s6022_s9 = inlined_call_operand.vmem [shape: bf16[128,128], index: 9, kind: input, shape index: {}]   ;;  %s6023_s10 = inlined_call_operand.vmem [shape: f32[1,128], index: 10, kind: input, shape index: {}]   ;;  %s6024_s11 = inlined_call_operand.hbm [shape: f32[2,16,128], index: 11, kind: output, shape index: {0}]   ;;  %s6025_s12 = inlined_call_operand.hbm [shape: f32[2,1,128], index: 12, kind: output, shape index: {1}]   ;;  %s6026_s13 = inlined_call_operand.hbm [shape: f32[2,1,128], index: 13, kind: output, shape index: {2}]  }
   0x1   :  { %6031 = sst [smem:[#allocation13_spill]] %s6013_s0 }
   0x2   :  { %6032 = sst [smem:[#allocation14_spill]] %s6014_s1 }
   0x3   :  { %6033 = sst [smem:[#allocation15_spill]] %s6015_s2 }
   0x4   :  { %6034 = sst [smem:[#allocation16_spill]] %s6016_s3 }
   0x5   :  { %6035 = sst [smem:[#allocation17_spill]] %s6017_s4 }
   0x6   :  { %6036 = sst [smem:[#allocation18_spill]] %s6018_s5 }
   0x7   :  { %19 = vsyncpa [#allocation4], 0 }
   0x8   :  { %21 = vsyncpa [#allocation4 + $0x1], 0 }
   0x9   :  { %22 = vsyncpa [#allocation6], 0 }
   0xa   :  { %24 = vsyncpa [#allocation6 + $0x1], 0  ;;  %s5086_s25 = smov 0   ;;  %s5088_s26 = smov 0  }
   0xb   :  { %s5090_s27 = smov 0   ;;  %s5092_s28 = smov 0  }
   0xc LB: > { %6037 = sst [smem:[#allocation10_spill]] %s5006_s27  ;;  %s5107_s29 = sadd.s32 4294967295, %s5010_s28   ;;  %s5010_s28 = sphi %s5092_s28, %s6057_s28   ;;  %s5006_s27 = sphi %s5090_s27, %s6059_s27   ;;  %s5002_s26 = sphi %s5088_s26, %s6061_s26   ;;  %s4998_s25 = sphi %s5086_s25, %s6060_s25  }
   0xd   : > { %s6027_s30 = sadd.s32 4294967294, %s5010_s28   ;;  %s5111_s14 = sadd.s32 1, %s5010_s28  }
   0xe   : > { %6038 = sst [smem:[#allocation11_spill]] %s5111_s14  ;;  %s273_s15 = sadd.s32 1, %s5006_s27 }
   0xf   : > { %s270_s16 = ssub.s32 %s5010_s28, %s5111_s14  ;;  %p283_p0 = scmp.ne.s32.totalorder %s5006_s27, %s5002_s26 }
  0x10   : > { %p271_p1 = scmp.eq.s32.totalorder %s270_s16, 0  ;;  %p284_p2 = scmp.eq.s32.totalorder %s5107_s29, 1 }
  0x11   : > { %p289_p3 = scmp.ne.s32.totalorder %s5002_s26, %s4998_s25  ;;  %p290_p4 = scmp.eq.s32.totalorder %s6027_s30, 1 }
  0x12   : > { %s5124_s17 = scalar_select %p271_p1, %s5006_s27, %s273_s15  }
  0x13   : > { %p5126_p5 = por %p284_p2, %p283_p0  ;;  %p5130_p6 = por %p290_p4, %p289_p3 }
  0x14   : > { %6039 = sst [smem:[#allocation12_spill]] %s5124_s17  ;;  %p3669_p7 = scmp.ge.s32.totalorder %s5010_s28, 1 }
  0x15   : > { %p398_p8 = scmp.lt.s32.totalorder %s5010_s28, 3 }
  0x17   : > { %p399_p9 = pnand %p3669_p7, %p398_p8 }
  0x18   : > { %s6042_s1 = sld [smem:[#allocation14_spill]] (!%p399_p9)  ;;  %p450_p10 = scmp.lt.s32.totalorder (!%p399_p9), %s5107_s29, 1 }
  0x19   : > { %402 = sbr.rel (%p399_p9) target bundleno = 1064 (0x428), region = 64  ;;  %s6043_s0 = sld [smem:[#allocation13_spill]] (!%p399_p9) }
  0x1a   : > { %s6044_s2 = sld [smem:[#allocation15_spill]] (!%p399_p9)  ;;  %s5922_s20 = sand.u32 (!%p399_p9), 1, %s5002_s26  }
  0x1b   : > { %s6049_s3 = sld [smem:[#allocation16_spill]] (!%p399_p9)  ;;  %s3670_s30 = sshll.u32 (!%p399_p9), %s5922_s20, 4 }
  0x1c   : > { %s6054_s5 = sld [smem:[#allocation18_spill]] (!%p399_p9)  ;;  %s5932_s17 = scalar_lea.vmem (!%p399_p9), [#allocation3], %s3670_s30 }
  0x1d   : > { %s6055_s4 = sld [smem:[#allocation17_spill]] (!%p399_p9)  ;;  %s443_s15 = scalar_lea.vmem (!%p399_p9), [#allocation5], %s5922_s20 }
  0x1e   : > { %v4667_v0 = vld [vmem:[%s6042_s1 + $0x38] sm:$0xff]  ;;  %v4666_v1 = vld [vmem:[%s6042_s1 + $0x30] sm:$0xff]  ;;  %v5012_v2 = vmov 0   ;;  %v4665_v3 = vld [vmem:[%s6042_s1 + $0x28] sm:$0xff]  ;;  %s451_s24 = scalar_select %p450_p10, %s5107_s29, 1  ;;  %vm560_vm0 = vcmask 1041408  }
  0x1f   : > { %538 = vmatpush.bf16.msra.mxu0 %v4667_v0  ;;  %458 = vst [vmem:[#allocation2] sm:$0x7] %v5012_v2  ;;  %v4664_v4 = vld [vmem:[%s6042_s1 + $0x20] sm:$0xff]  ;;  %v4663_v5 = vld [vmem:[%s6042_s1 + $0x18] sm:$0xff]  ;;  %v4662_v6 = vld [vmem:[%s6042_s1 + $0x10] sm:$0xff]  ;;  %vm564_vm1 = vcmask 1043458   ;;  %s3536_s30 = scalar_lea.hbm %s6025_s12, %s5107_s29 }
  0x20   : > { %459 = vst [vmem:[#allocation2 + $0x4] sm:$0x7] %v5012_v2  ;;  %v4661_v7 = vld [vmem:[%s6042_s1 + $0x8] sm:$0xff]  ;;  %s4658_s27 = sshll.u32 %s451_s24, 3  ;;  %v4660_v8 = vld [vmem:[%s6042_s1] sm:$0xff]  ;;  %vm616_vm9 = vcmask 1042432  }
  0x21   : > { %460 = vst [vmem:[#allocation2 + $0x8] sm:$0x7] %v5012_v2  ;;  %s5165_s14 = scalar_lea.vmem %s6043_s0, %s4658_s27  ;;  %v4882_v10 = vld [vmem:[%s6044_s2] ss:$0 sm:$0xff]  ;;  %vm687_vm2 = vsmask.f32 1280 }
  0x22   : > { %463 = vst [vmem:[#allocation2 + $0x14] sm:$0x7] %v5012_v2  ;;  %v4659_v9 = vld [vmem:[%s5165_s14] sm:$0xff]  ;;  %vm688_vm3 = vsmask.f32 3336  ;;  %vm953_vm12 = vcmask 1040384  }
  0x23   : > { %539 = vmatpush.bf16.msra.mxu0 %v4666_v1  ;;  %461 = vst [vmem:[#allocation2 + $0xc] sm:$0x7] %v5012_v2  ;;  %vm689_vm4 = vmor %vm687_vm2, %vm688_vm3  ;;  %vm690_vm5 = vsmask.f32 5392  ;;  %vm692_vm7 = vsmask.f32 7448 }
  0x24   : > { %462 = vst [vmem:[#allocation2 + $0x10] sm:$0x7] %v5012_v2  ;;  %vm691_vm6 = vmor %vm689_vm4, %vm690_vm5  ;;  %vm617_vm10 = vsmask.f32 2306  ;;  %vm954_vm13 = vcmask 1042434   ;;  %vm956_vm14 = vcmask 1044484  }
  0x25   : > { %vm5175_vm8 = vmor %vm691_vm6, %vm692_vm7  ;;  %vm958_vm2 = vcmask 1046534   ;;  %s3506_s16 = sand.u32 1, %s5107_s29   ;;  %s3538_s23 = sshll.u32 %s443_s15, 4  ;;  %s3539_s23 = int_to_ptr.vmem [resolvable:$true] %s3538_s23 }
  0x26   : > { %v651_v13 = vld [vmem:[#allocation2] sm:$0x7]  ;;  %vm5183_vm11 = vmand %vm616_vm9, %vm617_vm10  ;;  %s3540_s27 = sshll.u32 %s3536_s30, 4  ;;  %s5947_s24 = scalar_lea.sflag [#allocation6], %s3506_s16  ;;  %s3541_s27 = int_to_ptr.hbm [resolvable:$true] %s3540_s27 }
  0x27   : > { %540 = vmatpush.bf16.msra.mxu0 %v4665_v3  ;;  %v659_v15 = vrot.slane %v651_v13, 2  ;;  %v619_v49 = vld [vmem:[#allocation2 + $0x4] sm:$0x7]  ;;  %vm5298_vm15 = vmor %vm953_vm12, %vm954_vm13  ;;  %s4902_s0 = sshra.s32 %s3541_s27, 4  ;;  %s4903_s0 = int_to_ptr.hbm [resolvable:$true] %s4902_s0 }
  0x28   : > { %v622_v53 = vld [vmem:[#allocation2 + $0x8] sm:$0x7]  ;;  %vm957_vm3 = vmor %vm5298_vm15, %vm956_vm14  ;;  %s4904_s1 = scalar_lea.hbm %s4903_s0, 1  ;;  %p4909_p0 = scmp.lt.s32.totalorder %s4903_s0, %s6025_s12 }
  0x29   : > { %v665_v17 = vsel %vm560_vm0, %v651_v13, %v659_v15  ;;  %v666_v18 = vsel %vm564_vm1, %v651_v13, %v659_v15  ;;  %vm5333_vm4 = vmor %vm957_vm3, %vm958_vm2  ;;  %p4905_p11 = scmp.ne.s32.totalorder %s4903_s0, %s4904_s1 }
  0x2a   : > { %v668_v19 = vrot.slane %v666_v18, 2  ;;  %v694_v20 = vshrl.u32 %v665_v17, 16  ;;  %v697_v22 = vshll.u32 %v665_v17, 16 }
  0x2b   : > { %541 = vmatpush.bf16.msra.mxu0 %v4664_v4  ;;  %p4906_p12 = pnand %p4905_p11, %p5126_p5 }
  0x2c   : > { %v696_v23 = vrot.slane %v694_v20, 6  ;;  %v703_v24 = vshll.u32 %v668_v19, 16  ;;  %v699_v28 = vrot.slane %v697_v22, 7 }
  0x2d   : > { %p4907_p13 = pneg %p4906_p12 }
  0x2e   : > { %v700_v31 = vor.u32 %v699_v28, %v696_v23  ;;  %v705_v34 = vrot.slane %v703_v24, 7  ;;  %v4683_v28 = vld [vmem:[%s6049_s3 + $0x78] sm:$0xff] }
  0x2f   : > { %542 = vmatpush.bf16.msra.mxu0 %v4663_v5  ;;  %824 = vmatpush.bf16.msra.mxu1 %v4683_v28 }
  0x30   : > { %v701_v33 = vrot.slane %v700_v31, 2 }
  0x32   : > { %v706_v39 = vsel %vm5175_vm8, %v701_v33, %v705_v34  ;;  %v4675_v34 = vld [vmem:[%s6049_s3 + $0x38] sm:$0xff] }
  0x33   : > { %543 = vmatpush.bf16.msra.mxu0 %v4662_v6  ;;  %899 = vmatpush.bf16.msra.mxu2 %v4675_v34  ;;  %v4715_v34 = vld [vmem:[%s6049_s3 + $0x178] sm:$0xff] }
  0x37   : > { %544 = vmatpush.bf16.msra.mxu0 %v4661_v7 }
  0x3b   : > { %545 = vmatpush.bf16.msra.mxu0 %v4660_v8 }
  0x3e   : > { %546 = vmatmul.bf16.vlgmr.msra.gmra.mxu0 %v4659_v9 }
  0xbb   : > { %v547_v11 = vpop.f32.mrf.mxu0 }
  0xbc   : > { %v548_v12 = vadd.f32 %v4882_v10, %v547_v11 }
  0xbe   : > { %v552_v14 = vmax.f32 %v548_v12, 0.0 }
  0xc0   : > { %v554_v16 = vpack.c.bf16 %v552_v14, %v552_v14 }
  0xc2   : > { %v558_v21 = vrot.slane %v554_v16, 2 }
  0xc3   : > { %v549_v25 = vpop.f32.mrf.mxu0 }
  0xc4   : > { %v563_v26 = vsel %vm560_vm0, %v554_v16, %v558_v21  ;;  %v565_v27 = vsel %vm564_vm1, %v554_v16, %v558_v21  ;;  %v550_v29 = vadd.f32 %v4882_v10, %v549_v25  ;;  %v625_v16 = vld [vmem:[#allocation2 + $0xc] sm:$0x7] }
  0xc5   : > { %v567_v30 = vrot.slane %v565_v27, 2  ;;  %574 = vst [vmem:[#allocation1] ss:$2 sm:$0xff] %v563_v26 }
  0xc6   : > { %v553_v32 = vmax.f32 %v550_v29, 0.0 }
  0xc7   : > { %578 = vst [vmem:[#allocation1 + $0x10] ss:$2 sm:$0xff] %v567_v30  ;;  %v4682_v30 = vld [vmem:[%s6049_s3 + $0x70] sm:$0xff] }
  0xc8   : > { %v555_v35 = vpack.c.bf16 %v553_v32, %v553_v32  ;;  %825 = vmatpush.bf16.msra.mxu1 %v4682_v30  ;;  %v4681_v32 = vld [vmem:[%s6049_s3 + $0x68] sm:$0xff]  ;;  %v4695_v30 = vld [vmem:[%s6049_s3 + $0xd8] sm:$0xff] }
  0xca   : > { %v559_v36 = vrot.slane %v555_v35, 2 }
  0xcc   : > { %v575_v38 = vld.sshfl [vmem:[#allocation1] sm:$0xff pattern:$0x75643120]  ;;  %v570_v40 = vsel %vm560_vm0, %v555_v35, %v559_v36  ;;  %v571_v41 = vsel %vm564_vm1, %v555_v35, %v559_v36  ;;  %826 = vmatpush.bf16.msra.mxu1 %v4681_v32 }
  0xcd   : > { %v587_v42 = vshrl.u32 %v575_v38, 16  ;;  %v573_v43 = vrot.slane %v571_v41, 2  ;;  %581 = vst [vmem:[#allocation1 + $0x20] ss:$2 sm:$0xff] %v570_v40  ;;  %v590_v46 = vshll.u32 %v575_v38, 16  ;;  %v4680_v36 = vld [vmem:[%s6049_s3 + $0x60] sm:$0xff] }
  0xce   : > { %v579_v44 = vld.sshfl [vmem:[#allocation1 + $0x10] sm:$0xff pattern:$0x75643120]  ;;  %v628_v40 = vld [vmem:[#allocation2 + $0x10] sm:$0x7] }
  0xcf   : > { %v589_v45 = vrot.slane %v587_v42, 7  ;;  %v593_v47 = vshrl.u32 %v579_v44, 16  ;;  %764 = vst [vmem:[#allocation1] ss:$4 sm:$0xff] %v706_v39  ;;  %v596_v52 = vshll.u32 %v579_v44, 16  ;;  %v4674_v38 = vld [vmem:[%s6049_s3 + $0x30] sm:$0xff] }
  0xd0   : > { %585 = vst [vmem:[#allocation1 + $0x30] ss:$2 sm:$0xff] %v573_v43  ;;  %827 = vmatpush.bf16.msra.mxu1 %v4680_v36  ;;  %v4679_v42 = vld [vmem:[%s6049_s3 + $0x58] sm:$0xff]  ;;  %900 = vmatpush.bf16.msra.mxu2 %v4674_v38  ;;  %v4673_v44 = vld [vmem:[%s6049_s3 + $0x28] sm:$0xff] }
  0xd1   : > { %v592_v50 = vor.u32 %v590_v46, %v589_v45  ;;  %v595_v51 = vrot.slane %v593_v47, 7  ;;  %v4691_v43 = vld [vmem:[%s6049_s3 + $0xb8] sm:$0xff]  ;;  %v4678_v47 = vld [vmem:[%s6049_s3 + $0x50] sm:$0xff] }
  0xd2   : > { %1054 = vmatpush.bf16.msra.mxu3 %v4691_v43 }
  0xd3   : > { %v598_v54 = vor.u32 %v596_v52, %v595_v51  ;;  %v620_v55 = vsel %vm5183_vm11, %v592_v50, %v619_v49  ;;  %v4672_v51 = vld [vmem:[%s6049_s3 + $0x20] sm:$0xff]  ;;  %v4690_v52 = vld [vmem:[%s6049_s3 + $0xb0] sm:$0xff] }
  0xd4   : > { %621 = vst [vmem:[#allocation2 + $0x4] sm:$0x7] %v620_v55  ;;  %v582_v57 = vld.sshfl [vmem:[#allocation1 + $0x20] sm:$0xff pattern:$0x75643120]  ;;  %828 = vmatpush.bf16.msra.mxu1 %v4679_v42  ;;  %901 = vmatpush.bf16.msra.mxu2 %v4673_v44 }
  0xd5   : > { %v623_v56 = vsel %vm5183_vm11, %v598_v54, %v622_v53  ;;  %v599_v58 = vshrl.u32 %v582_v57, 16  ;;  %v602_v7 = vshll.u32 %v582_v57, 16  ;;  %v4689_v57 = vld [vmem:[%s6049_s3 + $0xa8] sm:$0xff]  ;;  %v4704_v42 = vld [vmem:[%s6049_s3 + $0x120] sm:$0xff] }
  0xd6   : > { %624 = vst [vmem:[#allocation2 + $0x8] sm:$0x7] %v623_v56  ;;  %1055 = vmatpush.bf16.msra.mxu3 %v4690_v52  ;;  %v4677_v56 = vld [vmem:[%s6049_s3 + $0x48] sm:$0xff] }
  0xd7   : > { %v601_v1 = vrot.slane %v599_v58, 7  ;;  %v586_v29 = vld.sshfl [vmem:[#allocation1 + $0x30] sm:$0xff pattern:$0x75643120] }
  0xd8   : > { %v605_v31 = vshrl.u32 %v586_v29, 16  ;;  %v608_v35 = vshll.u32 %v586_v29, 16  ;;  %829 = vmatpush.bf16.msra.mxu1 %v4678_v47  ;;  %902 = vmatpush.bf16.msra.mxu2 %v4672_v51 }
  0xd9   : > { %v604_v14 = vor.u32 %v602_v7, %v601_v1  ;;  %v4670_v1 = vld [vmem:[%s6049_s3 + $0x10] sm:$0xff]  ;;  %v4687_v7 = vld [vmem:[%s6049_s3 + $0x98] sm:$0xff] }
  0xda   : > { %v607_v33 = vrot.slane %v605_v31, 7  ;;  %1056 = vmatpush.bf16.msra.mxu3 %v4689_v57 }
  0xdb   : > { %v652_v59 = vld [vmem:[#allocation2 + $0x4] sm:$0x7]  ;;  %v626_v23 = vsel %vm5183_vm11, %v604_v14, %v625_v16  ;;  %v4696_v14 = vld [vmem:[%s6049_s3 + $0xe0] sm:$0xff]  ;;  %v631_v16 = vld [vmem:[#allocation2] sm:$0x3] }
  0xdc   : > { %v660_v60 = vrot.slane %v652_v59, 2  ;;  %627 = vst [vmem:[#allocation2 + $0xc] sm:$0x7] %v626_v23  ;;  %v610_v39 = vor.u32 %v608_v35, %v607_v33  ;;  %830 = vmatpush.bf16.msra.mxu1 %v4677_v56  ;;  %v4705_v33 = vld [vmem:[%s6049_s3 + $0x128] sm:$0xff]  ;;  %v4684_v35 = vld [vmem:[%s6049_s3 + $0x80] sm:$0xff] }
  0xdd   : > { %v653_v61 = vld [vmem:[#allocation2 + $0x8] sm:$0x7]  ;;  %v1070_v29 = vld [vmem:[#allocation2 + $0x4] sm:$0x3] }
  0xde   : > { %v661_v62 = vrot.slane %v653_v61, 2  ;;  %v671_v63 = vsel %vm560_vm0, %v652_v59, %v660_v60  ;;  %v672_v0 = vsel %vm564_vm1, %v652_v59, %v660_v60  ;;  %v629_v45 = vsel %vm5183_vm11, %v610_v39, %v628_v40  ;;  %v4671_v59 = vld [vmem:[%s6049_s3 + $0x18] sm:$0xff] }
  0xdf   : > { %v674_v2 = vrot.slane %v672_v0, 2  ;;  %v707_v3 = vshrl.u32 %v671_v63, 16  ;;  %v710_v4 = vshll.u32 %v671_v63, 16  ;;  %630 = vst [vmem:[#allocation2 + $0x10] sm:$0x7] %v629_v45  ;;  %v4699_v60 = vld [vmem:[%s6049_s3 + $0xf8] sm:$0xff]  ;;  %903 = vmatpush.bf16.msra.mxu2 %v4671_v59 }
  0xe0   : > { %v677_v5 = vsel %vm560_vm0, %v653_v61, %v661_v62  ;;  %v678_v6 = vsel %vm564_vm1, %v653_v61, %v661_v62  ;;  %1152 = vmatpush.bf16.msrb.mxu0 %v4699_v60  ;;  %v4676_v0 = vld [vmem:[%s6049_s3 + $0x40] sm:$0xff]  ;;  %v4714_v45 = vld [vmem:[%s6049_s3 + $0x170] sm:$0xff]  ;;  %v4703_v59 = vld [vmem:[%s6049_s3 + $0x118] sm:$0xff] }
  0xe1   : > { %v680_v8 = vrot.slane %v678_v6, 2  ;;  %v709_v9 = vrot.slane %v707_v3, 6  ;;  %v712_v10 = vrot.slane %v710_v4, 7  ;;  %v716_v11 = vshll.u32 %v674_v2, 16  ;;  %v4688_v2 = vld [vmem:[%s6049_s3 + $0xa0] sm:$0xff]  ;;  %831 = vmatpush.bf16.msra.mxu1 %v4676_v0  ;;  %v4723_v60 = vld [vmem:[%s6049_s3 + $0x1b8] sm:$0xff] }
  0xe2   : > { %v720_v12 = vshrl.u32 %v677_v5, 16  ;;  %v723_v13 = vshll.u32 %v677_v5, 16  ;;  %v4698_v5 = vld [vmem:[%s6049_s3 + $0xf0] sm:$0xff]  ;;  %1057 = vmatpush.bf16.msra.mxu3 %v4688_v2 }
  0xe3   : > { %v713_v15 = vor.u32 %v712_v10, %v709_v9  ;;  %v729_v19 = vshll.u32 %v680_v8, 16  ;;  %v718_v21 = vrot.slane %v716_v11, 7  ;;  %v654_v41 = vld [vmem:[#allocation2 + $0xc] sm:$0x7]  ;;  %v4697_v8 = vld [vmem:[%s6049_s3 + $0xe8] sm:$0xff]  ;;  %904 = vmatpush.bf16.msra.mxu2 %v4670_v1  ;;  %v4707_v10 = vld [vmem:[%s6049_s3 + $0x138] sm:$0xff] }
  0xe4   : > { %v722_v17 = vrot.slane %v720_v12, 6  ;;  %v725_v18 = vrot.slane %v723_v13, 7  ;;  %v662_v46 = vrot.slane %v654_v41, 2  ;;  %1153 = vmatpush.bf16.msrb.mxu0 %v4698_v5  ;;  %v4669_v9 = vld [vmem:[%s6049_s3 + $0x8] sm:$0xff]  ;;  %v4686_v12 = vld [vmem:[%s6049_s3 + $0x90] sm:$0xff]  ;;  %v4668_v13 = vld [vmem:[%s6049_s3] sm:$0xff] }
  0xe5   : > { %v714_v20 = vrot.slane %v713_v15, 2  ;;  %v731_v26 = vrot.slane %v729_v19, 7  ;;  %v913_v11 = vld [vmem:[#allocation2] sm:$0x6]  ;;  %1334 = vmatpush.bf16.msrb.mxu1 %v4707_v10  ;;  %v4706_v15 = vld [vmem:[%s6049_s3 + $0x130] sm:$0xff] }
  0xe6   : > { %v726_v22 = vor.u32 %v725_v18, %v722_v17  ;;  %v683_v49 = vsel %vm560_vm0, %v654_v41, %v662_v46  ;;  %v684_v50 = vsel %vm564_vm1, %v654_v41, %v662_v46  ;;  %1058 = vmatpush.bf16.msra.mxu3 %v4687_v7  ;;  %v914_v17 = vld [vmem:[#allocation2 + $0x4] sm:$0x6]  ;;  %v921_v18 = vrot.slane %v913_v11, 2  ;;  %v915_v19 = vld [vmem:[#allocation2 + $0x8] sm:$0x6] }
  0xe7   : > { %v719_v24 = vsel %vm5175_vm8, %v714_v20, %v718_v21  ;;  %v686_v53 = vrot.slane %v684_v50, 2  ;;  %v733_v54 = vshrl.u32 %v683_v49, 16  ;;  %v736_v55 = vshll.u32 %v683_v49, 16  ;;  %905 = vmatpush.bf16.msra.mxu2 %v4669_v9  ;;  %v916_v21 = vld [vmem:[#allocation2 + $0xc] sm:$0x6]  ;;  %v4713_v1 = vld [vmem:[%s6049_s3 + $0x168] sm:$0xff] }
  0xe8   : > { %v727_v25 = vrot.slane %v726_v22, 2  ;;  %767 = vst [vmem:[#allocation1 + $0x1] ss:$4 sm:$0xff] %v719_v24  ;;  %1154 = vmatpush.bf16.msrb.mxu0 %v4697_v8  ;;  %v632_v22 = vld [vmem:[#allocation2 + $0x4] sm:$0x3]  ;;  %v922_v23 = vrot.slane %v914_v17, 2  ;;  %v929_v28 = vsel %vm564_vm1, %v913_v11, %v921_v18 }
  0xe9   : > { %v735_v58 = vrot.slane %v733_v54, 6  ;;  %v738_v61 = vrot.slane %v736_v55, 7  ;;  %v742_v62 = vshll.u32 %v686_v53, 16  ;;  %1335 = vmatpush.bf16.msrb.mxu1 %v4706_v15  ;;  %v4685_v24 = vld [vmem:[%s6049_s3 + $0x88] sm:$0xff]  ;;  %v634_v31 = vld [vmem:[#allocation2 + $0xc] sm:$0x3] }
  0xea   : > { %v732_v27 = vsel %vm5175_vm8, %v727_v25, %v731_v26  ;;  %1059 = vmatpush.bf16.msra.mxu3 %v4686_v12  ;;  %v633_v25 = vld [vmem:[#allocation2 + $0x8] sm:$0x3]  ;;  %v923_v26 = vrot.slane %v915_v19, 2  ;;  %v924_v32 = vrot.slane %v916_v21, 2  ;;  %v934_v36 = vsel %vm560_vm0, %v914_v17, %v922_v23  ;;  %v1168_v46 = vld [vmem:[#allocation2 + $0x4] sm:$0x7] }
  0xeb   : > { %770 = vst [vmem:[#allocation1 + $0x2] ss:$4 sm:$0xff] %v732_v27  ;;  %v739_v63 = vor.u32 %v738_v61, %v735_v58  ;;  %v744_v4 = vrot.slane %v742_v62, 7  ;;  %906 = vmatpush.bf16.msra.mxu2 %v4668_v13  ;;  %v927_v27 = vsel %vm560_vm0, %v913_v11, %v921_v18  ;;  %v936_v38 = vsel %vm564_vm1, %v914_v17, %v922_v23  ;;  %v4694_v41 = vld [vmem:[%s6049_s3 + $0xd0] sm:$0xff]  ;;  %v4693_v54 = vld [vmem:[%s6049_s3 + $0xc8] sm:$0xff]  ;;  %v4712_v13 = vld [vmem:[%s6049_s3 + $0x160] sm:$0xff] }
  0xec   : > { %1155 = vmatpush.bf16.msrb.mxu0 %v4696_v14  ;;  %v3789_v39 = vrot.slane %v927_v27, 9  ;;  %v3790_v40 = vrot.slane %v929_v28, 9  ;;  %v941_v43 = vsel %vm560_vm0, %v915_v19, %v923_v26  ;;  %v943_v44 = vsel %vm564_vm1, %v915_v19, %v923_v26  ;;  %v1169_v53 = vld [vmem:[#allocation2 + $0x8] sm:$0x7]  ;;  %v5342_v58 = vld [vmem:[#allocation2 + $0xc] sm:$0x7] }
  0xed   : > { %v740_v3 = vrot.slane %v739_v63, 2  ;;  %1336 = vmatpush.bf16.msrb.mxu1 %v4705_v33  ;;  %v948_v47 = vsel %vm560_vm0, %v916_v21, %v924_v32  ;;  %v950_v49 = vsel %vm564_vm1, %v916_v21, %v924_v32  ;;  %v3791_v51 = vrot.slane %v934_v36, 9  ;;  %v5350_v0 = vld [vmem:[#allocation2 + $0x10] sm:$0x7]  ;;  %v4702_v9 = vld [vmem:[%s6049_s3 + $0x110] sm:$0xff]  ;;  %v4720_v32 = vld [vmem:[%s6049_s3 + $0x1a0] sm:$0xff] }
  0xee   : > { %1060 = vmatpush.bf16.msra.mxu3 %v4685_v24  ;;  %v3792_v52 = vrot.slane %v936_v38, 9  ;;  %v963_v55 = vsel %vm5333_vm4, %v3789_v39, %v3790_v40  ;;  %v3793_v56 = vrot.slane %v941_v43, 9  ;;  %v3794_v57 = vrot.slane %v943_v44, 9  ;;  %v4722_v10 = vld [vmem:[%s6049_s3 + $0x1b0] sm:$0xff]  ;;  %v4731_v21 = vld [vmem:[%s6049_s3 + $0x1f8] sm:$0xff]  ;;  %v4700_v39 = vld [vmem:[%s6049_s3 + $0x100] sm:$0xff] }
  0xef   : > { %v745_v6 = vsel %vm5175_vm8, %v740_v3, %v744_v4  ;;  %1484 = vmatpush.bf16.msrb.mxu2 %v4715_v34  ;;  %v1176_v61 = vrot.slane %v1168_v46, 2  ;;  %v3795_v62 = vrot.slane %v948_v47, 9  ;;  %v3796_v63 = vrot.slane %v950_v49, 9  ;;  %v4711_v26 = vld [vmem:[%s6049_s3 + $0x158] sm:$0xff]  ;;  %v1071_v33 = vld [vmem:[#allocation2 + $0x8] sm:$0x3] }
  0xf0   : > { %773 = vst [vmem:[#allocation1 + $0x3] ss:$4 sm:$0xff] %v745_v6  ;;  %1156 = vmatpush.bf16.msrb.mxu0 %v4695_v30  ;;  %v1177_v2 = vrot.slane %v1169_v53, 2  ;;  %v967_v4 = vsel %vm5333_vm4, %v3791_v51, %v3792_v52  ;;  %v1178_v5 = vrot.slane %v5342_v58, 2  ;;  %v4692_v6 = vld [vmem:[%s6049_s3 + $0xc0] sm:$0xff]  ;;  %v971_v7 = vsel %vm5333_vm4, %v3793_v56, %v3794_v57  ;;  %v4730_v40 = vld [vmem:[%s6049_s3 + $0x1f0] sm:$0xff] }
  0xf1   : > { %1337 = vmatpush.bf16.msrb.mxu1 %v4704_v42  ;;  %v1179_v8 = vrot.slane %v5350_v0, 2  ;;  %v1182_v11 = vsel %vm560_vm0, %v1168_v46, %v1176_v61  ;;  %v975_v12 = vsel %vm5333_vm4, %v3795_v62, %v3796_v63  ;;  %v1073_v57 = vld [vmem:[#allocation2 + $0x10] sm:$0x3]  ;;  %v4709_v62 = vld [vmem:[%s6049_s3 + $0x148] sm:$0xff] }
  0xf2   : > { %1061 = vmatpush.bf16.msra.mxu3 %v4684_v35  ;;  %v1188_v14 = vsel %vm560_vm0, %v1169_v53, %v1177_v2  ;;  %v1194_v15 = vsel %vm560_vm0, %v5342_v58, %v1178_v5  ;;  %v1204_v17 = vshrl.u32 %v1182_v11, 16  ;;  %v1207_v18 = vshll.u32 %v1182_v11, 16  ;;  %v4708_v11 = vld [vmem:[%s6049_s3 + $0x140] sm:$0xff] }
  0xf3   : > { %1485 = vmatpush.bf16.msrb.mxu2 %v4714_v45  ;;  %v1200_v19 = vsel %vm560_vm0, %v5350_v0, %v1179_v8  ;;  %v1189_v23 = vsel %vm564_vm1, %v1169_v53, %v1177_v2  ;;  %v1217_v24 = vshrl.u32 %v1188_v14, 16  ;;  %v1230_v27 = vshrl.u32 %v1194_v15, 16  ;;  %v4710_v45 = vld [vmem:[%s6049_s3 + $0x150] sm:$0xff] }
  0xf4   : > { %1157 = vmatpush.bf16.msrb.mxu0 %v4694_v41  ;;  %v1233_v28 = vshll.u32 %v1194_v15, 16  ;;  %v1243_v30 = vshrl.u32 %v1200_v19, 16  ;;  %v1191_v35 = vrot.slane %v1189_v23, 2  ;;  %v1206_v36 = vrot.slane %v1204_v17, 6  ;;  %v1352_v15 = vld [vmem:[#allocation2 + $0xc] sm:$0x6] }
  0xf5   : > { %1338 = vmatpush.bf16.msrb.mxu1 %v4703_v59  ;;  %v1209_v38 = vrot.slane %v1207_v18, 7  ;;  %v1219_v41 = vrot.slane %v1217_v24, 6  ;;  %v1195_v44 = vsel %vm564_vm1, %v5342_v58, %v1178_v5  ;;  %v1201_v47 = vsel %vm564_vm1, %v5350_v0, %v1179_v8  ;;  %v4739_v59 = vld [vmem:[%s6049_s3 + $0x238] sm:$0xff]  ;;  %v4738_v8 = vld [vmem:[%s6049_s3 + $0x230] sm:$0xff] }
  0xf6   : > { %1583 = vmatpush.bf16.msrb.mxu3 %v4723_v60  ;;  %v1232_v49 = vrot.slane %v1230_v27, 6  ;;  %v1235_v51 = vrot.slane %v1233_v28, 7  ;;  %v1245_v52 = vrot.slane %v1243_v30, 6  ;;  %v1197_v58 = vrot.slane %v1195_v44, 2 }
  0xf7   : > { %v774_v20 = vld.sshfl [vmem:[#allocation1] sm:$0xff pattern:$0x73625140]  ;;  %1486 = vmatpush.bf16.msrb.mxu2 %v4713_v1  ;;  %v1210_v56 = vor.u32 %v1209_v38, %v1206_v36  ;;  %v1226_v1 = vshll.u32 %v1191_v35, 16  ;;  %v1360_v30 = vrot.slane %v1352_v15, 2 }
  0xf8   : > { %839 = vst [vmem:[#allocation1] ss:$4 sm:$0xff] %v631_v16  ;;  %832 = vmatmul.bf16.vlgmr.msra.gmra.mxu1 %v774_v20  ;;  %1158 = vmatpush.bf16.msrb.mxu0 %v4693_v54  ;;  %v4721_v16 = vld [vmem:[%s6049_s3 + $0x1a8] sm:$0xff]  ;;  %v4719_v54 = vld [vmem:[%s6049_s3 + $0x198] sm:$0xff]  ;;  %v1236_v0 = vor.u32 %v1235_v51, %v1232_v49  ;;  %v4736_v35 = vld [vmem:[%s6049_s3 + $0x220] sm:$0xff] }
  0xf9   : > { %842 = vst [vmem:[#allocation1 + $0x1] ss:$4 sm:$0xff] %v632_v22  ;;  %1339 = vmatpush.bf16.msrb.mxu1 %v4702_v9  ;;  %v4701_v20 = vld [vmem:[%s6049_s3 + $0x108] sm:$0xff]  ;;  %v1183_v22 = vsel %vm564_vm1, %v1168_v46, %v1176_v61  ;;  %v1072_v46 = vld [vmem:[#allocation2 + $0xc] sm:$0x3]  ;;  %v1203_v61 = vrot.slane %v1201_v47, 2 }
  0xfa   : > { %845 = vst [vmem:[#allocation1 + $0x2] ss:$4 sm:$0xff] %v633_v25  ;;  %1584 = vmatpush.bf16.msrb.mxu3 %v4722_v10  ;;  %v1220_v25 = vshll.u32 %v1188_v14, 16  ;;  %v1185_v34 = vrot.slane %v1183_v22, 2  ;;  %v1211_v5 = vrot.slane %v1210_v56, 2  ;;  %v1237_v14 = vrot.slane %v1236_v0, 2 }
  0xfb   : > { %848 = vst [vmem:[#allocation1 + $0x3] ss:$4 sm:$0xff] %v634_v31  ;;  %1487 = vmatpush.bf16.msrb.mxu2 %v4712_v13  ;;  %v1246_v31 = vshll.u32 %v1200_v19, 16  ;;  %v1252_v10 = vshll.u32 %v1203_v61, 16  ;;  %v1351_v13 = vld [vmem:[#allocation2 + $0x8] sm:$0x6] }
  0xfc   : > { %1159 = vmatpush.bf16.msrb.mxu0 %v4692_v6  ;;  %v1222_v42 = vrot.slane %v1220_v25, 7  ;;  %v1213_v63 = vshll.u32 %v1185_v34, 16  ;;  %v1350_v6 = vld [vmem:[#allocation2 + $0x4] sm:$0x6]  ;;  %v1353_v25 = vld [vmem:[#allocation2 + $0x10] sm:$0x6] }
  0xfd   : > { %1340 = vmatpush.bf16.msrb.mxu1 %v4701_v20  ;;  %v1248_v53 = vrot.slane %v1246_v31, 7  ;;  %v1358_v17 = vrot.slane %v1350_v6, 2  ;;  %v4717_v19 = vld [vmem:[%s6049_s3 + $0x188] sm:$0xff]  ;;  %v4727_v20 = vld [vmem:[%s6049_s3 + $0x1d8] sm:$0xff]  ;;  %v1359_v27 = vrot.slane %v1351_v13, 2  ;;  %v1254_v28 = vrot.slane %v1252_v10, 7 }
  0xfe   : > { %1585 = vmatpush.bf16.msrb.mxu3 %v4721_v16  ;;  %v1223_v60 = vor.u32 %v1222_v42, %v1219_v41  ;;  %v1228_v16 = vrot.slane %v1226_v1, 7  ;;  %v4726_v34 = vld [vmem:[%s6049_s3 + $0x1d0] sm:$0xff]  ;;  %v1602_v41 = vld [vmem:[#allocation2 + $0x14] sm:$0x7]  ;;  %v1378_v42 = vsel %vm560_vm0, %v1352_v15, %v1360_v30  ;;  %v4725_v51 = vld [vmem:[%s6049_s3 + $0x1c8] sm:$0xff] }
  0xff   : > { %1488 = vmatpush.bf16.msrb.mxu2 %v4711_v26  ;;  %v1249_v2 = vor.u32 %v1248_v53, %v1245_v52  ;;  %v1364_v36 = vsel %vm560_vm0, %v1350_v6, %v1358_v17  ;;  %v1366_v38 = vsel %vm564_vm1, %v1350_v6, %v1358_v17  ;;  %v4735_v52 = vld [vmem:[%s6049_s3 + $0x218] sm:$0xff]  ;;  %v1610_v56 = vrot.slane %v1602_v41, 2 }
 0x100   : > { %1765 = vmatpush.bf16.msra.mxu0 %v4731_v21  ;;  %v1224_v9 = vrot.slane %v1223_v60, 2  ;;  %v4737_v21 = vld [vmem:[%s6049_s3 + $0x228] sm:$0xff]  ;;  %v3941_v44 = vrot.slane %v1364_v36, 9 }
 0x101   : > { %1341 = vmatpush.bf16.msrb.mxu1 %v4700_v39  ;;  %v1250_v18 = vrot.slane %v1249_v2, 2  ;;  %v1371_v39 = vsel %vm560_vm0, %v1351_v13, %v1359_v27  ;;  %v4724_v2 = vld [vmem:[%s6049_s3 + $0x1c0] sm:$0xff]  ;;  %v1631_v6 = vsel %vm560_vm0, %v1602_v41, %v1610_v56 }
 0x102   : > { %v849_v3 = vld.sshfl [vmem:[#allocation1] sm:$0xff pattern:$0x73625140]  ;;  %1586 = vmatpush.bf16.msrb.mxu3 %v4720_v32  ;;  %v1229_v26 = vsel %vm5175_vm8, %v1224_v9, %v1228_v16  ;;  %v1361_v32 = vrot.slane %v1353_v25, 2  ;;  %v3943_v53 = vrot.slane %v1371_v39, 9  ;;  %v1677_v17 = vshll.u32 %v1631_v6, 16 }
 0x103   : > { %994 = vst [vmem:[#allocation1] ss:$4 sm:$0xff] %v963_v55  ;;  %907 = vmatmul.bf16.vlgmr.msra.gmra.mxu2 %v849_v3  ;;  %v4729_v55 = vld [vmem:[%s6049_s3 + $0x1e8] sm:$0xff]  ;;  %v4718_v3 = vld [vmem:[%s6049_s3 + $0x190] sm:$0xff]  ;;  %v1255_v31 = vsel %vm5175_vm8, %v1250_v18, %v1254_v28 }
 0x104   : > { %997 = vst [vmem:[#allocation1 + $0x1] ss:$4 sm:$0xff] %v967_v4  ;;  %1766 = vmatpush.bf16.msra.mxu0 %v4730_v40  ;;  %1489 = vmatpush.bf16.msrb.mxu2 %v4710_v45  ;;  %v4728_v4 = vld [vmem:[%s6049_s3 + $0x1e0] sm:$0xff]  ;;  %v1373_v40 = vsel %vm564_vm1, %v1351_v13, %v1359_v27  ;;  %v3942_v45 = vrot.slane %v1366_v38, 9  ;;  %v1385_v47 = vsel %vm560_vm0, %v1353_v25, %v1361_v32  ;;  %v1504_v27 = vld [vmem:[#allocation2 + $0x14] sm:$0x3] }
 0x105   : > { %1000 = vst [vmem:[#allocation1 + $0x2] ss:$4 sm:$0xff] %v971_v7  ;;  %1915 = vmatpush.bf16.msra.mxu1 %v4739_v59  ;;  %v1239_v7 = vshll.u32 %v1197_v58, 16  ;;  %v1387_v49 = vsel %vm564_vm1, %v1353_v25, %v1361_v32  ;;  %v1601_v59 = vld [vmem:[#allocation2 + $0x10] sm:$0x7]  ;;  %v3947_v61 = vrot.slane %v1385_v47, 9 }
 0x106   : > { %1003 = vst [vmem:[#allocation1 + $0x3] ss:$4 sm:$0xff] %v975_v12  ;;  %1587 = vmatpush.bf16.msrb.mxu3 %v4719_v54  ;;  %v1215_v12 = vrot.slane %v1213_v63, 7  ;;  %v3944_v54 = vrot.slane %v1373_v40, 9  ;;  %v1393_v63 = vsel %vm5333_vm4, %v3941_v44, %v3942_v45  ;;  %v1502_v38 = vld [vmem:[#allocation2 + $0xc] sm:$0x3] }
 0x107   : > { %v1241_v24 = vrot.slane %v1239_v7, 7 }
 0x108   : > { %1767 = vmatpush.bf16.msra.mxu0 %v4729_v55  ;;  %1490 = vmatpush.bf16.msrb.mxu2 %v4709_v62  ;;  %v1216_v22 = vsel %vm5175_vm8, %v1211_v5, %v1215_v12  ;;  %v1600_v55 = vld [vmem:[#allocation2 + $0xc] sm:$0x7]  ;;  %v3948_v62 = vrot.slane %v1387_v49, 9  ;;  %v1609_v5 = vrot.slane %v1601_v59, 2  ;;  %v1674_v12 = vshrl.u32 %v1631_v6, 16 }
 0x109   : > { %1916 = vmatpush.bf16.msra.mxu1 %v4738_v8  ;;  %v1608_v1 = vrot.slane %v1600_v55, 2 }
 0x10a   : > { %1588 = vmatpush.bf16.msrb.mxu3 %v4718_v3  ;;  %v4734_v3 = vld [vmem:[%s6049_s3 + $0x210] sm:$0xff]  ;;  %v1405_v9 = vsel %vm5333_vm4, %v3947_v61, %v3948_v62  ;;  %v1625_v13 = vsel %vm560_vm0, %v1601_v59, %v1609_v5  ;;  %v1676_v25 = vrot.slane %v1674_v12, 6 }
 0x10b   : > { %v1619_v10 = vsel %vm560_vm0, %v1600_v55, %v1608_v1  ;;  %v1782_v62 = vld [vmem:[#allocation2 + $0xc] sm:$0x6] }
 0x10c   : > { %1768 = vmatpush.bf16.msra.mxu0 %v4728_v4  ;;  %1491 = vmatpush.bf16.msrb.mxu2 %v4708_v11  ;;  %v1397_v4 = vsel %vm5333_vm4, %v3943_v53, %v3944_v54  ;;  %v4733_v11 = vld [vmem:[%s6049_s3 + $0x208] sm:$0xff]  ;;  %v1648_v18 = vshrl.u32 %v1619_v10, 16 }
 0x10d   : > { %v1004_v43 = vld.sshfl [vmem:[#allocation1] sm:$0xff pattern:$0x73625140]  ;;  %1917 = vmatpush.bf16.msra.mxu1 %v4737_v21  ;;  %v1661_v21 = vshrl.u32 %v1625_v13, 16 }
 0x10e   : > { %1092 = vst [vmem:[#allocation1] ss:$4 sm:$0xff] %v1070_v29  ;;  %1062 = vmatmul.bf16.vlgmr.msra.gmra.mxu3 %v1004_v43  ;;  %v1242_v29 = vsel %vm5175_vm8, %v1237_v14, %v1241_v24  ;;  %v1380_v43 = vsel %vm564_vm1, %v1352_v15, %v1360_v30  ;;  %v1632_v14 = vsel %vm564_vm1, %v1602_v41, %v1610_v56  ;;  %v1679_v30 = vrot.slane %v1677_v17, 7  ;;  %v1503_v41 = vld [vmem:[#allocation2 + $0x10] sm:$0x3] }
 0x10f   : > { %1095 = vst [vmem:[#allocation1 + $0x1] ss:$4 sm:$0xff] %v1071_v33  ;;  %1589 = vmatpush.bf16.msrb.mxu3 %v4717_v19  ;;  %v4716_v33 = vld [vmem:[%s6049_s3 + $0x180] sm:$0xff]  ;;  %v3946_v58 = vrot.slane %v1380_v43, 9  ;;  %v1651_v19 = vshll.u32 %v1619_v10, 16  ;;  %v1634_v24 = vrot.slane %v1632_v14, 2 }
 0x110   : > { %1098 = vst [vmem:[#allocation1 + $0x2] ss:$4 sm:$0xff] %v1072_v46  ;;  %1769 = vmatpush.bf16.msra.mxu0 %v4727_v20  ;;  %v1599_v46 = vld [vmem:[#allocation2 + $0x8] sm:$0x7]  ;;  %v1663_v39 = vrot.slane %v1661_v21, 6  ;;  %v1680_v45 = vor.u32 %v1679_v30, %v1676_v25 }
 0x111   : > { %1101 = vst [vmem:[#allocation1 + $0x3] ss:$4 sm:$0xff] %v1073_v57  ;;  %1918 = vmatpush.bf16.msra.mxu1 %v4736_v35  ;;  %v3945_v57 = vrot.slane %v1378_v42, 9  ;;  %v1607_v60 = vrot.slane %v1599_v46, 2  ;;  %v1650_v35 = vrot.slane %v1648_v18, 6  ;;  %v1653_v36 = vrot.slane %v1651_v19, 7 }
 0x113   : > { %1590 = vmatpush.bf16.msrb.mxu3 %v4716_v33  ;;  %v1401_v7 = vsel %vm5333_vm4, %v3945_v57, %v3946_v58  ;;  %v1613_v8 = vsel %vm560_vm0, %v1599_v46, %v1607_v60  ;;  %v1614_v20 = vsel %vm564_vm1, %v1599_v46, %v1607_v60  ;;  %v1683_v46 = vshll.u32 %v1634_v24, 16  ;;  %v1781_v57 = vld [vmem:[#allocation2 + $0x8] sm:$0x6]  ;;  %v1784_v60 = vld [vmem:[#allocation2 + $0x14] sm:$0x6] }
 0x114   : > { %1770 = vmatpush.bf16.msra.mxu0 %v4726_v34  ;;  %v1635_v15 = vshrl.u32 %v1613_v8, 16  ;;  %v1638_v16 = vshll.u32 %v1613_v8, 16  ;;  %v1616_v32 = vrot.slane %v1614_v20, 2  ;;  %v1626_v34 = vsel %vm564_vm1, %v1601_v59, %v1609_v5 }
 0x115   : > { %1919 = vmatpush.bf16.msra.mxu1 %v4735_v52  ;;  %v1628_v44 = vrot.slane %v1626_v34, 2  ;;  %v1654_v47 = vor.u32 %v1653_v36, %v1650_v35  ;;  %v1685_v56 = vrot.slane %v1683_v46, 7  ;;  %v1792_v6 = vrot.slane %v1784_v60, 2  ;;  %v4746_v34 = vld [vmem:[%s6054_s5 + $0x30] sm:$0xff]  ;;  %v4745_v36 = vld [vmem:[%s6054_s5 + $0x28] sm:$0xff] }
 0x116   : > { %v1637_v28 = vrot.slane %v1635_v15, 6  ;;  %v1644_v49 = vshll.u32 %v1616_v32, 16  ;;  %v1790_v8 = vrot.slane %v1782_v62, 2 }
 0x117   : > { %v1670_v54 = vshll.u32 %v1628_v44, 16  ;;  %v1655_v58 = vrot.slane %v1654_v47, 2  ;;  %v1818_v14 = vsel %vm564_vm1, %v1784_v60, %v1792_v6  ;;  %v4742_v44 = vld [vmem:[%s6054_s5 + $0x10] sm:$0xff] }
 0x118   : > { %v1102_v23 = vld.sshfl [vmem:[#allocation1] sm:$0xff pattern:$0x73625140]  ;;  %1771 = vmatpush.bf16.msra.mxu0 %v4725_v51  ;;  %v1646_v59 = vrot.slane %v1644_v49, 7  ;;  %v1802_v15 = vsel %vm560_vm0, %v1782_v62, %v1790_v8  ;;  %v4741_v49 = vld [vmem:[%s6054_s5 + $0x8] sm:$0xff] }
 0x119   : > { %1274 = vst [vmem:[#allocation1] ss:$4 sm:$0xff] %v1216_v22  ;;  %1160 = vmatmul.bf16.vlgmr.msrb.gmra.mxu0 %v1102_v23  ;;  %1920 = vmatpush.bf16.msra.mxu1 %v4734_v3  ;;  %v1664_v22 = vshll.u32 %v1625_v13, 16  ;;  %v4732_v23 = vld [vmem:[%s6049_s3 + $0x200] sm:$0xff]  ;;  %v1816_v13 = vsel %vm560_vm0, %v1784_v60, %v1792_v6 }
 0x11a   : > { %1277 = vst [vmem:[#allocation1 + $0x1] ss:$4 sm:$0xff] %v1229_v26  ;;  %v1501_v26 = vld [vmem:[#allocation2 + $0x8] sm:$0x3]  ;;  %v4099_v21 = vrot.slane %v1816_v13, 9 }
 0x11b   : > { %1280 = vst [vmem:[#allocation1 + $0x2] ss:$4 sm:$0xff] %v1242_v29  ;;  %v1640_v29 = vrot.slane %v1638_v16, 7  ;;  %v1666_v40 = vrot.slane %v1664_v22, 7  ;;  %v1804_v16 = vsel %vm564_vm1, %v1782_v62, %v1790_v8  ;;  %v4100_v22 = vrot.slane %v1818_v14, 9 }
 0x11c   : > { %1283 = vst [vmem:[#allocation1 + $0x3] ss:$4 sm:$0xff] %v1255_v31  ;;  %1772 = vmatpush.bf16.msra.mxu0 %v4724_v2  ;;  %v1620_v31 = vsel %vm564_vm1, %v1600_v55, %v1608_v1  ;;  %v1681_v55 = vrot.slane %v1680_v45, 2  ;;  %v1789_v2 = vrot.slane %v1781_v57, 2  ;;  %v4096_v24 = vrot.slane %v1804_v16, 9 }
 0x11d   : > { %1921 = vmatpush.bf16.msra.mxu1 %v4733_v11  ;;  %v1622_v42 = vrot.slane %v1620_v31, 2  ;;  %v1641_v43 = vor.u32 %v1640_v29, %v1637_v28  ;;  %v1667_v51 = vor.u32 %v1666_v40, %v1663_v39  ;;  %v1836_v29 = vsel %vm5333_vm4, %v4099_v21, %v4100_v22  ;;  %v4744_v39 = vld [vmem:[%s6054_s5 + $0x20] sm:$0xff] }
 0x11e   : > { %v1686_v5 = vsel %vm5175_vm8, %v1681_v55, %v1685_v56  ;;  %v1795_v11 = vsel %vm560_vm0, %v1781_v57, %v1789_v2  ;;  %v1797_v12 = vsel %vm564_vm1, %v1781_v57, %v1789_v2 }
 0x11f   : > { %v1657_v52 = vshll.u32 %v1622_v42, 16  ;;  %v1642_v53 = vrot.slane %v1641_v43, 2  ;;  %v1668_v61 = vrot.slane %v1667_v51, 2  ;;  %v4093_v19 = vrot.slane %v1795_v11, 9  ;;  %v4743_v42 = vld [vmem:[%s6054_s5 + $0x18] sm:$0xff] }
 0x120   : > { %v4094_v20 = vrot.slane %v1797_v12, 9 }
 0x121   : > { %1922 = vmatpush.bf16.msra.mxu1 %v4732_v23  ;;  %v1647_v1 = vsel %vm5175_vm8, %v1642_v53, %v1646_v59  ;;  %v4095_v23 = vrot.slane %v1802_v15, 9 }
 0x123   : > { %v1284_v0 = vld.sshfl [vmem:[#allocation1] sm:$0xff pattern:$0x73625140]  ;;  %v1828_v30 = vsel %vm5333_vm4, %v4095_v23, %v4096_v24 }
 0x124   : > { %1424 = vst [vmem:[#allocation1] ss:$4 sm:$0xff] %v1393_v63  ;;  %1342 = vmatmul.bf16.vlgmr.msrb.gmra.mxu1 %v1284_v0  ;;  %v1659_v63 = vrot.slane %v1657_v52, 7  ;;  %v1783_v0 = vld [vmem:[#allocation2 + $0x10] sm:$0x6] }
 0x125   : > { %1427 = vst [vmem:[#allocation1 + $0x1] ss:$4 sm:$0xff] %v1397_v4  ;;  %v1672_v4 = vrot.slane %v1670_v54, 7  ;;  %v1791_v10 = vrot.slane %v1783_v0, 2  ;;  %v4740_v54 = vld [vmem:[%s6054_s5] sm:$0xff] }
 0x126   : > { %1430 = vst [vmem:[#allocation1 + $0x2] ss:$4 sm:$0xff] %v1401_v7  ;;  %v1660_v7 = vsel %vm5175_vm8, %v1655_v58, %v1659_v63 }
 0x127   : > { %1433 = vst [vmem:[#allocation1 + $0x3] ss:$4 sm:$0xff] %v1405_v9  ;;  %v1673_v9 = vsel %vm5175_vm8, %v1668_v61, %v1672_v4  ;;  %v1809_v17 = vsel %vm560_vm0, %v1783_v0, %v1791_v10  ;;  %v1811_v18 = vsel %vm564_vm1, %v1783_v0, %v1791_v10 }
 0x128   : > { %v4097_v25 = vrot.slane %v1809_v17, 9 }
 0x12e   : > { %v1434_v33 = vld.sshfl [vmem:[#allocation1] sm:$0xff pattern:$0x73625140] }
 0x12f   : > { %1523 = vst [vmem:[#allocation1] ss:$4 sm:$0xff] %v1501_v26  ;;  %1492 = vmatmul.bf16.vlgmr.msrb.gmra.mxu2 %v1434_v33  ;;  %v4098_v26 = vrot.slane %v1811_v18, 9  ;;  %v4747_v33 = vld [vmem:[%s6054_s5 + $0x38] sm:$0xff] }
 0x130   : > { %1526 = vst [vmem:[#allocation1 + $0x1] ss:$4 sm:$0xff] %v1502_v38  ;;  %2019 = vmatpush.bf16.msra.mxu2 %v4747_v33 }
 0x131   : > { %1529 = vst [vmem:[#allocation1 + $0x2] ss:$4 sm:$0xff] %v1503_v41  ;;  %v1832_v31 = vsel %vm5333_vm4, %v4097_v25, %v4098_v26 }
 0x132   : > { %1532 = vst [vmem:[#allocation1 + $0x3] ss:$4 sm:$0xff] %v1504_v27  ;;  %v1824_v27 = vsel %vm5333_vm4, %v4093_v19, %v4094_v20 }
 0x134   : > { %2020 = vmatpush.bf16.msra.mxu2 %v4746_v34 }
 0x138   : > { %2021 = vmatpush.bf16.msra.mxu2 %v4745_v36 }
 0x139   : > { %v1533_v3 = vld.sshfl [vmem:[#allocation1] sm:$0xff pattern:$0x73625140] }
 0x13a   : > { %1705 = vst [vmem:[#allocation1] ss:$4 sm:$0xff] %v1647_v1  ;;  %1591 = vmatmul.bf16.vlgmr.msrb.gmra.mxu3 %v1533_v3 }
 0x13b   : > { %1708 = vst [vmem:[#allocation1 + $0x1] ss:$4 sm:$0xff] %v1660_v7  ;;  %v456_v7 = vld [vmem:[%s5165_s14] sm:$0xff]   ;;  %s3522_s14 = sshll.u32 %s5932_s17, 4  ;;  %s3523_s14 = int_to_ptr.vmem [resolvable:$true] %s3522_s14 }
 0x13c   : > { %1711 = vst [vmem:[#allocation1 + $0x2] ss:$4 sm:$0xff] %v1673_v9  ;;  %2022 = vmatpush.bf16.msra.mxu2 %v4744_v39  ;;  %v1937_v13 = vunpack.c.l.bf16 %v456_v7  ;;  %v1938_v19 = vunpack.c.h.bf16 %v456_v7 }
 0x13d   : > { %1714 = vst [vmem:[#allocation1 + $0x3] ss:$4 sm:$0xff] %v1686_v5  ;;  %v4883_v5 = vld [vmem:[%s6055_s4] ss:$0 sm:$0xff]  ;;  %s4908_s4 = scalar_lea.hbm %s6025_s12, 2 }
 0x13e   : > { %p4910_p1 = scmp.lt.s32.totalorder %s4908_s4, %s4904_s1 }
 0x140   : > { %2023 = vmatpush.bf16.msra.mxu2 %v4743_v42  ;;  %p4911_p2 = por %p4910_p1, %p4909_p0 }
 0x142   : > { %p4912_p3 = pnand %p4911_p2, %p4907_p13 }
 0x144   : > { %v1715_v28 = vld.sshfl [vmem:[#allocation1] sm:$0xff pattern:$0x73625140]  ;;  %2024 = vmatpush.bf16.msra.mxu2 %v4742_v44 }
 0x145   : > { %1855 = vst [vmem:[#allocation1] ss:$4 sm:$0xff] %v1824_v27  ;;  %1773 = vmatmul.bf16.vlgmr.msra.gmra.mxu0 %v1715_v28 }
 0x146   : > { %1858 = vst [vmem:[#allocation1 + $0x1] ss:$4 sm:$0xff] %v1828_v30 }
 0x147   : > { %1861 = vst [vmem:[#allocation1 + $0x2] ss:$4 sm:$0xff] %v1832_v31  ;;  %v4884_v31 = vld [vmem:[%s6019_s6] ss:$0 sm:$0xff] }
 0x148   : > { %1864 = vst [vmem:[#allocation1 + $0x3] ss:$4 sm:$0xff] %v1836_v29  ;;  %2025 = vmatpush.bf16.msra.mxu2 %v4741_v49  ;;  %v2126_v29 = vld [vmem:[#allocation2] sm:$0x7] }
 0x149   : > { %v2134_v30 = vrot.slane %v2126_v29, 2 }
 0x14b   : > { %v2141_v34 = vsel %vm564_vm1, %v2126_v29, %v2134_v30 }
 0x14c   : > { %2026 = vmatpush.bf16.msra.mxu2 %v4740_v54 }
 0x14f   : > { %v1865_v32 = vld.sshfl [vmem:[#allocation1] sm:$0xff pattern:$0x73625140] }
 0x150   : > { %1923 = vmatmul.bf16.vlgmr.msra.gmra.mxu1 %v1865_v32  ;;  %v2140_v32 = vsel %vm560_vm0, %v2126_v29, %v2134_v30 }
 0x151   : > { %v2165_v36 = vshll.u32 %v2140_v32, 16 }
 0x153   : > { %v2167_v42 = vrot.slane %v2165_v36, 7  ;;  %v4762_v36 = vld [vmem:[%s6020_s7 + $0x70] sm:$0xff] }
 0x175   : > { %v833_v35 = vpop.f32.mrf.mxu1 }
 0x17d   : > { %v835_v41 = vpop.f32.mrf.mxu1 }
 0x186   : > { %v908_v38 = vpop.f32.mrf.mxu2 }
 0x187   : > { %v909_v51 = vadd.f32 %v908_v38, %v833_v35  ;;  %v2162_v35 = vshrl.u32 %v2140_v32, 16 }
 0x18e   : > { %v910_v45 = vpop.f32.mrf.mxu2 }
 0x18f   : > { %v911_v58 = vadd.f32 %v910_v45, %v835_v41  ;;  %v2164_v41 = vrot.slane %v2162_v35, 6 }
 0x191   : > { %v1063_v40 = vpop.f32.mrf.mxu3 }
 0x192   : > { %v1068_v52 = vadd.f32 %v1063_v40, %v909_v51  ;;  %v2143_v40 = vrot.slane %v2141_v34, 2 }
 0x194   : > { %v2171_v45 = vshll.u32 %v2143_v40, 16 }
 0x196   : > { %v1161_v43 = vpop.f32.mrf.mxu0 }
 0x197   : > { %v1166_v56 = vadd.f32 %v1161_v43, %v1068_v52 }
 0x199   : > { %v1065_v46 = vpop.f32.mrf.mxu3 }
 0x19a   : > { %v1069_v61 = vadd.f32 %v1065_v46, %v911_v58 }
 0x19e   : > { %v1163_v53 = vpop.f32.mrf.mxu0 }
 0x19f   : > { %v1167_v1 = vadd.f32 %v1163_v53, %v1069_v61 }
 0x1a1   : > { %v1343_v47 = vpop.f32.mrf.mxu1 }
 0x1a2   : > { %v1348_v59 = vadd.f32 %v1343_v47, %v1166_v56  ;;  %v2168_v47 = vor.u32 %v2167_v42, %v2164_v41  ;;  %v2173_v56 = vrot.slane %v2171_v45, 7 }
 0x1a9   : > { %v1345_v60 = vpop.f32.mrf.mxu1 }
 0x1aa   : > { %v1349_v3 = vadd.f32 %v1345_v60, %v1167_v1 }
 0x1b2   : > { %v1493_v55 = vpop.f32.mrf.mxu2 }
 0x1b3   : > { %v1498_v62 = vadd.f32 %v1493_v55, %v1348_v59  ;;  %v2169_v55 = vrot.slane %v2168_v47, 2 }
 0x1b5   : > { %v2174_v59 = vsel %vm5175_vm8, %v2169_v55, %v2173_v56 }
 0x1ba   : > { %v1495_v2 = vpop.f32.mrf.mxu2 }
 0x1bb   : > { %v1499_v9 = vadd.f32 %v1495_v2, %v1349_v3 }
 0x1bd   : > { %v1592_v57 = vpop.f32.mrf.mxu3 }
 0x1be   : > { %v1597_v0 = vadd.f32 %v1592_v57, %v1498_v62 }
 0x1c2   : > { %v1774_v63 = vpop.f32.mrf.mxu0 }
 0x1c3   : > { %v1779_v4 = vadd.f32 %v1774_v63, %v1597_v0 }
 0x1c5   : > { %v1594_v6 = vpop.f32.mrf.mxu3 }
 0x1c6   : > { %v1598_v11 = vadd.f32 %v1594_v6, %v1499_v9  ;;  %v2097_v9 = vld [vmem:[#allocation2 + $0x8] sm:$0x7] }
 0x1ca   : > { %v1776_v14 = vpop.f32.mrf.mxu0 }
 0x1cb   : > { %v1780_v15 = vadd.f32 %v1776_v14, %v1598_v11 }
 0x1cd   : > { %v1924_v8 = vpop.f32.mrf.mxu1 }
 0x1ce   : > { %v1929_v10 = vadd.f32 %v1924_v8, %v1779_v4  ;;  %v2094_v8 = vld [vmem:[#allocation2 + $0x4] sm:$0x7] }
 0x1d0   : > { %v1935_v12 = vadd.f32 %v4883_v5, %v1929_v10 }
 0x1d2   : > { %v1939_v16 = vadd.f32 %v1937_v13, %v1935_v12 }
 0x1d4   : > { %v1941_v20 = vmax.f32 %v1939_v16, 0.0 }
 0x1d5   : > { %v1926_v17 = vpop.f32.mrf.mxu1 }
 0x1d6   : > { %v1930_v18 = vadd.f32 %v1926_v17, %v1780_v15  ;;  %v5555_v23 = vpack.c.bf16 %v1941_v20, %v1941_v20  ;;  %v4763_v15 = vld [vmem:[%s6020_s7 + $0x78] sm:$0xff] }
 0x1d7   : > { %2292 = vmatpush.bf16.msra.mxu3 %v4763_v15 }
 0x1d8   : > { %v1936_v21 = vadd.f32 %v4883_v5, %v1930_v18  ;;  %v1967_v26 = vunpack.c.l.b16 %v5555_v23 }
 0x1da   : > { %v1940_v22 = vadd.f32 %v1938_v19, %v1936_v21 }
 0x1db   : > { %2293 = vmatpush.bf16.msra.mxu3 %v4762_v36 }
 0x1dc   : > { %v1942_v24 = vmax.f32 %v1940_v22, 0.0 }
 0x1de   : > { %v5557_v25 = vpack.c.bf16 %v1942_v24, %v1942_v24  ;;  %v2100_v24 = vld [vmem:[#allocation2 + $0xc] sm:$0x7] }
 0x1e0   : > { %v1968_v27 = vunpack.c.l.b16 %v5557_v25 }
 0x1e2   : > { %v1969_v28 = vpack.c.b16 %v1968_v27, %v1967_v26 }
 0x1e4   : > { %2027 = vmatmul.bf16.vlgmr.msra.gmra.mxu2 %v1969_v28 }
 0x267   : > { %v2028_v33 = vpop.f32.mrf.mxu2 }
 0x268   : > { %v2029_v38 = vadd.f32 %v4884_v31, %v2028_v33 }
 0x26a   : > { %v2033_v39 = vmax.f32 %v2029_v38, 0.0 }
 0x26c   : > { %v2035_v43 = vpack.c.bf16 %v2033_v39, %v2033_v39 }
 0x26e   : > { %v2039_v44 = vrot.slane %v2035_v43, 2 }
 0x26f   : > { %v2030_v46 = vpop.f32.mrf.mxu2 }
 0x270   : > { %v2043_v49 = vsel %vm560_vm0, %v2035_v43, %v2039_v44  ;;  %v2044_v51 = vsel %vm564_vm1, %v2035_v43, %v2039_v44  ;;  %v2031_v52 = vadd.f32 %v4884_v31, %v2030_v46  ;;  %v2103_v31 = vld [vmem:[#allocation2 + $0x10] sm:$0x7] }
 0x271   : > { %v2046_v53 = vrot.slane %v2044_v51, 2  ;;  %2053 = vst [vmem:[#allocation1] ss:$2 sm:$0xff] %v2043_v49 }
 0x272   : > { %v2034_v54 = vmax.f32 %v2031_v52, 0.0 }
 0x273   : > { %2057 = vst [vmem:[#allocation1 + $0x10] ss:$2 sm:$0xff] %v2046_v53 }
 0x274   : > { %v2036_v57 = vpack.c.bf16 %v2034_v54, %v2034_v54 }
 0x276   : > { %v2040_v58 = vrot.slane %v2036_v57, 2 }
 0x278   : > { %v2054_v60 = vld.sshfl [vmem:[#allocation1] sm:$0xff pattern:$0x75643120]  ;;  %v2049_v61 = vsel %vm560_vm0, %v2036_v57, %v2040_v58  ;;  %v2050_v62 = vsel %vm564_vm1, %v2036_v57, %v2040_v58 }
 0x279   : > { %v2066_v63 = vshrl.u32 %v2054_v60, 16  ;;  %v2052_v0 = vrot.slane %v2050_v62, 2  ;;  %2060 = vst [vmem:[#allocation1 + $0x20] ss:$2 sm:$0xff] %v2049_v61  ;;  %v2069_v3 = vshll.u32 %v2054_v60, 16 }
 0x27a   : > { %v2058_v1 = vld.sshfl [vmem:[#allocation1 + $0x10] sm:$0xff pattern:$0x75643120] }
 0x27b   : > { %v2072_v2 = vshrl.u32 %v2058_v1, 16  ;;  %2232 = vst [vmem:[#allocation1] ss:$4 sm:$0xff] %v2174_v59  ;;  %v2068_v4 = vrot.slane %v2066_v63, 7  ;;  %v2075_v6 = vshll.u32 %v2058_v1, 16 }
 0x27c   : > { %2064 = vst [vmem:[#allocation1 + $0x30] ss:$2 sm:$0xff] %v2052_v0 }
 0x27d   : > { %v2074_v5 = vrot.slane %v2072_v2, 7  ;;  %v2071_v7 = vor.u32 %v2069_v3, %v2068_v4  ;;  %v4761_v2 = vld [vmem:[%s6020_s7 + $0x68] sm:$0xff] }
 0x27e   : > { %2294 = vmatpush.bf16.msra.mxu3 %v4761_v2 }
 0x27f   : > { %v2077_v10 = vor.u32 %v2075_v6, %v2074_v5  ;;  %v2095_v11 = vsel %vm5183_vm11, %v2071_v7, %v2094_v8  ;;  %v4755_v5 = vld [vmem:[%s6020_s7 + $0x38] sm:$0xff] }
 0x280   : > { %v2061_v12 = vld.sshfl [vmem:[#allocation1 + $0x20] sm:$0xff pattern:$0x75643120]  ;;  %2096 = vst [vmem:[#allocation2 + $0x4] sm:$0x7] %v2095_v11  ;;  %2367 = vmatpush.bf16.msrb.mxu0 %v4755_v5  ;;  %v4754_v11 = vld [vmem:[%s6020_s7 + $0x30] sm:$0xff] }
 0x281   : > { %v2098_v13 = vsel %vm5183_vm11, %v2077_v10, %v2097_v9  ;;  %v2078_v14 = vshrl.u32 %v2061_v12, 16  ;;  %v2081_v18 = vshll.u32 %v2061_v12, 16  ;;  %v4760_v10 = vld [vmem:[%s6020_s7 + $0x60] sm:$0xff] }
 0x282   : > { %2099 = vst [vmem:[#allocation2 + $0x8] sm:$0x7] %v2098_v13  ;;  %2295 = vmatpush.bf16.msra.mxu3 %v4760_v10 }
 0x283   : > { %v2065_v16 = vld.sshfl [vmem:[#allocation1 + $0x30] sm:$0xff pattern:$0x75643120]  ;;  %v2080_v17 = vrot.slane %v2078_v14, 7  ;;  %v4759_v14 = vld [vmem:[%s6020_s7 + $0x58] sm:$0xff] }
 0x284   : > { %v2084_v19 = vshrl.u32 %v2065_v16, 16  ;;  %v2087_v22 = vshll.u32 %v2065_v16, 16  ;;  %2368 = vmatpush.bf16.msrb.mxu0 %v4754_v11  ;;  %v4753_v16 = vld [vmem:[%s6020_s7 + $0x28] sm:$0xff] }
 0x285   : > { %v2083_v20 = vor.u32 %v2081_v18, %v2080_v17  ;;  %v4771_v17 = vld [vmem:[%s6020_s7 + $0xb8] sm:$0xff]  ;;  %v4770_v18 = vld [vmem:[%s6020_s7 + $0xb0] sm:$0xff]  ;;  %v4785_v11 = vld [vmem:[%s6020_s7 + $0x128] sm:$0xff] }
 0x286   : > { %v2086_v21 = vrot.slane %v2084_v19, 7  ;;  %2515 = vmatpush.bf16.msrb.mxu1 %v4771_v17  ;;  %v4779_v19 = vld [vmem:[%s6020_s7 + $0xf8] sm:$0xff]  ;;  %2296 = vmatpush.bf16.msra.mxu3 %v4759_v14  ;;  %v4774_v14 = vld [vmem:[%s6020_s7 + $0xd0] sm:$0xff] }
 0x287   : > { %v2101_v26 = vsel %vm5183_vm11, %v2083_v20, %v2100_v24  ;;  %v2127_v27 = vld [vmem:[#allocation2 + $0x4] sm:$0x7]  ;;  %v2381_v20 = vld [vmem:[#allocation2] sm:$0x6]  ;;  %2613 = vmatpush.bf16.msrb.mxu2 %v4779_v19  ;;  %v4778_v24 = vld [vmem:[%s6020_s7 + $0xf0] sm:$0xff] }
 0x288   : > { %v2089_v28 = vor.u32 %v2087_v22, %v2086_v21  ;;  %2102 = vst [vmem:[#allocation2 + $0xc] sm:$0x7] %v2101_v26  ;;  %v2135_v29 = vrot.slane %v2127_v27, 2  ;;  %2369 = vmatpush.bf16.msrb.mxu0 %v4753_v16  ;;  %v4758_v21 = vld [vmem:[%s6020_s7 + $0x50] sm:$0xff]  ;;  %v4752_v22 = vld [vmem:[%s6020_s7 + $0x20] sm:$0xff]  ;;  %v4765_v19 = vld [vmem:[%s6020_s7 + $0x88] sm:$0xff] }
 0x289   : > { %v2128_v30 = vld [vmem:[#allocation2 + $0x8] sm:$0x7]  ;;  %v2106_v26 = vld [vmem:[#allocation2] sm:$0x3] }
 0x28a   : > { %v2136_v32 = vrot.slane %v2128_v30, 2  ;;  %v2104_v33 = vsel %vm5183_vm11, %v2089_v28, %v2103_v31  ;;  %v2146_v34 = vsel %vm560_vm0, %v2127_v27, %v2135_v29  ;;  %v2147_v35 = vsel %vm564_vm1, %v2127_v27, %v2135_v29  ;;  %2516 = vmatpush.bf16.msrb.mxu1 %v4770_v18  ;;  %v4769_v29 = vld [vmem:[%s6020_s7 + $0xa8] sm:$0xff]  ;;  %2297 = vmatpush.bf16.msra.mxu3 %v4758_v21 }
 0x28b   : > { %2105 = vst [vmem:[#allocation2 + $0x10] sm:$0x7] %v2104_v33  ;;  %v2149_v40 = vrot.slane %v2147_v35, 2  ;;  %v2175_v41 = vshrl.u32 %v2146_v34, 16  ;;  %v2178_v44 = vshll.u32 %v2146_v34, 16  ;;  %v2389_v27 = vrot.slane %v2381_v20, 2  ;;  %2614 = vmatpush.bf16.msrb.mxu2 %v4778_v24 }
 0x28c   : > { %v2152_v38 = vsel %vm560_vm0, %v2128_v30, %v2136_v32  ;;  %v2153_v39 = vsel %vm564_vm1, %v2128_v30, %v2136_v32  ;;  %v2383_v30 = vld [vmem:[#allocation2 + $0x8] sm:$0x6]  ;;  %2370 = vmatpush.bf16.msrb.mxu0 %v4752_v22  ;;  %v4757_v31 = vld [vmem:[%s6020_s7 + $0x48] sm:$0xff]  ;;  %v4751_v32 = vld [vmem:[%s6020_s7 + $0x18] sm:$0xff] }
 0x28d   : > { %v2155_v42 = vrot.slane %v2153_v39, 2  ;;  %v2188_v43 = vshrl.u32 %v2152_v38, 16  ;;  %v2191_v48 = vshll.u32 %v2152_v38, 16  ;;  %v2177_v45 = vrot.slane %v2175_v41, 6  ;;  %v4777_v35 = vld [vmem:[%s6020_s7 + $0xe8] sm:$0xff]  ;;  %v4784_v24 = vld [vmem:[%s6020_s7 + $0x120] sm:$0xff] }
 0x28e   : > { %v2184_v46 = vshll.u32 %v2149_v40, 16  ;;  %v2180_v52 = vrot.slane %v2178_v44, 7  ;;  %v2107_v38 = vld [vmem:[#allocation2 + $0x4] sm:$0x3]  ;;  %v2395_v39 = vsel %vm560_vm0, %v2381_v20, %v2389_v27  ;;  %v2397_v40 = vsel %vm564_vm1, %v2381_v20, %v2389_v27  ;;  %v2108_v41 = vld [vmem:[#allocation2 + $0x8] sm:$0x3]  ;;  %2517 = vmatpush.bf16.msrb.mxu1 %v4769_v29  ;;  %2298 = vmatpush.bf16.msra.mxu3 %v4757_v31 }
 0x28f   : > { %v2190_v47 = vrot.slane %v2188_v43, 6  ;;  %v2193_v49 = vrot.slane %v2191_v48, 7  ;;  %v2197_v51 = vshll.u32 %v2155_v42, 16  ;;  %v2129_v53 = vld [vmem:[#allocation2 + $0xc] sm:$0x7]  ;;  %v4768_v42 = vld [vmem:[%s6020_s7 + $0xa0] sm:$0xff]  ;;  %2615 = vmatpush.bf16.msrb.mxu2 %v4777_v35 }
 0x290   : > { %v2137_v55 = vrot.slane %v2129_v53, 2  ;;  %v2181_v56 = vor.u32 %v2180_v52, %v2177_v45  ;;  %v2186_v58 = vrot.slane %v2184_v46, 7  ;;  %v2384_v28 = vld [vmem:[#allocation2 + $0xc] sm:$0x6]  ;;  %v2391_v43 = vrot.slane %v2383_v30, 2  ;;  %2371 = vmatpush.bf16.msrb.mxu0 %v4751_v32  ;;  %v4756_v48 = vld [vmem:[%s6020_s7 + $0x40] sm:$0xff] }
 0x291   : > { %v2194_v54 = vor.u32 %v2193_v49, %v2190_v47  ;;  %v2199_v57 = vrot.slane %v2197_v51, 7  ;;  %v2109_v33 = vld [vmem:[#allocation2 + $0xc] sm:$0x3]  ;;  %v2392_v36 = vrot.slane %v2384_v28, 2  ;;  %v2382_v45 = vld [vmem:[#allocation2 + $0x4] sm:$0x6] }
 0x292   : > { %v2158_v60 = vsel %vm560_vm0, %v2129_v53, %v2137_v55  ;;  %v2159_v61 = vsel %vm564_vm1, %v2129_v53, %v2137_v55  ;;  %v2182_v62 = vrot.slane %v2181_v56, 2  ;;  %v4750_v44 = vld [vmem:[%s6020_s7 + $0x10] sm:$0xff]  ;;  %v4787_v46 = vld [vmem:[%s6020_s7 + $0x138] sm:$0xff]  ;;  %v4261_v47 = vrot.slane %v2395_v39, 9  ;;  %v4776_v53 = vld [vmem:[%s6020_s7 + $0xe0] sm:$0xff]  ;;  %2518 = vmatpush.bf16.msrb.mxu1 %v4768_v42  ;;  %2299 = vmatpush.bf16.msra.mxu3 %v4756_v48 }
 0x293   : > { %v2195_v59 = vrot.slane %v2194_v54, 2  ;;  %v2161_v63 = vrot.slane %v2159_v61, 2  ;;  %v2201_v0 = vshrl.u32 %v2158_v60, 16  ;;  %v2204_v1 = vshll.u32 %v2158_v60, 16  ;;  %v4767_v54 = vld [vmem:[%s6020_s7 + $0x98] sm:$0xff]  ;;  %v4786_v61 = vld [vmem:[%s6020_s7 + $0x130] sm:$0xff]  ;;  %2616 = vmatpush.bf16.msrb.mxu2 %v4776_v53 }
 0x294   : > { %v2187_v4 = vsel %vm5175_vm8, %v2182_v62, %v2186_v58  ;;  %v4262_v49 = vrot.slane %v2397_v40, 9  ;;  %v2416_v51 = vsel %vm560_vm0, %v2384_v28, %v2392_v36  ;;  %v2418_v52 = vsel %vm564_vm1, %v2384_v28, %v2392_v36  ;;  %2372 = vmatpush.bf16.msrb.mxu0 %v4750_v44  ;;  %v4749_v58 = vld [vmem:[%s6020_s7 + $0x8] sm:$0xff]  ;;  %v2631_v10 = vld [vmem:[#allocation2 + $0xc] sm:$0x7]  ;;  %v4803_v32 = vld [vmem:[%s6020_s7 + $0x1b8] sm:$0xff] }
 0x295   : > { %v2200_v3 = vsel %vm5175_vm8, %v2195_v59, %v2199_v57  ;;  %v2203_v6 = vrot.slane %v2201_v0, 6  ;;  %v2206_v7 = vrot.slane %v2204_v1, 7  ;;  %v2210_v8 = vshll.u32 %v2161_v63, 16  ;;  %2235 = vst [vmem:[#allocation1 + $0x1] ss:$4 sm:$0xff] %v2187_v4  ;;  %v4775_v63 = vld [vmem:[%s6020_s7 + $0xd8] sm:$0xff] }
 0x296   : > { %2238 = vst [vmem:[#allocation1 + $0x2] ss:$4 sm:$0xff] %v2200_v3  ;;  %v2390_v55 = vrot.slane %v2382_v45, 2  ;;  %v2409_v56 = vsel %vm560_vm0, %v2383_v30, %v2391_v43  ;;  %v2411_v57 = vsel %vm564_vm1, %v2383_v30, %v2391_v43  ;;  %v4267_v59 = vrot.slane %v2416_v51, 9  ;;  %2795 = vmatpush.bf16.msrb.mxu3 %v4787_v46  ;;  %v5681_v0 = vld [vmem:[#allocation2 + $0x8] sm:$0x7]  ;;  %2519 = vmatpush.bf16.msrb.mxu1 %v4767_v54 }
 0x297   : > { %v2207_v9 = vor.u32 %v2206_v7, %v2203_v6  ;;  %v2212_v13 = vrot.slane %v2210_v8, 7  ;;  %v4268_v60 = vrot.slane %v2418_v52, 9  ;;  %v2424_v62 = vsel %vm5333_vm4, %v4261_v47, %v4262_v49  ;;  %v4766_v3 = vld [vmem:[%s6020_s7 + $0x90] sm:$0xff]  ;;  %v5686_v4 = vld [vmem:[#allocation2 + $0x4] sm:$0x7]  ;;  %v4748_v7 = vld [vmem:[%s6020_s7] sm:$0xff]  ;;  %2617 = vmatpush.bf16.msrb.mxu2 %v4775_v63 }
 0x298   : > { %v4265_v1 = vrot.slane %v2409_v56, 9  ;;  %v4266_v2 = vrot.slane %v2411_v57, 9  ;;  %v2402_v5 = vsel %vm560_vm0, %v2382_v45, %v2390_v55  ;;  %v2404_v6 = vsel %vm564_vm1, %v2382_v45, %v2390_v55  ;;  %2373 = vmatpush.bf16.msrb.mxu0 %v4749_v58  ;;  %v4773_v27 = vld [vmem:[%s6020_s7 + $0xc8] sm:$0xff]  ;;  %v4764_v30 = vld [vmem:[%s6020_s7 + $0x80] sm:$0xff]  ;;  %v4783_v35 = vld [vmem:[%s6020_s7 + $0x118] sm:$0xff] }
 0x299   : > { %v2208_v12 = vrot.slane %v2207_v9, 2  ;;  %v2436_v9 = vsel %vm5333_vm4, %v4267_v59, %v4268_v60  ;;  %v4263_v16 = vrot.slane %v2402_v5, 9  ;;  %v4264_v17 = vrot.slane %v2404_v6, 9  ;;  %v4793_v36 = vld [vmem:[%s6020_s7 + $0x168] sm:$0xff]  ;;  %v4772_v40 = vld [vmem:[%s6020_s7 + $0xc0] sm:$0xff]  ;;  %v4811_v48 = vld [vmem:[%s6020_s7 + $0x1f8] sm:$0xff] }
 0x29a   : > { %2796 = vmatpush.bf16.msrb.mxu3 %v4786_v61  ;;  %v2432_v18 = vsel %vm5333_vm4, %v4265_v1, %v4266_v2  ;;  %2520 = vmatpush.bf16.msrb.mxu1 %v4766_v3  ;;  %v2638_v20 = vrot.slane %v5681_v0, 2  ;;  %v2639_v21 = vrot.slane %v2631_v10, 2  ;;  %v2531_v49 = vld [vmem:[#allocation2 + $0x4] sm:$0x3]  ;;  %v4782_v52 = vld [vmem:[%s6020_s7 + $0x110] sm:$0xff]  ;;  %v4792_v53 = vld [vmem:[%s6020_s7 + $0x160] sm:$0xff] }
 0x29b   : > { %v2213_v15 = vsel %vm5175_vm8, %v2208_v12, %v2212_v13  ;;  %v4795_v12 = vld [vmem:[%s6020_s7 + $0x178] sm:$0xff]  ;;  %2618 = vmatpush.bf16.msrb.mxu2 %v4774_v14  ;;  %v2428_v29 = vsel %vm5333_vm4, %v4263_v16, %v4264_v17  ;;  %v2532_v54 = vld [vmem:[#allocation2 + $0x8] sm:$0x3]  ;;  %v2533_v60 = vld [vmem:[#allocation2 + $0xc] sm:$0x3] }
 0x29c   : > { %2241 = vst [vmem:[#allocation1 + $0x3] ss:$4 sm:$0xff] %v2213_v15  ;;  %v5701_v13 = vld [vmem:[#allocation2 + $0x10] sm:$0x7]  ;;  %v2637_v15 = vrot.slane %v5686_v4, 2  ;;  %2374 = vmatpush.bf16.msrb.mxu0 %v4748_v7  ;;  %v2649_v31 = vsel %vm560_vm0, %v5681_v0, %v2638_v20  ;;  %v2650_v56 = vsel %vm564_vm1, %v5681_v0, %v2638_v20  ;;  %v4802_v59 = vld [vmem:[%s6020_s7 + $0x1b0] sm:$0xff] }
 0x29d   : > { %v2640_v22 = vrot.slane %v5701_v13, 2  ;;  %v2678_v42 = vshrl.u32 %v2649_v31, 16  ;;  %v2681_v43 = vshll.u32 %v2649_v31, 16  ;;  %v4810_v2 = vld [vmem:[%s6020_s7 + $0x1f0] sm:$0xff]  ;;  %v2652_v7 = vrot.slane %v2650_v56, 2  ;;  %v4788_v56 = vld [vmem:[%s6020_s7 + $0x140] sm:$0xff] }
 0x29e   : > { %2797 = vmatpush.bf16.msrb.mxu3 %v4785_v11  ;;  %v2643_v28 = vsel %vm560_vm0, %v5686_v4, %v2637_v15  ;;  %2521 = vmatpush.bf16.msrb.mxu1 %v4765_v19  ;;  %v2644_v51 = vsel %vm564_vm1, %v5686_v4, %v2637_v15  ;;  %v4809_v15 = vld [vmem:[%s6020_s7 + $0x1e8] sm:$0xff] }
 0x29f   : > { %v2668_v39 = vshll.u32 %v2643_v28, 16  ;;  %2619 = vmatpush.bf16.msrb.mxu2 %v4773_v27  ;;  %v2662_v61 = vsel %vm564_vm1, %v5701_v13, %v2640_v22  ;;  %v2683_v63 = vrot.slane %v2681_v43, 7  ;;  %v2646_v5 = vrot.slane %v2644_v51, 2  ;;  %v4819_v27 = vld [vmem:[%s6020_s7 + $0x238] sm:$0xff] }
 0x2a0   : > { %2945 = vmatpush.bf16.msra.mxu0 %v4795_v12  ;;  %v4801_v12 = vld [vmem:[%s6020_s7 + $0x1a8] sm:$0xff]  ;;  %v2687_v20 = vshll.u32 %v2652_v7, 16 }
 0x2a1   : > { %v2670_v58 = vrot.slane %v2668_v39, 7  ;;  %v2674_v17 = vshll.u32 %v2646_v5, 16  ;;  %v2814_v39 = vld [vmem:[#allocation2 + $0x10] sm:$0x6] }
 0x2a2   : > { %2798 = vmatpush.bf16.msrb.mxu3 %v4784_v24  ;;  %2522 = vmatpush.bf16.msrb.mxu1 %v4764_v30  ;;  %v2811_v30 = vld [vmem:[#allocation2 + $0x4] sm:$0x6] }
 0x2a3   : > { %v2242_v34 = vld.sshfl [vmem:[#allocation1] sm:$0xff pattern:$0x73625140]  ;;  %2620 = vmatpush.bf16.msrb.mxu2 %v4772_v40  ;;  %v2689_v40 = vrot.slane %v2687_v20, 7  ;;  %v4805_v20 = vld [vmem:[%s6020_s7 + $0x1c8] sm:$0xff] }
 0x2a4   : > { %2316 = vst [vmem:[#allocation1 + $0x3] ss:$4 sm:$0xff] %v2109_v33  ;;  %2300 = vmatmul.bf16.vlgmr.msra.gmra.mxu3 %v2242_v34  ;;  %v2655_v33 = vsel %vm560_vm0, %v2631_v10, %v2639_v21  ;;  %v2661_v34 = vsel %vm560_vm0, %v5701_v13, %v2640_v22  ;;  %v2664_v13 = vrot.slane %v2662_v61, 2  ;;  %v4790_v22 = vld [vmem:[%s6020_s7 + $0x150] sm:$0xff] }
 0x2a5   : > { %2307 = vst [vmem:[#allocation1] ss:$4 sm:$0xff] %v2106_v26  ;;  %v4794_v26 = vld [vmem:[%s6020_s7 + $0x170] sm:$0xff]  ;;  %v2691_v44 = vshrl.u32 %v2655_v33, 16  ;;  %v2694_v45 = vshll.u32 %v2655_v33, 16  ;;  %v2704_v46 = vshrl.u32 %v2661_v34, 16 }
 0x2a6   : > { %2313 = vst [vmem:[#allocation1 + $0x2] ss:$4 sm:$0xff] %v2108_v41  ;;  %2946 = vmatpush.bf16.msra.mxu0 %v4794_v26  ;;  %v2656_v41 = vsel %vm564_vm1, %v2631_v10, %v2639_v21  ;;  %3043 = vmatpush.bf16.msra.mxu1 %v4803_v32  ;;  %v2707_v47 = vshll.u32 %v2661_v34, 16  ;;  %v2534_v10 = vld [vmem:[#allocation2 + $0x10] sm:$0x3]  ;;  %v4780_v21 = vld [vmem:[%s6020_s7 + $0x100] sm:$0xff] }
 0x2a7   : > { %2310 = vst [vmem:[#allocation1 + $0x1] ss:$4 sm:$0xff] %v2107_v38  ;;  %v2665_v38 = vshrl.u32 %v2643_v28, 16  ;;  %2799 = vmatpush.bf16.msrb.mxu3 %v4783_v35  ;;  %v2658_v55 = vrot.slane %v2656_v41, 2  ;;  %3225 = vmatpush.bf16.msra.mxu2 %v4811_v48  ;;  %v2693_v0 = vrot.slane %v2691_v44, 6  ;;  %v2696_v3 = vrot.slane %v2694_v45, 7 }
 0x2a8   : > { %v2706_v4 = vrot.slane %v2704_v46, 6  ;;  %v2709_v6 = vrot.slane %v2707_v47, 7  ;;  %v4800_v26 = vld [vmem:[%s6020_s7 + $0x1a0] sm:$0xff]  ;;  %v2812_v28 = vld [vmem:[#allocation2 + $0x8] sm:$0x6]  ;;  %v2676_v34 = vrot.slane %v2674_v17, 7 }
 0x2a9   : > { %v2667_v57 = vrot.slane %v2665_v38, 6  ;;  %v2697_v16 = vor.u32 %v2696_v3, %v2693_v0  ;;  %v2813_v33 = vld [vmem:[#allocation2 + $0xc] sm:$0x6]  ;;  %v4808_v35 = vld [vmem:[%s6020_s7 + $0x1e0] sm:$0xff]  ;;  %v4789_v41 = vld [vmem:[%s6020_s7 + $0x148] sm:$0xff]  ;;  %v2820_v47 = vrot.slane %v2812_v28, 2 }
 0x2aa   : > { %2947 = vmatpush.bf16.msra.mxu0 %v4793_v36  ;;  %3044 = vmatpush.bf16.msra.mxu1 %v4802_v59  ;;  %v2710_v19 = vor.u32 %v2709_v6, %v2706_v4  ;;  %v4799_v44 = vld [vmem:[%s6020_s7 + $0x198] sm:$0xff]  ;;  %v4818_v45 = vld [vmem:[%s6020_s7 + $0x230] sm:$0xff] }
 0x2ab   : > { %2800 = vmatpush.bf16.msrb.mxu3 %v4782_v52  ;;  %v2671_v11 = vor.u32 %v2670_v58, %v2667_v57  ;;  %3226 = vmatpush.bf16.msra.mxu2 %v4810_v2  ;;  %v2698_v32 = vrot.slane %v2697_v16, 2  ;;  %v2821_v52 = vrot.slane %v2813_v33, 2  ;;  %v4798_v59 = vld [vmem:[%s6020_s7 + $0x190] sm:$0xff]  ;;  %v2832_v61 = vsel %vm560_vm0, %v2812_v28, %v2820_v47  ;;  %v3062_v0 = vld [vmem:[#allocation2 + $0x14] sm:$0x7] }
 0x2ac   : > { %v2711_v38 = vrot.slane %v2710_v19, 2  ;;  %v4806_v2 = vld [vmem:[%s6020_s7 + $0x1d0] sm:$0xff]  ;;  %v3070_v16 = vrot.slane %v3062_v0, 2 }
 0x2ad   : > { %v2672_v24 = vrot.slane %v2671_v11, 2  ;;  %v3059_v3 = vld [vmem:[#allocation2 + $0x8] sm:$0x7]  ;;  %v4797_v11 = vld [vmem:[%s6020_s7 + $0x188] sm:$0xff] }
 0x2ae   : > { %v2317_v8 = vld.sshfl [vmem:[#allocation1] sm:$0xff pattern:$0x73625140]  ;;  %2948 = vmatpush.bf16.msra.mxu0 %v4792_v53  ;;  %3045 = vmatpush.bf16.msra.mxu1 %v4801_v12  ;;  %v4807_v53 = vld [vmem:[%s6020_s7 + $0x1d8] sm:$0xff]  ;;  %v3067_v19 = vrot.slane %v3059_v3, 2 }
 0x2af   : > { %2455 = vst [vmem:[#allocation1] ss:$4 sm:$0xff] %v2424_v62  ;;  %2375 = vmatmul.bf16.vlgmr.msrb.gmra.mxu0 %v2317_v8  ;;  %v2680_v62 = vrot.slane %v2678_v42, 6  ;;  %v4781_v8 = vld [vmem:[%s6020_s7 + $0x108] sm:$0xff]  ;;  %3227 = vmatpush.bf16.msra.mxu2 %v4809_v15  ;;  %v2819_v42 = vrot.slane %v2811_v30, 2  ;;  %v2677_v43 = vsel %vm5175_vm8, %v2672_v24, %v2676_v34  ;;  %v4816_v15 = vld [vmem:[%s6020_s7 + $0x220] sm:$0xff] }
 0x2b0   : > { %2464 = vst [vmem:[#allocation1 + $0x3] ss:$4 sm:$0xff] %v2436_v9  ;;  %v4791_v9 = vld [vmem:[%s6020_s7 + $0x158] sm:$0xff]  ;;  %2801 = vmatpush.bf16.msrb.mxu3 %v4781_v8  ;;  %v3060_v8 = vld [vmem:[#allocation2 + $0xc] sm:$0x7]  ;;  %v4804_v34 = vld [vmem:[%s6020_s7 + $0x1c0] sm:$0xff] }
 0x2b1   : > { %2461 = vst [vmem:[#allocation1 + $0x2] ss:$4 sm:$0xff] %v2432_v18  ;;  %v2684_v14 = vor.u32 %v2683_v63, %v2680_v62  ;;  %v2700_v18 = vshll.u32 %v2658_v55, 16  ;;  %v2822_v55 = vrot.slane %v2814_v39, 2  ;;  %v2825_v57 = vsel %vm560_vm0, %v2811_v30, %v2819_v42 }
 0x2b2   : > { %2458 = vst [vmem:[#allocation1 + $0x1] ss:$4 sm:$0xff] %v2428_v29  ;;  %2949 = vmatpush.bf16.msra.mxu0 %v4791_v9  ;;  %v2713_v29 = vshll.u32 %v2664_v13, 16  ;;  %3046 = vmatpush.bf16.msra.mxu1 %v4800_v26  ;;  %v2827_v58 = vsel %vm564_vm1, %v2811_v30, %v2819_v42  ;;  %v2834_v62 = vsel %vm564_vm1, %v2812_v28, %v2820_v47  ;;  %v4413_v6 = vrot.slane %v2825_v57, 9  ;;  %v4796_v28 = vld [vmem:[%s6020_s7 + $0x180] sm:$0xff]  ;;  %v4815_v30 = vld [vmem:[%s6020_s7 + $0x218] sm:$0xff] }
 0x2b3   : > { %v2685_v31 = vrot.slane %v2684_v14, 2  ;;  %v2702_v36 = vrot.slane %v2700_v18, 7  ;;  %3228 = vmatpush.bf16.msra.mxu2 %v4808_v35  ;;  %v2839_v63 = vsel %vm560_vm0, %v2813_v33, %v2821_v52  ;;  %v2846_v4 = vsel %vm560_vm0, %v2814_v39, %v2822_v55  ;;  %v3061_v14 = vld [vmem:[#allocation2 + $0x10] sm:$0x7]  ;;  %v4814_v42 = vld [vmem:[%s6020_s7 + $0x210] sm:$0xff] }
 0x2b4   : > { %2802 = vmatpush.bf16.msrb.mxu3 %v4780_v21  ;;  %v2715_v46 = vrot.slane %v2713_v29, 7  ;;  %v2848_v5 = vsel %vm564_vm1, %v2814_v39, %v2822_v55  ;;  %v4414_v7 = vrot.slane %v2827_v58, 9  ;;  %v4415_v9 = vrot.slane %v2832_v61, 9  ;;  %v4813_v58 = vld [vmem:[%s6020_s7 + $0x208] sm:$0xff] }
 0x2b5   : > { %v2703_v51 = vsel %vm5175_vm8, %v2698_v32, %v2702_v36  ;;  %v4417_v12 = vrot.slane %v2839_v63, 9  ;;  %v4419_v17 = vrot.slane %v2846_v4, 9  ;;  %v4420_v18 = vrot.slane %v2848_v5, 9 }
 0x2b6   : > { %2950 = vmatpush.bf16.msra.mxu0 %v4790_v22  ;;  %3047 = vmatpush.bf16.msra.mxu1 %v4799_v44  ;;  %v3068_v21 = vrot.slane %v3060_v8, 2  ;;  %v2854_v22 = vsel %vm5333_vm4, %v4413_v6, %v4414_v7  ;;  %v3069_v26 = vrot.slane %v3061_v14, 2  ;;  %v4812_v7 = vld [vmem:[%s6020_s7 + $0x200] sm:$0xff] }
 0x2b7   : > { %3229 = vmatpush.bf16.msra.mxu2 %v4807_v53  ;;  %v2866_v32 = vsel %vm5333_vm4, %v4419_v17, %v4420_v18  ;;  %v3241_v18 = vld [vmem:[#allocation2 + $0x8] sm:$0x6] }
 0x2b8   : > { %3375 = vmatpush.bf16.msra.mxu3 %v4819_v27  ;;  %v3079_v35 = vsel %vm560_vm0, %v3060_v8, %v3068_v21  ;;  %v3085_v36 = vsel %vm560_vm0, %v3061_v14, %v3069_v26  ;;  %v3080_v55 = vsel %vm564_vm1, %v3060_v8, %v3068_v21 }
 0x2b9   : > { %v2465_v1 = vld.sshfl [vmem:[#allocation1] sm:$0xff pattern:$0x73625140]  ;;  %v3111_v44 = vshll.u32 %v3079_v35, 16  ;;  %v3082_v4 = vrot.slane %v3080_v55, 2 }
 0x2ba   : > { %2523 = vmatmul.bf16.vlgmr.msrb.gmra.mxu1 %v2465_v1  ;;  %2553 = vst [vmem:[#allocation1] ss:$4 sm:$0xff] %v2531_v49  ;;  %v2690_v49 = vsel %vm5175_vm8, %v2685_v31, %v2689_v40  ;;  %2951 = vmatpush.bf16.msra.mxu0 %v4789_v41  ;;  %v2841_v1 = vsel %vm564_vm1, %v2813_v33, %v2821_v52  ;;  %v2964_v52 = vld [vmem:[#allocation2 + $0x14] sm:$0x3] }
 0x2bb   : > { %2556 = vst [vmem:[#allocation1 + $0x1] ss:$4 sm:$0xff] %v2532_v54  ;;  %v2716_v54 = vsel %vm5175_vm8, %v2711_v38, %v2715_v46  ;;  %3048 = vmatpush.bf16.msra.mxu1 %v4798_v59  ;;  %v4418_v13 = vrot.slane %v2841_v1, 9  ;;  %3230 = vmatpush.bf16.msra.mxu2 %v4806_v2  ;;  %v3091_v31 = vsel %vm560_vm0, %v3062_v0, %v3070_v16  ;;  %v3124_v46 = vshll.u32 %v3085_v36, 16 }
 0x2bc   : > { %2559 = vst [vmem:[#allocation1 + $0x2] ss:$4 sm:$0xff] %v2533_v60  ;;  %3376 = vmatpush.bf16.msra.mxu3 %v4818_v45  ;;  %v4817_v60 = vld [vmem:[%s6020_s7 + $0x228] sm:$0xff]  ;;  %v3073_v33 = vsel %vm560_vm0, %v3059_v3, %v3067_v19  ;;  %v3092_v38 = vsel %vm564_vm1, %v3062_v0, %v3070_v16  ;;  %v3134_v39 = vshrl.u32 %v3091_v31, 16  ;;  %v3121_v45 = vshrl.u32 %v3085_v36, 16 }
 0x2bd   : > { %2562 = vst [vmem:[#allocation1 + $0x3] ss:$4 sm:$0xff] %v2534_v10  ;;  %v4416_v10 = vrot.slane %v2834_v62, 9  ;;  %v2862_v29 = vsel %vm5333_vm4, %v4417_v12, %v4418_v13  ;;  %v3095_v40 = vshrl.u32 %v3073_v33, 16  ;;  %v3098_v41 = vshll.u32 %v3073_v33, 16 }
 0x2be   : > { %2952 = vmatpush.bf16.msra.mxu0 %v4788_v56  ;;  %v3094_v47 = vrot.slane %v3092_v38, 2  ;;  %v3136_v53 = vrot.slane %v3134_v39, 6  ;;  %v3113_v62 = vrot.slane %v3111_v44, 7  ;;  %v3123_v1 = vrot.slane %v3121_v45, 6 }
 0x2bf   : > { %v2858_v27 = vsel %vm5333_vm4, %v4415_v9, %v4416_v10  ;;  %3049 = vmatpush.bf16.msra.mxu1 %v4797_v11  ;;  %3231 = vmatpush.bf16.msra.mxu2 %v4805_v20  ;;  %v3097_v56 = vrot.slane %v3095_v40, 6  ;;  %v3100_v57 = vrot.slane %v3098_v41, 7  ;;  %v3126_v2 = vrot.slane %v3124_v46, 7  ;;  %v3244_v20 = vld [vmem:[#allocation2 + $0x14] sm:$0x6] }
 0x2c0   : > { %3377 = vmatpush.bf16.msra.mxu3 %v4817_v60  ;;  %v3086_v60 = vsel %vm564_vm1, %v3061_v14, %v3069_v26  ;;  %v3143_v9 = vshll.u32 %v3094_v47, 16  ;;  %v3117_v13 = vshll.u32 %v3082_v4, 16  ;;  %v3252_v33 = vrot.slane %v3244_v20, 2 }
 0x2c1   : > { %v3088_v5 = vrot.slane %v3086_v60, 2  ;;  %v3101_v6 = vor.u32 %v3100_v57, %v3097_v56  ;;  %v3127_v11 = vor.u32 %v3126_v2, %v3123_v1 }
 0x2c2   : > { %v3145_v17 = vrot.slane %v3143_v9, 7  ;;  %v3119_v26 = vrot.slane %v3117_v13, 7  ;;  %v3276_v41 = vsel %vm560_vm0, %v3244_v20, %v3252_v33 }
 0x2c3   : > { %3050 = vmatpush.bf16.msra.mxu1 %v4796_v28  ;;  %3232 = vmatpush.bf16.msra.mxu2 %v4804_v34  ;;  %v3130_v14 = vshll.u32 %v3088_v5, 16  ;;  %v3128_v21 = vrot.slane %v3127_v11, 2  ;;  %v4571_v47 = vrot.slane %v3276_v41, 9  ;;  %v4821_v41 = vld [vmem:[%s6022_s9 + $0x8] sm:$0xff] }
 0x2c4   : > { %v2563_v48 = vld.sshfl [vmem:[#allocation1] sm:$0xff pattern:$0x73625140]  ;;  %3378 = vmatpush.bf16.msra.mxu3 %v4816_v15  ;;  %v3102_v15 = vrot.slane %v3101_v6, 2 }
 0x2c5   : > { %2621 = vmatmul.bf16.vlgmr.msrb.gmra.mxu2 %v2563_v48  ;;  %2735 = vst [vmem:[#allocation1] ss:$4 sm:$0xff] %v2677_v43  ;;  %v3137_v43 = vshll.u32 %v3091_v31, 16  ;;  %v3108_v48 = vshrl.u32 %v3079_v35, 16  ;;  %v3132_v28 = vrot.slane %v3130_v14, 7 }
 0x2c6   : > { %2738 = vst [vmem:[#allocation1 + $0x1] ss:$4 sm:$0xff] %v2690_v49  ;;  %v2961_v49 = vld [vmem:[#allocation2 + $0x8] sm:$0x3] }
 0x2c7   : > { %2741 = vst [vmem:[#allocation1 + $0x2] ss:$4 sm:$0xff] %v2703_v51  ;;  %v3074_v51 = vsel %vm564_vm1, %v3059_v3, %v3067_v19  ;;  %v3139_v59 = vrot.slane %v3137_v43, 7  ;;  %v3110_v61 = vrot.slane %v3108_v48, 6  ;;  %v2963_v3 = vld [vmem:[#allocation2 + $0x10] sm:$0x3]  ;;  %v3133_v36 = vsel %vm5175_vm8, %v3128_v21, %v3132_v28 }
 0x2c8   : > { %2744 = vst [vmem:[#allocation1 + $0x3] ss:$4 sm:$0xff] %v2716_v54  ;;  %3379 = vmatpush.bf16.msra.mxu3 %v4815_v30  ;;  %v2962_v54 = vld [vmem:[#allocation2 + $0xc] sm:$0x3]  ;;  %v3076_v0 = vrot.slane %v3074_v51, 2 }
 0x2c9   : > { %v3140_v8 = vor.u32 %v3139_v59, %v3136_v53  ;;  %v3114_v10 = vor.u32 %v3113_v62, %v3110_v61 }
 0x2ca   : > { %v3104_v12 = vshll.u32 %v3076_v0, 16  ;;  %v4827_v0 = vld [vmem:[%s6022_s9 + $0x38] sm:$0xff] }
 0x2cb   : > { %v3141_v16 = vrot.slane %v3140_v8, 2  ;;  %v3115_v19 = vrot.slane %v3114_v10, 2  ;;  %3487 = vmatpush.bf16.msrb.mxu0 %v4827_v0  ;;  %v4826_v8 = vld [vmem:[%s6022_s9 + $0x30] sm:$0xff] }
 0x2cc   : > { %3380 = vmatpush.bf16.msra.mxu3 %v4814_v42  ;;  %v3278_v42 = vsel %vm564_vm1, %v3244_v20, %v3252_v33 }
 0x2cd   : > { %v3120_v34 = vsel %vm5175_vm8, %v3115_v19, %v3119_v26  ;;  %v4824_v19 = vld [vmem:[%s6022_s9 + $0x20] sm:$0xff] }
 0x2cf   : > { %v2745_v24 = vld.sshfl [vmem:[#allocation1] sm:$0xff pattern:$0x73625140]  ;;  %3488 = vmatpush.bf16.msrb.mxu0 %v4826_v8 }
 0x2d0   : > { %2803 = vmatmul.bf16.vlgmr.msrb.gmra.mxu3 %v2745_v24  ;;  %2885 = vst [vmem:[#allocation1] ss:$4 sm:$0xff] %v2854_v22  ;;  %v3242_v22 = vld [vmem:[#allocation2 + $0xc] sm:$0x6]  ;;  %v3106_v24 = vrot.slane %v3104_v12, 7  ;;  %v4825_v12 = vld [vmem:[%s6022_s9 + $0x28] sm:$0xff] }
 0x2d1   : > { %2888 = vst [vmem:[#allocation1 + $0x1] ss:$4 sm:$0xff] %v2858_v27  ;;  %3381 = vmatpush.bf16.msra.mxu3 %v4813_v58  ;;  %v3243_v27 = vld [vmem:[#allocation2 + $0x10] sm:$0x6]  ;;  %v3250_v35 = vrot.slane %v3242_v22, 2 }
 0x2d2   : > { %2891 = vst [vmem:[#allocation1 + $0x2] ss:$4 sm:$0xff] %v2862_v29  ;;  %v3249_v29 = vrot.slane %v3241_v18, 2  ;;  %v3107_v30 = vsel %vm5175_vm8, %v3102_v15, %v3106_v24  ;;  %v3251_v38 = vrot.slane %v3243_v27, 2 }
 0x2d3   : > { %2894 = vst [vmem:[#allocation1 + $0x3] ss:$4 sm:$0xff] %v2866_v32  ;;  %v3146_v32 = vsel %vm5175_vm8, %v3141_v16, %v3145_v17  ;;  %v3262_v43 = vsel %vm560_vm0, %v3242_v22, %v3250_v35  ;;  %v3264_v48 = vsel %vm564_vm1, %v3242_v22, %v3250_v35  ;;  %3489 = vmatpush.bf16.msrb.mxu0 %v4825_v12  ;;  %v4823_v22 = vld [vmem:[%s6022_s9 + $0x18] sm:$0xff]  ;;  %v3397_v35 = vunpack.c.l.bf16 %v5555_v23 }
 0x2d4   : > { %v3255_v39 = vsel %vm560_vm0, %v3241_v18, %v3249_v29  ;;  %v3257_v40 = vsel %vm564_vm1, %v3241_v18, %v3249_v29  ;;  %v3269_v44 = vsel %vm560_vm0, %v3243_v27, %v3251_v38  ;;  %v3271_v37 = vsel %vm564_vm1, %v3243_v27, %v3251_v38  ;;  %v4885_v27 = vld [vmem:[%s6021_s8] ss:$0 sm:$0xff] }
 0x2d5   : > { %3382 = vmatpush.bf16.msra.mxu3 %v4812_v7  ;;  %v4565_v45 = vrot.slane %v3255_v39, 9  ;;  %v4566_v46 = vrot.slane %v3257_v40, 9  ;;  %v4567_v51 = vrot.slane %v3262_v43, 9  ;;  %v4569_v53 = vrot.slane %v3269_v44, 9 }
 0x2d7   : > { %v3284_v55 = vsel %vm5333_vm4, %v4565_v45, %v4566_v46  ;;  %3490 = vmatpush.bf16.msrb.mxu0 %v4824_v19  ;;  %v3398_v46 = vunpack.c.l.bf16 %v5557_v25 }
 0x2da   : > { %v2895_v63 = vld.sshfl [vmem:[#allocation1] sm:$0xff pattern:$0x73625140] }
 0x2db   : > { %2953 = vmatmul.bf16.vlgmr.msra.gmra.mxu0 %v2895_v63  ;;  %2983 = vst [vmem:[#allocation1] ss:$4 sm:$0xff] %v2961_v49  ;;  %v4572_v49 = vrot.slane %v3278_v42, 9 }
 0x2dc   : > { %2986 = vst [vmem:[#allocation1 + $0x1] ss:$4 sm:$0xff] %v2962_v54  ;;  %v4570_v54 = vrot.slane %v3271_v37, 9  ;;  %3491 = vmatpush.bf16.msrb.mxu0 %v4823_v22  ;;  %v4820_v37 = vld [vmem:[%s6022_s9] sm:$0xff] }
 0x2dd   : > { %2989 = vst [vmem:[#allocation1 + $0x2] ss:$4 sm:$0xff] %v2963_v3  ;;  %v3296_v57 = vsel %vm5333_vm4, %v4571_v47, %v4572_v49 }
 0x2de   : > { %2992 = vst [vmem:[#allocation1 + $0x3] ss:$4 sm:$0xff] %v2964_v52  ;;  %v4568_v52 = vrot.slane %v3264_v48, 9  ;;  %v3292_v59 = vsel %vm5333_vm4, %v4569_v53, %v4570_v54 }
 0x2e0   : > { %v3288_v58 = vsel %vm5333_vm4, %v4567_v51, %v4568_v52 }
 0x2e5   : > { %v2993_v31 = vld.sshfl [vmem:[#allocation1] sm:$0xff pattern:$0x73625140] }
 0x2e6   : > { %3051 = vmatmul.bf16.vlgmr.msra.gmra.mxu1 %v2993_v31  ;;  %3165 = vst [vmem:[#allocation1] ss:$4 sm:$0xff] %v3107_v30  ;;  %v4822_v31 = vld [vmem:[%s6022_s9 + $0x10] sm:$0xff] }
 0x2e7   : > { %3168 = vst [vmem:[#allocation1 + $0x1] ss:$4 sm:$0xff] %v3120_v34  ;;  %3492 = vmatpush.bf16.msrb.mxu0 %v4822_v31 }
 0x2e8   : > { %3171 = vst [vmem:[#allocation1 + $0x2] ss:$4 sm:$0xff] %v3133_v36  ;;  %v5013_v36 = vmov 16.0  }
 0x2e9   : > { %3174 = vst [vmem:[#allocation1 + $0x3] ss:$4 sm:$0xff] %v3146_v32  ;;  %4886 = vrcp.f32 %v5013_v36 }
 0x2eb   : > { %3493 = vmatpush.bf16.msrb.mxu0 %v4821_v41 }
 0x2ef   : > { %v4887_v44 = vpop.eup %4886  ;;  %3494 = vmatpush.bf16.msrb.mxu0 %v4820_v37 }
 0x2f0   : > { %v3175_v56 = vld.sshfl [vmem:[#allocation1] sm:$0xff pattern:$0x73625140]  ;;  %v3413_v47 = vmul.f32 16.0, %v4887_v44  ;;  %vm3417_vm0 = vweird.f32 %v4887_v44 }
 0x2f1   : > { %3233 = vmatmul.bf16.vlgmr.msra.gmra.mxu2 %v3175_v56  ;;  %3315 = vst [vmem:[#allocation1] ss:$4 sm:$0xff] %v3284_v55 }
 0x2f2   : > { %3318 = vst [vmem:[#allocation1 + $0x1] ss:$4 sm:$0xff] %v3288_v58  ;;  %v3414_v52 = vsub.f32 1.0, %v3413_v47 }
 0x2f3   : > { %3321 = vst [vmem:[#allocation1 + $0x2] ss:$4 sm:$0xff] %v3292_v59 }
 0x2f4   : > { %3324 = vst [vmem:[#allocation1 + $0x3] ss:$4 sm:$0xff] %v3296_v57  ;;  %v3415_v55 = vmul.f32 %v4887_v44, %v3414_v52 }
 0x2f6   : > { %v3416_v58 = vadd.f32 %v4887_v44, %v3415_v55 }
 0x2f8   : > { %v3418_v25 = vsel %vm3417_vm0, %v4887_v44, %v3416_v58 }
 0x2fb   : > { %v3325_v60 = vld.sshfl [vmem:[#allocation1] sm:$0xff pattern:$0x73625140] }
 0x2fc   : > { %3383 = vmatmul.bf16.vlgmr.msra.gmra.mxu3 %v3325_v60 }
 0x327   : > { %v2301_v61 = vpop.f32.mrf.mxu3 }
 0x32c   : > { %v2376_v62 = vpop.f32.mrf.mxu0 }
 0x32d   : > { %v2377_v50 = vadd.f32 %v2376_v62, %v2301_v61 }
 0x32f   : > { %v2303_v63 = vpop.f32.mrf.mxu3 }
 0x334   : > { %v2378_v3 = vpop.f32.mrf.mxu0 }
 0x335   : > { %v2379_v15 = vadd.f32 %v2378_v3, %v2303_v63 }
 0x337   : > { %v2524_v1 = vpop.f32.mrf.mxu1 }
 0x338   : > { %v2529_v7 = vadd.f32 %v2524_v1, %v2377_v50 }
 0x33f   : > { %v2526_v5 = vpop.f32.mrf.mxu1 }
 0x340   : > { %v2530_v17 = vadd.f32 %v2526_v5, %v2379_v15 }
 0x348   : > { %v2622_v2 = vpop.f32.mrf.mxu2 }
 0x349   : > { %v2627_v9 = vadd.f32 %v2622_v2, %v2529_v7 }
 0x350   : > { %v2624_v6 = vpop.f32.mrf.mxu2 }
 0x351   : > { %v2628_v20 = vadd.f32 %v2624_v6, %v2530_v17 }
 0x353   : > { %v2804_v4 = vpop.f32.mrf.mxu3 }
 0x354   : > { %v2809_v11 = vadd.f32 %v2804_v4, %v2627_v9 }
 0x358   : > { %v2954_v10 = vpop.f32.mrf.mxu0 }
 0x359   : > { %v2959_v18 = vadd.f32 %v2954_v10, %v2809_v11 }
 0x35b   : > { %v2806_v13 = vpop.f32.mrf.mxu3 }
 0x35c   : > { %v2810_v24 = vadd.f32 %v2806_v13, %v2628_v20 }
 0x360   : > { %v2956_v28 = vpop.f32.mrf.mxu0 }
 0x361   : > { %v2960_v33 = vadd.f32 %v2956_v28, %v2810_v24 }
 0x363   : > { %v3052_v14 = vpop.f32.mrf.mxu1 }
 0x364   : > { %v3057_v21 = vadd.f32 %v3052_v14, %v2959_v18 }
 0x36b   : > { %v3054_v32 = vpop.f32.mrf.mxu1 }
 0x36c   : > { %v3058_v39 = vadd.f32 %v3054_v32, %v2960_v33 }
 0x374   : > { %v3234_v16 = vpop.f32.mrf.mxu2 }
 0x375   : > { %v3239_v26 = vadd.f32 %v3234_v16, %v3057_v21 }
 0x37c   : > { %v3236_v38 = vpop.f32.mrf.mxu2 }
 0x37d   : > { %v3240_v42 = vadd.f32 %v3236_v38, %v3058_v39 }
 0x37f   : > { %v3384_v29 = vpop.f32.mrf.mxu3 }
 0x380   : > { %v3389_v30 = vadd.f32 %v3384_v29, %v3239_v26 }
 0x382   : > { %v3395_v34 = vadd.f32 %v4885_v27, %v3389_v30 }
 0x384   : > { %v3399_v40 = vadd.f32 %v3397_v35, %v3395_v34 }
 0x386   : > { %v3401_v43 = vmax.f32 %v3399_v40, 0.0 }
 0x387   : > { %v3386_v48 = vpop.f32.mrf.mxu3 }
 0x388   : > { %3403 = vst [vmem:[%s5932_s17] sm:$0xff] %v3401_v43  ;;  %v3390_v23 = vadd.f32 %v3386_v48, %v3240_v42 }
 0x38a   : > { %v3396_v45 = vadd.f32 %v4885_v27, %v3390_v23 }
 0x38c   : > { %v3400_v49 = vadd.f32 %v3398_v46, %v3396_v45 }
 0x38e   : > { %v3402_v51 = vmax.f32 %v3400_v49, 0.0 }
 0x390   : > { %3404 = vst [vmem:[%s5932_s17 + $0x8] sm:$0xff] %v3402_v51  ;;  %v3405_v53 = vadd.f32 %v3402_v51, %v3401_v43 }
 0x392   : > { %v3406_v54 = vrot.slane %v3405_v53, 4 }
 0x394   : > { %v3407_v56 = vadd.f32 %v3406_v54, %v3405_v53 }
 0x396   : > { %v3408_v57 = vrot.slane %v3407_v56, 2 }
 0x398   : > { %v3409_v59 = vadd.f32 %v3408_v57, %v3407_v56 }
 0x39a   : > { %v3410_v60 = vrot.slane %v3409_v59, 1 }
 0x39c   : > { %v3411_v61 = vadd.f32 %v3410_v60, %v3409_v59 }
 0x39e   : > { %v3419_v62 = vmul.f32 %v3418_v25, %v3411_v61 }
 0x3a0   : > { %v3421_v63 = vpack.c.bf16 %v3419_v62, %v3419_v62  ;;  %3420 = vst [vmem:[%s443_s15] sm:$0x1] %v3419_v62 }
 0x3a2   : > { %3495 = vmatmul.bf16.vlgmr.msrb.gmra.mxu0 %v3421_v63 }
 0x3a3   : > { %4915 = shalt.err (!%p4912_p3)
}
 0x3a4   : > { %4830 = dma.vmem_to_hbm [thread:$0]  (%p5126_p5), %s3539_s23, 16, %s3541_s27, %s5947_s24  }
 0x3a5   : > { %s4828_s17 = sshll.u32 %s5107_s29, 4  ;;  %s3502_s0 = scalar_lea.sflag [#allocation4], %s5922_s20 }
 0x3a6   : > { %s3521_s2 = scalar_lea.hbm %s6024_s11, %s4828_s17  ;;  %s4936_s23 = scalar_lea.hbm %s6024_s11, 32 }
 0x3a7   : > { %s3524_s3 = sshll.u32 %s3521_s2, 4  ;;  %s3525_s3 = int_to_ptr.hbm [resolvable:$true] %s3524_s3 }
 0x3a8   : > { %s4930_s1 = sshra.s32 %s3525_s3, 4  ;;  %s4931_s1 = int_to_ptr.hbm [resolvable:$true] %s4930_s1 }
 0x3a9   : > { %s4932_s4 = scalar_lea.hbm %s4931_s1, 16  ;;  %p4937_p9 = scmp.lt.s32.totalorder %s4931_s1, %s6024_s11 }
 0x3aa   : > { %p4933_p4 = scmp.ne.s32.totalorder %s4931_s1, %s4932_s4  ;;  %p4938_p10 = scmp.lt.s32.totalorder %s4936_s23, %s4932_s4 }
 0x3ac   : > { %p4934_p7 = pnand %p4933_p4, %p5126_p5  ;;  %p4939_p11 = por %p4938_p10, %p4937_p9 }
 0x3ae   : > { %p4935_p8 = pneg %p4934_p7 }
 0x3b0   : > { %p4940_p12 = pnand %p4939_p11, %p4935_p8 }
 0x3b2   : > { %4943 = shalt.err (!%p4940_p12)
}
 0x3b3   : > { %s5014_s17 = smov 128   ;;  %s5015_s15 = smov 8   ;;  %v3438_v1 = vld [vmem:[%s6023_s10] sm:$0x1] }
 0x3b4   : > { %4829 = dma.vmem_to_hbm [thread:$0]  (%p5126_p5), %s3523_s14, 256, %s3525_s3, %s3502_s0, %s5014_s17, %s5014_s17, %s5015_s15  }
 0x3b5   : > { %s3549_s30 = scalar_lea.hbm %s6026_s13, %s5107_s29  ;;  %s449_s1 = scalar_lea.vmem [#allocation7], %s5922_s20 }
 0x3b6   : > { %s3551_s4 = sshll.u32 %s449_s1, 4  ;;  %s3553_s23 = sshll.u32 %s3549_s30, 4  ;;  %s3552_s4 = int_to_ptr.vmem [resolvable:$true] %s3551_s4  ;;  %s3554_s23 = int_to_ptr.hbm [resolvable:$true] %s3553_s23 }
 0x3b7   : > { %s4958_s27 = sshra.s32 %s3554_s23, 4  ;;  %s4964_s5 = scalar_lea.hbm %s6026_s13, 2  ;;  %s4959_s27 = int_to_ptr.hbm [resolvable:$true] %s4958_s27 }
 0x3b8   : > { %s4960_s22 = scalar_lea.hbm %s4959_s27, 1  ;;  %p4965_p2 = scmp.lt.s32.totalorder %s4959_s27, %s6026_s13 }
 0x3b9   : > { %p4961_p13 = scmp.ne.s32.totalorder %s4959_s27, %s4960_s22  ;;  %p4966_p3 = scmp.lt.s32.totalorder %s4964_s5, %s4960_s22 }
 0x3bb   : > { %p4962_p0 = pnand %p4961_p13, %p5126_p5  ;;  %p4967_p4 = por %p4966_p3, %p4965_p2 }
 0x3bd   : > { %p4963_p1 = pneg %p4962_p0 }
 0x3bf   : > { %p4968_p7 = pnand %p4967_p4, %p4963_p1 }
 0x41f   : > { %v3496_v2 = vpop.f32.mrf.mxu0 }
 0x420   : > { %v3497_v0 = vadd.f32 %v3496_v2, %v3438_v1 }
 0x422   : > { %3500 = vst [vmem:[%s449_s1] sm:$0x1] %v3497_v0 }
 0x423   : > { %4971 = shalt.err (!%p4968_p7)
}
 0x424   : > { %4831 = dma.vmem_to_hbm [thread:$0]  (%p5126_p5), %s3552_s4, 16, %s3554_s23, %s5947_s24  }
 0x427   : > { %v3498_v3 = vpop.f32.mrf.mxu0 }
 0x428 PF: > { %p4845_p8 = scmp.ge.s32.totalorder %s5010_s28, 2  ;;  %s3565_s0 = sand.u32 1, %s4998_s25  }
 0x429   : > { %s3566_s17 = scalar_lea.sflag [#allocation4], %s3565_s0 }
 0x42a   : > { %p4836_p9 = pnand %p4845_p8, %p5130_p6 }
 0x42c   : > { %p4837_p10 = pneg %p4836_p9 }
 0x42e   : > { %4989 = dma.done.wait (%p4837_p10), %s3566_s17, 256  }
 0x42f   : > { %4991 = vsyncadd (%p4837_p10), %s3566_s17, 4294967040  ;;  %s6056_s15 = sadd.s32 4294967294, %s5010_s28  }
 0x430   : > { %s3575_s16 = sand.u32 1, %s6056_s15  }
 0x431   : > { %s3576_s2 = scalar_lea.sflag [#allocation6], %s3575_s16 }
 0x432   : > { %4993 = dma.done.wait (%p4837_p10), %s3576_s2, 32  }
 0x433   : > { %4995 = vsyncadd (%p4837_p10), %s3576_s2, 4294967264  ;;  %s6057_s28 = sld [smem:[#allocation11_spill]]  ;;  %s6060_s25 = smov %s5002_s26 }
 0x434   : > { %s6058_s18 = sld [smem:[#allocation10_spill]] }
 0x435   : > { %s6059_s27 = sld [smem:[#allocation12_spill]] }
 0x439   : > { %p27_p5 = scmp.ge.s32.totalorder %s6057_s28, 4  }
 0x43a   : > { %s6061_s26 = smov %s6058_s18 }
 0x43b   :  { %29 = sbr.rel (!%p27_p5) target bundleno = 12 (0xc), region = 209 }
 0x440   :  { %3590 = vsyncpa [#allocation4], 1 }
 0x441   :  { %3592 = vsyncpa [#allocation4 + $0x1], 1 }
 0x442   :  { %3593 = vsyncpa [#allocation6], 1 }
 0x443   :  { %3595 = vsyncpa [#allocation6 + $0x1], 1 }

</bundles_post_ra>
